<compile_context>
chip_gen: v7x
topology: tpu7x:2x2x1
jax: 0.10.0
libtpu: 0.0.40
codegen_flags: <defaults>
</compile_context>

<pallas_src>
import functools

import jax
import jax.numpy as jnp
from jax import lax
from jax.experimental import pallas as pl
from jax.experimental.pallas import tpu as pltpu

EPS = 1e-5                      # PyTorch BatchNorm2d default eps
LANE = 128                      # TPU vreg lane width
MXU_DTYPE = jnp.bfloat16        # MXU operand dtype (f32 accumulation)
VMEM_LIMIT = 32 * 1024 * 1024   # explicit scoped-VMEM limit (safe on v5e/v6e/v7x)


def _round_up(x, m):
    return ((x + m - 1) // m) * m


def _pad_rows(a, mult):
    pad = (-a.shape[0]) % mult
    if pad:
        a = jnp.pad(a, ((0, pad),) + ((0, 0),) * (a.ndim - 1))
    return a


def _pad_vec(v, cp):
    return jnp.pad(v, (0, cp - v.shape[0])).reshape(1, cp).astype(jnp.float32)


def _bn_scale_bias(ssum, ssq, count, gamma, beta):
    """Fold batch-stat BN into per-channel scale/bias (all shapes (1, Cp))."""
    mean = ssum / count
    var = jnp.maximum(ssq / count - mean * mean, 0.0)   # biased variance
    scale = gamma * lax.rsqrt(var + EPS)
    bias = beta - mean * scale
    return scale, bias


# ----------------------------------------------------------------------------
# Kernel 1: 3x3 conv (stride 1 or 2) + per-channel partial sum / sumsq.
# Grid over batch images; each step writes its own stats block ("parallel").
# ----------------------------------------------------------------------------
def _make_conv3x3_stats_kernel(stride, ho, wo):
    def kernel(x_ref, w_ref, y_ref, sum_ref, sq_ref):
        cin = x_ref.shape[-1]
        cout = w_ref.shape[-1]
        acc = jnp.zeros((ho * wo, cout), jnp.float32)
        for di in range(3):
            for dj in range(3):
                if stride == 1:
                    patch = x_ref[0, pl.ds(di, ho), pl.ds(dj, wo), :]
                else:  # stride 2: polyphase layout (N, 4, Hh, Wh, C)
                    phase = (di % 2) * 2 + (dj % 2)
                    patch = x_ref[0, phase, pl.ds(di // 2, ho),
                                  pl.ds(dj // 2, wo), :]
                patch = patch.reshape(ho * wo, cin)
                acc = acc + jnp.dot(patch, w_ref[di * 3 + dj],
                                    preferred_element_type=jnp.float32)
        y_ref[...] = acc.reshape(y_ref.shape)
        sum_ref[...] = jnp.sum(acc, axis=0).reshape(1, 1, cout)
        sq_ref[...] = jnp.sum(acc * acc, axis=0).reshape(1, 1, cout)

    return kernel


def _conv3x3_stats(x1, w1, stride, n, ho, wo, cout_p):
    cin_p = x1.shape[-1]
    x_block = (1,) + x1.shape[1:]
    if stride == 1:
        x_index = lambda i: (i, 0, 0, 0)
    else:
        x_index = lambda i: (i, 0, 0, 0, 0)

    flops = 2 * n * ho * wo * 9 * cin_p * cout_p
    bytes_acc = x1.size * 2 + w1.size * 2 + n * ho * wo * cout_p * 4

    y, psum, psq = pl.pallas_call(
        _make_conv3x3_stats_kernel(stride, ho, wo),
        out_shape=(
            jax.ShapeDtypeStruct((n, ho, wo, cout_p), jnp.float32),
            jax.ShapeDtypeStruct((n, 1, cout_p), jnp.float32),
            jax.ShapeDtypeStruct((n, 1, cout_p), jnp.float32),
        ),
        grid=(n,),
        in_specs=[
            pl.BlockSpec(x_block, x_index),
            pl.BlockSpec(w1.shape, lambda i: (0, 0, 0)),
        ],
        out_specs=(
            pl.BlockSpec((1, ho, wo, cout_p), lambda i: (i, 0, 0, 0)),
            pl.BlockSpec((1, 1, cout_p), lambda i: (i, 0, 0)),
            pl.BlockSpec((1, 1, cout_p), lambda i: (i, 0, 0)),
        ),
        compiler_params=pltpu.CompilerParams(
            dimension_semantics=("parallel",),   # disjoint outputs per step
            vmem_limit_bytes=VMEM_LIMIT,
        ),
        cost_estimate=pl.CostEstimate(flops=flops, transcendentals=0,
                                      bytes_accessed=bytes_acc),
    )(x1, w1)
    return y, jnp.sum(psum, axis=0), jnp.sum(psq, axis=0)


# ----------------------------------------------------------------------------
# Kernel 2: plain matmul (1x1 shortcut conv) + partial sum / sumsq, M-tiled.
# ----------------------------------------------------------------------------
def _matmul_stats_kernel(x_ref, w_ref, y_ref, sum_ref, sq_ref):
    cout = w_ref.shape[-1]
    y = jnp.dot(x_ref[...], w_ref[...], preferred_element_type=jnp.float32)
    y_ref[...] = y
    sum_ref[...] = jnp.sum(y, axis=0).reshape(1, 1, cout)
    sq_ref[...] = jnp.sum(y * y, axis=0).reshape(1, 1, cout)


def _matmul_stats(x_flat, w_mat):
    m, cin_p = x_flat.shape
    cout_p = w_mat.shape[1]
    tile_m = 256 if m >= 256 else m
    x_flat = _pad_rows(x_flat, tile_m)     # zero rows: no effect on sum/sumsq
    m_pad = x_flat.shape[0]
    n_tiles = m_pad // tile_m

    flops = 2 * m_pad * cin_p * cout_p
    bytes_acc = x_flat.size * 2 + w_mat.size * 2 + m_pad * cout_p * 4

    y, psum, psq = pl.pallas_call(
        _matmul_stats_kernel,
        out_shape=(
            jax.ShapeDtypeStruct((m_pad, cout_p), jnp.float32),
            jax.ShapeDtypeStruct((n_tiles, 1, cout_p), jnp.float32),
            jax.ShapeDtypeStruct((n_tiles, 1, cout_p), jnp.float32),
        ),
        grid=(n_tiles,),
        in_specs=[
            pl.BlockSpec((tile_m, cin_p), lambda i: (i, 0)),
            pl.BlockSpec((cin_p, cout_p), lambda i: (0, 0)),
        ],
        out_specs=(
            pl.BlockSpec((tile_m, cout_p), lambda i: (i, 0)),
            pl.BlockSpec((1, 1, cout_p), lambda i: (i, 0, 0)),
            pl.BlockSpec((1, 1, cout_p), lambda i: (i, 0, 0)),
        ),
        compiler_params=pltpu.CompilerParams(
            dimension_semantics=("parallel",),
            vmem_limit_bytes=VMEM_LIMIT,
        ),
        cost_estimate=pl.CostEstimate(flops=flops, transcendentals=0,
                                      bytes_accessed=bytes_acc),
    )(x_flat, w_mat)
    return y[:m], jnp.sum(psum, axis=0), jnp.sum(psq, axis=0)


# ----------------------------------------------------------------------------
# Kernel 3: bn1-apply + ReLU + 3x3 conv2 (stride 1) + partial sum / sumsq.
# h1 is built and zero-padded in a VMEM scratch — it never hits HBM.
# ----------------------------------------------------------------------------
def _make_bn_relu_conv3x3_stats_kernel(ho, wo):
    def kernel(y1_ref, s1_ref, b1_ref, w_ref, y2_ref, sum_ref, sq_ref, hpad_ref):
        cin = y1_ref.shape[-1]
        cout = w_ref.shape[-1]
        s1 = s1_ref[...].reshape(1, 1, cin)
        b1 = b1_ref[...].reshape(1, 1, cin)
        h = jnp.maximum(y1_ref[0] * s1 + b1, 0.0)           # (Ho, Wo, Cin) f32

        # Zero the whole scratch each step (keeps the halo zero; correct under
        # any megacore sharding), then write the interior.
        hpad_ref[...] = jnp.zeros_like(hpad_ref)
        hpad_ref[pl.ds(1, ho), pl.ds(1, wo), :] = h.astype(hpad_ref.dtype)

        acc = jnp.zeros((ho * wo, cout), jnp.float32)
        for di in range(3):
            for dj in range(3):
                patch = hpad_ref[pl.ds(di, ho), pl.ds(dj, wo), :]
                patch = patch.reshape(ho * wo, cin)
                acc = acc + jnp.dot(patch, w_ref[di * 3 + dj],
                                    preferred_element_type=jnp.float32)
        y2_ref[...] = acc.reshape(y2_ref.shape)
        sum_ref[...] = jnp.sum(acc, axis=0).reshape(1, 1, cout)
        sq_ref[...] = jnp.sum(acc * acc, axis=0).reshape(1, 1, cout)

    return kernel


def _bn_relu_conv3x3_stats(y1, scale1, bias1, w2, ho, wo, cout_p):
    n = y1.shape[0]
    cin_p = y1.shape[-1]

    flops = 2 * n * ho * wo * 9 * cin_p * cout_p
    bytes_acc = y1.size * 4 + w2.size * 2 + n * ho * wo * cout_p * 4

    y2, psum, psq = pl.pallas_call(
        _make_bn_relu_conv3x3_stats_kernel(ho, wo),
        out_shape=(
            jax.ShapeDtypeStruct((n, ho, wo, cout_p), jnp.float32),
            jax.ShapeDtypeStruct((n, 1, cout_p), jnp.float32),
            jax.ShapeDtypeStruct((n, 1, cout_p), jnp.float32),
        ),
        grid=(n,),
        in_specs=[
            pl.BlockSpec((1, ho, wo, cin_p), lambda i: (i, 0, 0, 0)),
            pl.BlockSpec((1, cin_p), lambda i: (0, 0)),
            pl.BlockSpec((1, cin_p), lambda i: (0, 0)),
            pl.BlockSpec(w2.shape, lambda i: (0, 0, 0)),
        ],
        out_specs=(
            pl.BlockSpec((1, ho, wo, cout_p), lambda i: (i, 0, 0, 0)),
            pl.BlockSpec((1, 1, cout_p), lambda i: (i, 0, 0)),
            pl.BlockSpec((1, 1, cout_p), lambda i: (i, 0, 0)),
        ),
        scratch_shapes=[pltpu.VMEM((ho + 2, wo + 2, cin_p), MXU_DTYPE)],
        compiler_params=pltpu.CompilerParams(
            dimension_semantics=("parallel",),
            vmem_limit_bytes=VMEM_LIMIT,
        ),
        cost_estimate=pl.CostEstimate(flops=flops, transcendentals=0,
                                      bytes_accessed=bytes_acc),
    )(y1, scale1, bias1, w2)
    return y2, jnp.sum(psum, axis=0), jnp.sum(psq, axis=0)


# ----------------------------------------------------------------------------
# Kernel 4: bn2-apply + shortcut-bn-apply + residual add + ReLU (M-tiled).
# ----------------------------------------------------------------------------
def _bn_add_relu_kernel(y2_ref, s2_ref, b2_ref, sc_ref, ss_ref, bs_ref, o_ref):
    main = y2_ref[...] * s2_ref[...] + b2_ref[...]
    sc = sc_ref[...] * ss_ref[...] + bs_ref[...]
    o_ref[...] = jnp.maximum(main + sc, 0.0)


def _bn_add_relu(y2_flat, scale2, bias2, sc_flat, scale_s, bias_s):
    m, c = y2_flat.shape
    tile_m = min(512, m) if m >= 512 else m
    tile_m = max(tile_m, 1)
    y2_flat = _pad_rows(y2_flat, tile_m)
    sc_flat = _pad_rows(sc_flat, tile_m)
    m_pad = y2_flat.shape[0]

    out = pl.pallas_call(
        _bn_add_relu_kernel,
        out_shape=jax.ShapeDtypeStruct((m_pad, c), jnp.float32),
        grid=(m_pad // tile_m,),
        in_specs=[
            pl.BlockSpec((tile_m, c), lambda i: (i, 0)),
            pl.BlockSpec((1, c), lambda i: (0, 0)),
            pl.BlockSpec((1, c), lambda i: (0, 0)),
            pl.BlockSpec((tile_m, c), lambda i: (i, 0)),
            pl.BlockSpec((1, c), lambda i: (0, 0)),
            pl.BlockSpec((1, c), lambda i: (0, 0)),
        ],
        out_specs=pl.BlockSpec((tile_m, c), lambda i: (i, 0)),
        compiler_params=pltpu.CompilerParams(
            dimension_semantics=("parallel",),     # megacore-shardable on v7x
            vmem_limit_bytes=VMEM_LIMIT,
        ),
    )(y2_flat, scale2, bias2, sc_flat, scale_s, bias_s)
    return out[:m]


# ----------------------------------------------------------------------------
# Plain-JAX glue (one-pass layout prep only — no 9x patch replication)
# ----------------------------------------------------------------------------
def _prep_conv1_input(x, stride):
    """x: (N, H, W, Cp) f32 -> bf16, spatially padded (+polyphase for stride 2)."""
    n, h, w, c = x.shape
    xp = jnp.pad(x, ((0, 0), (1, 1), (1, 1), (0, 0)))
    if stride == 1:
        return xp.astype(MXU_DTYPE)                      # (N, H+2, W+2, Cp)
    # stride == 2: polyphase split so every in-kernel tap slice is contiguous.
    hp, wp = h + 2, w + 2
    hpe, wpe = hp + (hp % 2), wp + (wp % 2)
    xp = jnp.pad(xp, ((0, 0), (0, hpe - hp), (0, wpe - wp), (0, 0)))
    xph = xp.reshape(n, hpe // 2, 2, wpe // 2, 2, c).transpose(0, 2, 4, 1, 3, 5)
    xph = xph.reshape(n, 4, hpe // 2, wpe // 2, c)       # (N, 4, Hh, Wh, Cp)
    return xph.astype(MXU_DTYPE)


def _prep_w3x3(w, cin_p, cout_p):
    cout, cin, kh, kw = w.shape
    wm = jnp.transpose(w, (2, 3, 1, 0)).reshape(kh * kw, cin, cout)
    wm = jnp.pad(wm, ((0, 0), (0, cin_p - cin), (0, cout_p - cout)))
    return wm.astype(MXU_DTYPE)


def _prep_w1x1(w, cin_p, cout_p):
    cout, cin = w.shape[0], w.shape[1]
    wm = jnp.transpose(w, (2, 3, 1, 0)).reshape(cin, cout)
    wm = jnp.pad(wm, ((0, cin_p - cin), (0, cout_p - cout)))
    return wm.astype(MXU_DTYPE)


# ----------------------------------------------------------------------------
# BasicBlock forward
# ----------------------------------------------------------------------------
def basic_block_forward(x_nchw, params, stride):
    if stride not in (1, 2):
        raise ValueError("only stride 1 or 2 supported (ResNet BasicBlock)")

    n, in_planes, h, w = x_nchw.shape
    planes = params["w1"].shape[0]
    cin_p = _round_up(in_planes, LANE)
    cout_p = _round_up(planes, LANE)
    ho = (h - 1) // stride + 1
    wo = (w - 1) // stride + 1
    m = n * ho * wo

    # NCHW -> NHWC once at the boundary; zero-pad channels to a lane multiple.
    x = jnp.transpose(x_nchw, (0, 2, 3, 1)).astype(jnp.float32)
    x = jnp.pad(x, ((0, 0), (0, 0), (0, 0), (0, cin_p - in_planes)))

    # ---- conv1 (+ bn1 batch-stat partials) ----------------------------------
    x1 = _prep_conv1_input(x, stride)
    w1 = _prep_w3x3(params["w1"], cin_p, cout_p)
    y1, s1_sum, s1_sq = _conv3x3_stats(x1, w1, stride, n, ho, wo, cout_p)
    scale1, bias1 = _bn_scale_bias(
        s1_sum, s1_sq, m, _pad_vec(params["g1"], cout_p), _pad_vec(params["b1"], cout_p))

    # ---- shortcut branch -----------------------------------------------------
    if stride != 1 or in_planes != planes:
        xs = x[:, ::stride, ::stride, :].reshape(m, cin_p).astype(MXU_DTYPE)
        ws = _prep_w1x1(params["ws"], cin_p, cout_p)
        ys, ss_sum, ss_sq = _matmul_stats(xs, ws)
        scale_s, bias_s = _bn_scale_bias(
            ss_sum, ss_sq, m, _pad_vec(params["gs"], cout_p), _pad_vec(params["bs"], cout_p))
        sc_pre = ys
    else:
        sc_pre = x.reshape(m, cin_p)                      # identity (Cp == cout_p)
        scale_s = jnp.ones((1, cout_p), jnp.float32)
        bias_s = jnp.zeros((1, cout_p), jnp.float32)

    # ---- bn1-apply + ReLU + conv2 (+ bn2 stats); h1 never hits HBM ----------
    w2 = _prep_w3x3(params["w2"], cout_p, cout_p)
    y2, s2_sum, s2_sq = _bn_relu_conv3x3_stats(y1, scale1, bias1, w2, ho, wo, cout_p)
    scale2, bias2 = _bn_scale_bias(
        s2_sum, s2_sq, m, _pad_vec(params["g2"], cout_p), _pad_vec(params["b2"], cout_p))

    # ---- bn2-apply + shortcut-bn + add + ReLU --------------------------------
    out_flat = _bn_add_relu(y2.reshape(m, cout_p), scale2, bias2,
                            sc_pre, scale_s, bias_s)

    out = out_flat.reshape(n, ho, wo, cout_p)[:, :, :, :planes]
    return jnp.transpose(out, (0, 3, 1, 2))               # back to NCHW


# ----------------------------------------------------------------------------
# Pure-JAX f32 reference (lax conv) for correctness check
# ----------------------------------------------------------------------------
def reference_forward(x_nchw, params, stride):
    def conv(x, w, s, pad):
        return lax.conv_general_dilated(
            x, w, (s, s), [(pad, pad), (pad, pad)],
            dimension_numbers=("NCHW", "OIHW", "NCHW"))

    def bn(y, g, b):
        mean = y.mean(axis=(0, 2, 3), keepdims=True)
        var = ((y - mean) ** 2).mean(axis=(0, 2, 3), keepdims=True)
        return (y - mean) / jnp.sqrt(var + EPS) * g.reshape(1, -1, 1, 1) \
            + b.reshape(1, -1, 1, 1)

    in_planes = x_nchw.shape[1]
    planes = params["w1"].shape[0]

    out = jax.nn.relu(bn(conv(x_nchw, params["w1"], stride, 1), params["g1"], params["b1"]))
    out = bn(conv(out, params["w2"], 1, 1), params["g2"], params["b2"])
    if stride != 1 or in_planes != planes:
        sc = bn(conv(x_nchw, params["ws"], stride, 0), params["gs"], params["bs"])
    else:
        sc = x_nchw
    return jax.nn.relu(out + sc)


# ----------------------------------------------------------------------------
# Main
# ----------------------------------------------------------------------------
if __name__ == "__main__":
    def run_case(key, n, in_planes, planes, hw, stride):
        k_x, k_w1, k_w2, k_ws = jax.random.split(key, 4)
        x = jax.random.normal(k_x, (n, in_planes, hw, hw), dtype=jnp.float32)
        params = {
            "w1": 0.1 * jax.random.normal(k_w1, (planes, in_planes, 3, 3), jnp.float32),
            "g1": jnp.ones((planes,), jnp.float32),
            "b1": jnp.zeros((planes,), jnp.float32),
            "w2": 0.1 * jax.random.normal(k_w2, (planes, planes, 3, 3), jnp.float32),
            "g2": jnp.ones((planes,), jnp.float32),
            "b2": jnp.zeros((planes,), jnp.float32),
        }
        if stride != 1 or in_planes != planes:
            params.update({
                "ws": 0.1 * jax.random.normal(k_ws, (planes, in_planes, 1, 1), jnp.float32),
                "gs": jnp.ones((planes,), jnp.float32),
                "bs": jnp.zeros((planes,), jnp.float32),
            })

        fwd = jax.jit(functools.partial(basic_block_forward, stride=stride))
        out = jax.block_until_ready(fwd(x, params))
        ref = reference_forward(x, params, stride)

        ho = (hw - 1) // stride + 1
        assert out.shape == (n, planes, ho, ho), out.shape
        # bf16 MXU operands (f32 accumulation) => allow a small numeric slack
        # vs. the all-f32 reference.
        err = float(jnp.max(jnp.abs(out - ref)))
        assert jnp.allclose(out, ref, atol=5e-2, rtol=5e-2), err

    key = jax.random.PRNGKey(0)
    k1, k2 = jax.random.split(key)
    # projection shortcut: stride 2, 4 -> 8 channels, 16x16 spatial
    run_case(k1, 2, 4, 8, 16, 2)
    # identity shortcut: stride 1, 8 -> 8 channels
    run_case(k2, 2, 8, 8, 16, 1)

    print("KERNEL_OK")
</pallas_src>

<mosaic_0001>
module attributes {stable_mosaic.version = 11 : i64} {
  func.func @kernel(%arg0: i32, %arg1: memref<1x4x9x9x128xbf16, #tpu.memory_space<vmem>>, %arg2: memref<9x128x128xbf16, #tpu.memory_space<vmem>>, %arg3: memref<1x8x8x128xf32, #tpu.memory_space<vmem>>, %arg4: memref<1x1x128xf32, #tpu.memory_space<vmem>>, %arg5: memref<1x1x128xf32, #tpu.memory_space<vmem>>) attributes {dimension_semantics = [#tpu.dimension_semantics<parallel>], iteration_bounds = array<i64: 2>, scalar_prefetch = 0 : i64, scratch_operands = 0 : i64, tpu.core_type = #tpu.core_type<tc>, window_params = [{transform_indices = @transform_0, window_bounds = array<i64: 1, 4, 9, 9, 128>}, {pipeline_mode = #tpu.pipeline_mode<synchronous>, transform_indices = @transform_1, window_bounds = array<i64: 9, 128, 128>}, {transform_indices = @transform_2, window_bounds = array<i64: 1, 8, 8, 128>}, {transform_indices = @transform_3, window_bounds = array<i64: 1, 1, 128>}, {transform_indices = @transform_4, window_bounds = array<i64: 1, 1, 128>}]} {
    %cst = arith.constant 0.000000e+00 : f32
    %0 = vector.broadcast %cst : f32 to vector<64x128xf32>
    %c0 = arith.constant 0 : index
    %c0_0 = arith.constant 0 : index
    %c0_1 = arith.constant 0 : index
    %c0_2 = arith.constant 0 : index
    %c0_3 = arith.constant 0 : index
    %1 = vector.load %arg1[%c0, %c0_0, %c0_1, %c0_2, %c0_3] : memref<1x4x9x9x128xbf16, #tpu.memory_space<vmem>>, vector<1x1x8x8x128xbf16>
    %2 = vector.shape_cast %1 : vector<1x1x8x8x128xbf16> to vector<8x8x128xbf16>
    %3 = vector.shape_cast %2 : vector<8x8x128xbf16> to vector<64x128xbf16>
    %c0_4 = arith.constant 0 : index
    %c0_5 = arith.constant 0 : index
    %c0_6 = arith.constant 0 : index
    %4 = vector.load %arg2[%c0_4, %c0_5, %c0_6] : memref<9x128x128xbf16, #tpu.memory_space<vmem>>, vector<1x128x128xbf16>
    %5 = vector.shape_cast %4 : vector<1x128x128xbf16> to vector<128x128xbf16>
    %cst_7 = arith.constant dense<0.000000e+00> : vector<64x128xf32>
    %6 = tpu.matmul %3, %5, %cst_7 {dimension_numbers = #tpu.dot_dimension_numbers<[1], [0], [0], [1], [0, 0, 1, 1], [], []>} : vector<64x128xbf16>, vector<128x128xbf16>, vector<64x128xf32> -> vector<64x128xf32>
    %7 = arith.addf %0, %6 : vector<64x128xf32>
    %c0_8 = arith.constant 0 : index
    %c1 = arith.constant 1 : index
    %c0_9 = arith.constant 0 : index
    %c0_10 = arith.constant 0 : index
    %c0_11 = arith.constant 0 : index
    %8 = vector.load %arg1[%c0_8, %c1, %c0_9, %c0_10, %c0_11] : memref<1x4x9x9x128xbf16, #tpu.memory_space<vmem>>, vector<1x1x8x8x128xbf16>
    %9 = vector.shape_cast %8 : vector<1x1x8x8x128xbf16> to vector<8x8x128xbf16>
    %10 = vector.shape_cast %9 : vector<8x8x128xbf16> to vector<64x128xbf16>
    %c1_12 = arith.constant 1 : index
    %c0_13 = arith.constant 0 : index
    %c0_14 = arith.constant 0 : index
    %11 = vector.load %arg2[%c1_12, %c0_13, %c0_14] : memref<9x128x128xbf16, #tpu.memory_space<vmem>>, vector<1x128x128xbf16>
    %12 = vector.shape_cast %11 : vector<1x128x128xbf16> to vector<128x128xbf16>
    %cst_15 = arith.constant dense<0.000000e+00> : vector<64x128xf32>
    %13 = tpu.matmul %10, %12, %cst_15 {dimension_numbers = #tpu.dot_dimension_numbers<[1], [0], [0], [1], [0, 0, 1, 1], [], []>} : vector<64x128xbf16>, vector<128x128xbf16>, vector<64x128xf32> -> vector<64x128xf32>
    %14 = arith.addf %7, %13 : vector<64x128xf32>
    %c0_16 = arith.constant 0 : index
    %c0_17 = arith.constant 0 : index
    %c0_18 = arith.constant 0 : index
    %c1_19 = arith.constant 1 : index
    %c0_20 = arith.constant 0 : index
    %15 = vector.load %arg1[%c0_16, %c0_17, %c0_18, %c1_19, %c0_20] : memref<1x4x9x9x128xbf16, #tpu.memory_space<vmem>>, vector<1x1x8x8x128xbf16>
    %16 = vector.shape_cast %15 : vector<1x1x8x8x128xbf16> to vector<8x8x128xbf16>
    %17 = vector.shape_cast %16 : vector<8x8x128xbf16> to vector<64x128xbf16>
    %c2 = arith.constant 2 : index
    %c0_21 = arith.constant 0 : index
    %c0_22 = arith.constant 0 : index
    %18 = vector.load %arg2[%c2, %c0_21, %c0_22] : memref<9x128x128xbf16, #tpu.memory_space<vmem>>, vector<1x128x128xbf16>
    %19 = vector.shape_cast %18 : vector<1x128x128xbf16> to vector<128x128xbf16>
    %cst_23 = arith.constant dense<0.000000e+00> : vector<64x128xf32>
    %20 = tpu.matmul %17, %19, %cst_23 {dimension_numbers = #tpu.dot_dimension_numbers<[1], [0], [0], [1], [0, 0, 1, 1], [], []>} : vector<64x128xbf16>, vector<128x128xbf16>, vector<64x128xf32> -> vector<64x128xf32>
    %21 = arith.addf %14, %20 : vector<64x128xf32>
    %c0_24 = arith.constant 0 : index
    %c2_25 = arith.constant 2 : index
    %c0_26 = arith.constant 0 : index
    %c0_27 = arith.constant 0 : index
    %c0_28 = arith.constant 0 : index
    %22 = vector.load %arg1[%c0_24, %c2_25, %c0_26, %c0_27, %c0_28] : memref<1x4x9x9x128xbf16, #tpu.memory_space<vmem>>, vector<1x1x8x8x128xbf16>
    %23 = vector.shape_cast %22 : vector<1x1x8x8x128xbf16> to vector<8x8x128xbf16>
    %24 = vector.shape_cast %23 : vector<8x8x128xbf16> to vector<64x128xbf16>
    %c3 = arith.constant 3 : index
    %c0_29 = arith.constant 0 : index
    %c0_30 = arith.constant 0 : index
    %25 = vector.load %arg2[%c3, %c0_29, %c0_30] : memref<9x128x128xbf16, #tpu.memory_space<vmem>>, vector<1x128x128xbf16>
    %26 = vector.shape_cast %25 : vector<1x128x128xbf16> to vector<128x128xbf16>
    %cst_31 = arith.constant dense<0.000000e+00> : vector<64x128xf32>
    %27 = tpu.matmul %24, %26, %cst_31 {dimension_numbers = #tpu.dot_dimension_numbers<[1], [0], [0], [1], [0, 0, 1, 1], [], []>} : vector<64x128xbf16>, vector<128x128xbf16>, vector<64x128xf32> -> vector<64x128xf32>
    %28 = arith.addf %21, %27 : vector<64x128xf32>
    %c0_32 = arith.constant 0 : index
    %c3_33 = arith.constant 3 : index
    %c0_34 = arith.constant 0 : index
    %c0_35 = arith.constant 0 : index
    %c0_36 = arith.constant 0 : index
    %29 = vector.load %arg1[%c0_32, %c3_33, %c0_34, %c0_35, %c0_36] : memref<1x4x9x9x128xbf16, #tpu.memory_space<vmem>>, vector<1x1x8x8x128xbf16>
    %30 = vector.shape_cast %29 : vector<1x1x8x8x128xbf16> to vector<8x8x128xbf16>
    %31 = vector.shape_cast %30 : vector<8x8x128xbf16> to vector<64x128xbf16>
    %c4 = arith.constant 4 : index
    %c0_37 = arith.constant 0 : index
    %c0_38 = arith.constant 0 : index
    %32 = vector.load %arg2[%c4, %c0_37, %c0_38] : memref<9x128x128xbf16, #tpu.memory_space<vmem>>, vector<1x128x128xbf16>
    %33 = vector.shape_cast %32 : vector<1x128x128xbf16> to vector<128x128xbf16>
    %cst_39 = arith.constant dense<0.000000e+00> : vector<64x128xf32>
    %34 = tpu.matmul %31, %33, %cst_39 {dimension_numbers = #tpu.dot_dimension_numbers<[1], [0], [0], [1], [0, 0, 1, 1], [], []>} : vector<64x128xbf16>, vector<128x128xbf16>, vector<64x128xf32> -> vector<64x128xf32>
    %35 = arith.addf %28, %34 : vector<64x128xf32>
    %c0_40 = arith.constant 0 : index
    %c2_41 = arith.constant 2 : index
    %c0_42 = arith.constant 0 : index
    %c1_43 = arith.constant 1 : index
    %c0_44 = arith.constant 0 : index
    %36 = vector.load %arg1[%c0_40, %c2_41, %c0_42, %c1_43, %c0_44] : memref<1x4x9x9x128xbf16, #tpu.memory_space<vmem>>, vector<1x1x8x8x128xbf16>
    %37 = vector.shape_cast %36 : vector<1x1x8x8x128xbf16> to vector<8x8x128xbf16>
    %38 = vector.shape_cast %37 : vector<8x8x128xbf16> to vector<64x128xbf16>
    %c5 = arith.constant 5 : index
    %c0_45 = arith.constant 0 : index
    %c0_46 = arith.constant 0 : index
    %39 = vector.load %arg2[%c5, %c0_45, %c0_46] : memref<9x128x128xbf16, #tpu.memory_space<vmem>>, vector<1x128x128xbf16>
    %40 = vector.shape_cast %39 : vector<1x128x128xbf16> to vector<128x128xbf16>
    %cst_47 = arith.constant dense<0.000000e+00> : vector<64x128xf32>
    %41 = tpu.matmul %38, %40, %cst_47 {dimension_numbers = #tpu.dot_dimension_numbers<[1], [0], [0], [1], [0, 0, 1, 1], [], []>} : vector<64x128xbf16>, vector<128x128xbf16>, vector<64x128xf32> -> vector<64x128xf32>
    %42 = arith.addf %35, %41 : vector<64x128xf32>
    %c0_48 = arith.constant 0 : index
    %c0_49 = arith.constant 0 : index
    %c1_50 = arith.constant 1 : index
    %c0_51 = arith.constant 0 : index
    %c0_52 = arith.constant 0 : index
    %43 = vector.load %arg1[%c0_48, %c0_49, %c1_50, %c0_51, %c0_52] : memref<1x4x9x9x128xbf16, #tpu.memory_space<vmem>>, vector<1x1x8x8x128xbf16>
    %44 = vector.shape_cast %43 : vector<1x1x8x8x128xbf16> to vector<8x8x128xbf16>
    %45 = vector.shape_cast %44 : vector<8x8x128xbf16> to vector<64x128xbf16>
    %c6 = arith.constant 6 : index
    %c0_53 = arith.constant 0 : index
    %c0_54 = arith.constant 0 : index
    %46 = vector.load %arg2[%c6, %c0_53, %c0_54] : memref<9x128x128xbf16, #tpu.memory_space<vmem>>, vector<1x128x128xbf16>
    %47 = vector.shape_cast %46 : vector<1x128x128xbf16> to vector<128x128xbf16>
    %cst_55 = arith.constant dense<0.000000e+00> : vector<64x128xf32>
    %48 = tpu.matmul %45, %47, %cst_55 {dimension_numbers = #tpu.dot_dimension_numbers<[1], [0], [0], [1], [0, 0, 1, 1], [], []>} : vector<64x128xbf16>, vector<128x128xbf16>, vector<64x128xf32> -> vector<64x128xf32>
    %49 = arith.addf %42, %48 : vector<64x128xf32>
    %c0_56 = arith.constant 0 : index
    %c1_57 = arith.constant 1 : index
    %c1_58 = arith.constant 1 : index
    %c0_59 = arith.constant 0 : index
    %c0_60 = arith.constant 0 : index
    %50 = vector.load %arg1[%c0_56, %c1_57, %c1_58, %c0_59, %c0_60] : memref<1x4x9x9x128xbf16, #tpu.memory_space<vmem>>, vector<1x1x8x8x128xbf16>
    %51 = vector.shape_cast %50 : vector<1x1x8x8x128xbf16> to vector<8x8x128xbf16>
    %52 = vector.shape_cast %51 : vector<8x8x128xbf16> to vector<64x128xbf16>
    %c7 = arith.constant 7 : index
    %c0_61 = arith.constant 0 : index
    %c0_62 = arith.constant 0 : index
    %53 = vector.load %arg2[%c7, %c0_61, %c0_62] : memref<9x128x128xbf16, #tpu.memory_space<vmem>>, vector<1x128x128xbf16>
    %54 = vector.shape_cast %53 : vector<1x128x128xbf16> to vector<128x128xbf16>
    %cst_63 = arith.constant dense<0.000000e+00> : vector<64x128xf32>
    %55 = tpu.matmul %52, %54, %cst_63 {dimension_numbers = #tpu.dot_dimension_numbers<[1], [0], [0], [1], [0, 0, 1, 1], [], []>} : vector<64x128xbf16>, vector<128x128xbf16>, vector<64x128xf32> -> vector<64x128xf32>
    %56 = arith.addf %49, %55 : vector<64x128xf32>
    %c0_64 = arith.constant 0 : index
    %c0_65 = arith.constant 0 : index
    %c1_66 = arith.constant 1 : index
    %c1_67 = arith.constant 1 : index
    %c0_68 = arith.constant 0 : index
    %57 = vector.load %arg1[%c0_64, %c0_65, %c1_66, %c1_67, %c0_68] : memref<1x4x9x9x128xbf16, #tpu.memory_space<vmem>>, vector<1x1x8x8x128xbf16>
    %58 = vector.shape_cast %57 : vector<1x1x8x8x128xbf16> to vector<8x8x128xbf16>
    %59 = vector.shape_cast %58 : vector<8x8x128xbf16> to vector<64x128xbf16>
    %c8 = arith.constant 8 : index
    %c0_69 = arith.constant 0 : index
    %c0_70 = arith.constant 0 : index
    %60 = vector.load %arg2[%c8, %c0_69, %c0_70] : memref<9x128x128xbf16, #tpu.memory_space<vmem>>, vector<1x128x128xbf16>
    %61 = vector.shape_cast %60 : vector<1x128x128xbf16> to vector<128x128xbf16>
    %cst_71 = arith.constant dense<0.000000e+00> : vector<64x128xf32>
    %62 = tpu.matmul %59, %61, %cst_71 {dimension_numbers = #tpu.dot_dimension_numbers<[1], [0], [0], [1], [0, 0, 1, 1], [], []>} : vector<64x128xbf16>, vector<128x128xbf16>, vector<64x128xf32> -> vector<64x128xf32>
    %63 = arith.addf %56, %62 : vector<64x128xf32>
    %64 = vector.shape_cast %63 : vector<64x128xf32> to vector<1x8x8x128xf32>
    %c0_72 = arith.constant 0 : index
    %c0_73 = arith.constant 0 : index
    %c0_74 = arith.constant 0 : index
    %c0_75 = arith.constant 0 : index
    %65 = vector.load %arg3[%c0_72, %c0_73, %c0_74, %c0_75] : memref<1x8x8x128xf32, #tpu.memory_space<vmem>>, vector<1x8x8x128xf32>
    tpu.vector_store %arg3[%c0_72, %c0_73, %c0_74, %c0_75], %64 {strides = array<i32>} : memref<1x8x8x128xf32, #tpu.memory_space<vmem>>, vector<1x8x8x128xf32>,
    %cst_76 = arith.constant dense<0.000000e+00> : vector<128xf32>
    %66 = vector.multi_reduction <add>, %63, %cst_76 [0] : vector<64x128xf32> to vector<128xf32>
    %67 = vector.shape_cast %66 : vector<128xf32> to vector<1x1x128xf32>
    %c0_77 = arith.constant 0 : index
    %c0_78 = arith.constant 0 : index
    %c0_79 = arith.constant 0 : index
    %68 = vector.load %arg4[%c0_77, %c0_78, %c0_79] : memref<1x1x128xf32, #tpu.memory_space<vmem>>, vector<1x1x128xf32>
    tpu.vector_store %arg4[%c0_77, %c0_78, %c0_79], %67 {strides = array<i32>} : memref<1x1x128xf32, #tpu.memory_space<vmem>>, vector<1x1x128xf32>,
    %69 = arith.mulf %63, %63 : vector<64x128xf32>
    %cst_80 = arith.constant dense<0.000000e+00> : vector<128xf32>
    %70 = vector.multi_reduction <add>, %69, %cst_80 [0] : vector<64x128xf32> to vector<128xf32>
    %71 = vector.shape_cast %70 : vector<128xf32> to vector<1x1x128xf32>
    %c0_81 = arith.constant 0 : index
    %c0_82 = arith.constant 0 : index
    %c0_83 = arith.constant 0 : index
    %72 = vector.load %arg5[%c0_81, %c0_82, %c0_83] : memref<1x1x128xf32, #tpu.memory_space<vmem>>, vector<1x1x128xf32>
    tpu.vector_store %arg5[%c0_81, %c0_82, %c0_83], %71 {strides = array<i32>} : memref<1x1x128xf32, #tpu.memory_space<vmem>>, vector<1x1x128xf32>,
    return
  }
  func.func @transform_0(%arg0: i32) -> (i32, i32, i32, i32, i32) {
    %c0_i32 = arith.constant 0 : i32
    %c0_i32_0 = arith.constant 0 : i32
    %c0_i32_1 = arith.constant 0 : i32
    %c0_i32_2 = arith.constant 0 : i32
    %c0_i32_3 = arith.constant 0 : i32
    return %arg0, %c0_i32, %c0_i32_0, %c0_i32_1, %c0_i32_2 : i32, i32, i32, i32, i32
  }
  func.func @transform_1(%arg0: i32) -> (i32, i32, i32) {
    %c0_i32 = arith.constant 0 : i32
    %c0_i32_0 = arith.constant 0 : i32
    %c0_i32_1 = arith.constant 0 : i32
    %c0_i32_2 = arith.constant 0 : i32
    return %c0_i32, %c0_i32_0, %c0_i32_1 : i32, i32, i32
  }
  func.func @transform_2(%arg0: i32) -> (i32, i32, i32, i32) {
    %c0_i32 = arith.constant 0 : i32
    %c0_i32_0 = arith.constant 0 : i32
    %c0_i32_1 = arith.constant 0 : i32
    %c0_i32_2 = arith.constant 0 : i32
    return %arg0, %c0_i32, %c0_i32_0, %c0_i32_1 : i32, i32, i32, i32
  }
  func.func @transform_3(%arg0: i32) -> (i32, i32, i32) {
    %c0_i32 = arith.constant 0 : i32
    %c0_i32_0 = arith.constant 0 : i32
    %c0_i32_1 = arith.constant 0 : i32
    return %arg0, %c0_i32, %c0_i32_0 : i32, i32, i32
  }
  func.func @transform_4(%arg0: i32) -> (i32, i32, i32) {
    %c0_i32 = arith.constant 0 : i32
    %c0_i32_0 = arith.constant 0 : i32
    %c0_i32_1 = arith.constant 0 : i32
    return %arg0, %c0_i32, %c0_i32_0 : i32, i32, i32
  }
}

module attributes {stable_mosaic.version = 11 : i64} {
  func.func @kernel(%arg0: i32, %arg1: memref<1x8x8x128xf32, #tpu.memory_space<vmem>>, %arg2: memref<1x128xf32, #tpu.memory_space<vmem>>, %arg3: memref<1x128xf32, #tpu.memory_space<vmem>>, %arg4: memref<9x128x128xbf16, #tpu.memory_space<vmem>>, %arg5: memref<1x8x8x128xf32, #tpu.memory_space<vmem>>, %arg6: memref<1x1x128xf32, #tpu.memory_space<vmem>>, %arg7: memref<1x1x128xf32, #tpu.memory_space<vmem>>, %arg8: memref<10x10x128xbf16, #tpu.memory_space<vmem>>) attributes {dimension_semantics = [#tpu.dimension_semantics<parallel>], iteration_bounds = array<i64: 2>, scalar_prefetch = 0 : i64, scratch_operands = 1 : i64, tpu.core_type = #tpu.core_type<tc>, window_params = [{transform_indices = @transform_0, window_bounds = array<i64: 1, 8, 8, 128>}, {pipeline_mode = #tpu.pipeline_mode<synchronous>, transform_indices = @transform_1, window_bounds = array<i64: 1, 128>}, {pipeline_mode = #tpu.pipeline_mode<synchronous>, transform_indices = @transform_2, window_bounds = array<i64: 1, 128>}, {pipeline_mode = #tpu.pipeline_mode<synchronous>, transform_indices = @transform_3, window_bounds = array<i64: 9, 128, 128>}, {transform_indices = @transform_4, window_bounds = array<i64: 1, 8, 8, 128>}, {transform_indices = @transform_5, window_bounds = array<i64: 1, 1, 128>}, {transform_indices = @transform_6, window_bounds = array<i64: 1, 1, 128>}]} {
    %c0 = arith.constant 0 : index
    %c0_0 = arith.constant 0 : index
    %0 = vector.load %arg2[%c0, %c0_0] : memref<1x128xf32, #tpu.memory_space<vmem>>, vector<1x128xf32>
    %1 = vector.shape_cast %0 : vector<1x128xf32> to vector<1x1x128xf32>
    %c0_1 = arith.constant 0 : index
    %c0_2 = arith.constant 0 : index
    %2 = vector.load %arg3[%c0_1, %c0_2] : memref<1x128xf32, #tpu.memory_space<vmem>>, vector<1x128xf32>
    %3 = vector.shape_cast %2 : vector<1x128xf32> to vector<1x1x128xf32>
    %c0_3 = arith.constant 0 : index
    %c0_4 = arith.constant 0 : index
    %c0_5 = arith.constant 0 : index
    %c0_6 = arith.constant 0 : index
    %4 = vector.load %arg1[%c0_3, %c0_4, %c0_5, %c0_6] : memref<1x8x8x128xf32, #tpu.memory_space<vmem>>, vector<1x8x8x128xf32>
    %5 = vector.shape_cast %4 : vector<1x8x8x128xf32> to vector<8x8x128xf32>
    %6 = vector.broadcast %1 : vector<1x1x128xf32> to vector<8x8x128xf32>
    %7 = arith.mulf %5, %6 : vector<8x8x128xf32>
    %8 = vector.broadcast %3 : vector<1x1x128xf32> to vector<8x8x128xf32>
    %9 = arith.addf %7, %8 : vector<8x8x128xf32>
    %cst = arith.constant 0.000000e+00 : f32
    %10 = vector.broadcast %cst : f32 to vector<8x8x128xf32>
    %11 = arith.maximumf %9, %10 : vector<8x8x128xf32>
    %cst_7 = arith.constant 0.000000e+00 : bf16
    %12 = vector.broadcast %cst_7 : bf16 to vector<10x10x128xbf16>
    %c0_8 = arith.constant 0 : index
    %c0_9 = arith.constant 0 : index
    %c0_10 = arith.constant 0 : index
    %13 = vector.load %arg8[%c0_8, %c0_9, %c0_10] : memref<10x10x128xbf16, #tpu.memory_space<vmem>>, vector<10x10x128xbf16>
    tpu.vector_store %arg8[%c0_8, %c0_9, %c0_10], %12 {strides = array<i32>} : memref<10x10x128xbf16, #tpu.memory_space<vmem>>, vector<10x10x128xbf16>,
    %14 = arith.truncf %11 : vector<8x8x128xf32> to vector<8x8x128xbf16>
    %c1 = arith.constant 1 : index
    %c1_11 = arith.constant 1 : index
    %c0_12 = arith.constant 0 : index
    %15 = vector.load %arg8[%c1, %c1_11, %c0_12] : memref<10x10x128xbf16, #tpu.memory_space<vmem>>, vector<8x8x128xbf16>
    tpu.vector_store %arg8[%c1, %c1_11, %c0_12], %14 {strides = array<i32>} : memref<10x10x128xbf16, #tpu.memory_space<vmem>>, vector<8x8x128xbf16>,
    %cst_13 = arith.constant 0.000000e+00 : f32
    %16 = vector.broadcast %cst_13 : f32 to vector<64x128xf32>
    %c0_14 = arith.constant 0 : index
    %c0_15 = arith.constant 0 : index
    %c0_16 = arith.constant 0 : index
    %17 = vector.load %arg8[%c0_14, %c0_15, %c0_16] : memref<10x10x128xbf16, #tpu.memory_space<vmem>>, vector<8x8x128xbf16>
    %18 = vector.shape_cast %17 : vector<8x8x128xbf16> to vector<64x128xbf16>
    %c0_17 = arith.constant 0 : index
    %c0_18 = arith.constant 0 : index
    %c0_19 = arith.constant 0 : index
    %19 = vector.load %arg4[%c0_17, %c0_18, %c0_19] : memref<9x128x128xbf16, #tpu.memory_space<vmem>>, vector<1x128x128xbf16>
    %20 = vector.shape_cast %19 : vector<1x128x128xbf16> to vector<128x128xbf16>
    %cst_20 = arith.constant dense<0.000000e+00> : vector<64x128xf32>
    %21 = tpu.matmul %18, %20, %cst_20 {dimension_numbers = #tpu.dot_dimension_numbers<[1], [0], [0], [1], [0, 0, 1, 1], [], []>} : vector<64x128xbf16>, vector<128x128xbf16>, vector<64x128xf32> -> vector<64x128xf32>
    %22 = arith.addf %16, %21 : vector<64x128xf32>
    %c0_21 = arith.constant 0 : index
    %c1_22 = arith.constant 1 : index
    %c0_23 = arith.constant 0 : index
    %23 = vector.load %arg8[%c0_21, %c1_22, %c0_23] : memref<10x10x128xbf16, #tpu.memory_space<vmem>>, vector<8x8x128xbf16>
    %24 = vector.shape_cast %23 : vector<8x8x128xbf16> to vector<64x128xbf16>
    %c1_24 = arith.constant 1 : index
    %c0_25 = arith.constant 0 : index
    %c0_26 = arith.constant 0 : index
    %25 = vector.load %arg4[%c1_24, %c0_25, %c0_26] : memref<9x128x128xbf16, #tpu.memory_space<vmem>>, vector<1x128x128xbf16>
    %26 = vector.shape_cast %25 : vector<1x128x128xbf16> to vector<128x128xbf16>
    %cst_27 = arith.constant dense<0.000000e+00> : vector<64x128xf32>
    %27 = tpu.matmul %24, %26, %cst_27 {dimension_numbers = #tpu.dot_dimension_numbers<[1], [0], [0], [1], [0, 0, 1, 1], [], []>} : vector<64x128xbf16>, vector<128x128xbf16>, vector<64x128xf32> -> vector<64x128xf32>
    %28 = arith.addf %22, %27 : vector<64x128xf32>
    %c0_28 = arith.constant 0 : index
    %c2 = arith.constant 2 : index
    %c0_29 = arith.constant 0 : index
    %29 = vector.load %arg8[%c0_28, %c2, %c0_29] : memref<10x10x128xbf16, #tpu.memory_space<vmem>>, vector<8x8x128xbf16>
    %30 = vector.shape_cast %29 : vector<8x8x128xbf16> to vector<64x128xbf16>
    %c2_30 = arith.constant 2 : index
    %c0_31 = arith.constant 0 : index
    %c0_32 = arith.constant 0 : index
    %31 = vector.load %arg4[%c2_30, %c0_31, %c0_32] : memref<9x128x128xbf16, #tpu.memory_space<vmem>>, vector<1x128x128xbf16>
    %32 = vector.shape_cast %31 : vector<1x128x128xbf16> to vector<128x128xbf16>
    %cst_33 = arith.constant dense<0.000000e+00> : vector<64x128xf32>
    %33 = tpu.matmul %30, %32, %cst_33 {dimension_numbers = #tpu.dot_dimension_numbers<[1], [0], [0], [1], [0, 0, 1, 1], [], []>} : vector<64x128xbf16>, vector<128x128xbf16>, vector<64x128xf32> -> vector<64x128xf32>
    %34 = arith.addf %28, %33 : vector<64x128xf32>
    %c1_34 = arith.constant 1 : index
    %c0_35 = arith.constant 0 : index
    %c0_36 = arith.constant 0 : index
    %35 = vector.load %arg8[%c1_34, %c0_35, %c0_36] : memref<10x10x128xbf16, #tpu.memory_space<vmem>>, vector<8x8x128xbf16>
    %36 = vector.shape_cast %35 : vector<8x8x128xbf16> to vector<64x128xbf16>
    %c3 = arith.constant 3 : index
    %c0_37 = arith.constant 0 : index
    %c0_38 = arith.constant 0 : index
    %37 = vector.load %arg4[%c3, %c0_37, %c0_38] : memref<9x128x128xbf16, #tpu.memory_space<vmem>>, vector<1x128x128xbf16>
    %38 = vector.shape_cast %37 : vector<1x128x128xbf16> to vector<128x128xbf16>
    %cst_39 = arith.constant dense<0.000000e+00> : vector<64x128xf32>
    %39 = tpu.matmul %36, %38, %cst_39 {dimension_numbers = #tpu.dot_dimension_numbers<[1], [0], [0], [1], [0, 0, 1, 1], [], []>} : vector<64x128xbf16>, vector<128x128xbf16>, vector<64x128xf32> -> vector<64x128xf32>
    %40 = arith.addf %34, %39 : vector<64x128xf32>
    %c1_40 = arith.constant 1 : index
    %c1_41 = arith.constant 1 : index
    %c0_42 = arith.constant 0 : index
    %41 = vector.load %arg8[%c1_40, %c1_41, %c0_42] : memref<10x10x128xbf16, #tpu.memory_space<vmem>>, vector<8x8x128xbf16>
    %42 = vector.shape_cast %41 : vector<8x8x128xbf16> to vector<64x128xbf16>
    %c4 = arith.constant 4 : index
    %c0_43 = arith.constant 0 : index
    %c0_44 = arith.constant 0 : index
    %43 = vector.load %arg4[%c4, %c0_43, %c0_44] : memref<9x128x128xbf16, #tpu.memory_space<vmem>>, vector<1x128x128xbf16>
    %44 = vector.shape_cast %43 : vector<1x128x128xbf16> to vector<128x128xbf16>
    %cst_45 = arith.constant dense<0.000000e+00> : vector<64x128xf32>
    %45 = tpu.matmul %42, %44, %cst_45 {dimension_numbers = #tpu.dot_dimension_numbers<[1], [0], [0], [1], [0, 0, 1, 1], [], []>} : vector<64x128xbf16>, vector<128x128xbf16>, vector<64x128xf32> -> vector<64x128xf32>
    %46 = arith.addf %40, %45 : vector<64x128xf32>
    %c1_46 = arith.constant 1 : index
    %c2_47 = arith.constant 2 : index
    %c0_48 = arith.constant 0 : index
    %47 = vector.load %arg8[%c1_46, %c2_47, %c0_48] : memref<10x10x128xbf16, #tpu.memory_space<vmem>>, vector<8x8x128xbf16>
    %48 = vector.shape_cast %47 : vector<8x8x128xbf16> to vector<64x128xbf16>
    %c5 = arith.constant 5 : index
    %c0_49 = arith.constant 0 : index
    %c0_50 = arith.constant 0 : index
    %49 = vector.load %arg4[%c5, %c0_49, %c0_50] : memref<9x128x128xbf16, #tpu.memory_space<vmem>>, vector<1x128x128xbf16>
    %50 = vector.shape_cast %49 : vector<1x128x128xbf16> to vector<128x128xbf16>
    %cst_51 = arith.constant dense<0.000000e+00> : vector<64x128xf32>
    %51 = tpu.matmul %48, %50, %cst_51 {dimension_numbers = #tpu.dot_dimension_numbers<[1], [0], [0], [1], [0, 0, 1, 1], [], []>} : vector<64x128xbf16>, vector<128x128xbf16>, vector<64x128xf32> -> vector<64x128xf32>
    %52 = arith.addf %46, %51 : vector<64x128xf32>
    %c2_52 = arith.constant 2 : index
    %c0_53 = arith.constant 0 : index
    %c0_54 = arith.constant 0 : index
    %53 = vector.load %arg8[%c2_52, %c0_53, %c0_54] : memref<10x10x128xbf16, #tpu.memory_space<vmem>>, vector<8x8x128xbf16>
    %54 = vector.shape_cast %53 : vector<8x8x128xbf16> to vector<64x128xbf16>
    %c6 = arith.constant 6 : index
    %c0_55 = arith.constant 0 : index
    %c0_56 = arith.constant 0 : index
    %55 = vector.load %arg4[%c6, %c0_55, %c0_56] : memref<9x128x128xbf16, #tpu.memory_space<vmem>>, vector<1x128x128xbf16>
    %56 = vector.shape_cast %55 : vector<1x128x128xbf16> to vector<128x128xbf16>
    %cst_57 = arith.constant dense<0.000000e+00> : vector<64x128xf32>
    %57 = tpu.matmul %54, %56, %cst_57 {dimension_numbers = #tpu.dot_dimension_numbers<[1], [0], [0], [1], [0, 0, 1, 1], [], []>} : vector<64x128xbf16>, vector<128x128xbf16>, vector<64x128xf32> -> vector<64x128xf32>
    %58 = arith.addf %52, %57 : vector<64x128xf32>
    %c2_58 = arith.constant 2 : index
    %c1_59 = arith.constant 1 : index
    %c0_60 = arith.constant 0 : index
    %59 = vector.load %arg8[%c2_58, %c1_59, %c0_60] : memref<10x10x128xbf16, #tpu.memory_space<vmem>>, vector<8x8x128xbf16>
    %60 = vector.shape_cast %59 : vector<8x8x128xbf16> to vector<64x128xbf16>
    %c7 = arith.constant 7 : index
    %c0_61 = arith.constant 0 : index
    %c0_62 = arith.constant 0 : index
    %61 = vector.load %arg4[%c7, %c0_61, %c0_62] : memref<9x128x128xbf16, #tpu.memory_space<vmem>>, vector<1x128x128xbf16>
    %62 = vector.shape_cast %61 : vector<1x128x128xbf16> to vector<128x128xbf16>
    %cst_63 = arith.constant dense<0.000000e+00> : vector<64x128xf32>
    %63 = tpu.matmul %60, %62, %cst_63 {dimension_numbers = #tpu.dot_dimension_numbers<[1], [0], [0], [1], [0, 0, 1, 1], [], []>} : vector<64x128xbf16>, vector<128x128xbf16>, vector<64x128xf32> -> vector<64x128xf32>
    %64 = arith.addf %58, %63 : vector<64x128xf32>
    %c2_64 = arith.constant 2 : index
    %c2_65 = arith.constant 2 : index
    %c0_66 = arith.constant 0 : index
    %65 = vector.load %arg8[%c2_64, %c2_65, %c0_66] : memref<10x10x128xbf16, #tpu.memory_space<vmem>>, vector<8x8x128xbf16>
    %66 = vector.shape_cast %65 : vector<8x8x128xbf16> to vector<64x128xbf16>
    %c8 = arith.constant 8 : index
    %c0_67 = arith.constant 0 : index
    %c0_68 = arith.constant 0 : index
    %67 = vector.load %arg4[%c8, %c0_67, %c0_68] : memref<9x128x128xbf16, #tpu.memory_space<vmem>>, vector<1x128x128xbf16>
    %68 = vector.shape_cast %67 : vector<1x128x128xbf16> to vector<128x128xbf16>
    %cst_69 = arith.constant dense<0.000000e+00> : vector<64x128xf32>
    %69 = tpu.matmul %66, %68, %cst_69 {dimension_numbers = #tpu.dot_dimension_numbers<[1], [0], [0], [1], [0, 0, 1, 1], [], []>} : vector<64x128xbf16>, vector<128x128xbf16>, vector<64x128xf32> -> vector<64x128xf32>
    %70 = arith.addf %64, %69 : vector<64x128xf32>
    %71 = vector.shape_cast %70 : vector<64x128xf32> to vector<1x8x8x128xf32>
    %c0_70 = arith.constant 0 : index
    %c0_71 = arith.constant 0 : index
    %c0_72 = arith.constant 0 : index
    %c0_73 = arith.constant 0 : index
    %72 = vector.load %arg5[%c0_70, %c0_71, %c0_72, %c0_73] : memref<1x8x8x128xf32, #tpu.memory_space<vmem>>, vector<1x8x8x128xf32>
    tpu.vector_store %arg5[%c0_70, %c0_71, %c0_72, %c0_73], %71 {strides = array<i32>} : memref<1x8x8x128xf32, #tpu.memory_space<vmem>>, vector<1x8x8x128xf32>,
    %cst_74 = arith.constant dense<0.000000e+00> : vector<128xf32>
    %73 = vector.multi_reduction <add>, %70, %cst_74 [0] : vector<64x128xf32> to vector<128xf32>
    %74 = vector.shape_cast %73 : vector<128xf32> to vector<1x1x128xf32>
    %c0_75 = arith.constant 0 : index
    %c0_76 = arith.constant 0 : index
    %c0_77 = arith.constant 0 : index
    %75 = vector.load %arg6[%c0_75, %c0_76, %c0_77] : memref<1x1x128xf32, #tpu.memory_space<vmem>>, vector<1x1x128xf32>
    tpu.vector_store %arg6[%c0_75, %c0_76, %c0_77], %74 {strides = array<i32>} : memref<1x1x128xf32, #tpu.memory_space<vmem>>, vector<1x1x128xf32>,
    %76 = arith.mulf %70, %70 : vector<64x128xf32>
    %cst_78 = arith.constant dense<0.000000e+00> : vector<128xf32>
    %77 = vector.multi_reduction <add>, %76, %cst_78 [0] : vector<64x128xf32> to vector<128xf32>
    %78 = vector.shape_cast %77 : vector<128xf32> to vector<1x1x128xf32>
    %c0_79 = arith.constant 0 : index
    %c0_80 = arith.constant 0 : index
    %c0_81 = arith.constant 0 : index
    %79 = vector.load %arg7[%c0_79, %c0_80, %c0_81] : memref<1x1x128xf32, #tpu.memory_space<vmem>>, vector<1x1x128xf32>
    tpu.vector_store %arg7[%c0_79, %c0_80, %c0_81], %78 {strides = array<i32>} : memref<1x1x128xf32, #tpu.memory_space<vmem>>, vector<1x1x128xf32>,
    return
  }
  func.func @transform_0(%arg0: i32) -> (i32, i32, i32, i32) {
    %c0_i32 = arith.constant 0 : i32
    %c0_i32_0 = arith.constant 0 : i32
    %c0_i32_1 = arith.constant 0 : i32
    %c0_i32_2 = arith.constant 0 : i32
    return %arg0, %c0_i32, %c0_i32_0, %c0_i32_1 : i32, i32, i32, i32
  }
  func.func @transform_1(%arg0: i32) -> (i32, i32) {
    %c0_i32 = arith.constant 0 : i32
    %c0_i32_0 = arith.constant 0 : i32
    %c0_i32_1 = arith.constant 0 : i32
    return %c0_i32, %c0_i32_0 : i32, i32
  }
  func.func @transform_2(%arg0: i32) -> (i32, i32) {
    %c0_i32 = arith.constant 0 : i32
    %c0_i32_0 = arith.constant 0 : i32
    %c0_i32_1 = arith.constant 0 : i32
    return %c0_i32, %c0_i32_0 : i32, i32
  }
  func.func @transform_3(%arg0: i32) -> (i32, i32, i32) {
    %c0_i32 = arith.constant 0 : i32
    %c0_i32_0 = arith.constant 0 : i32
    %c0_i32_1 = arith.constant 0 : i32
    %c0_i32_2 = arith.constant 0 : i32
    return %c0_i32, %c0_i32_0, %c0_i32_1 : i32, i32, i32
  }
  func.func @transform_4(%arg0: i32) -> (i32, i32, i32, i32) {
    %c0_i32 = arith.constant 0 : i32
    %c0_i32_0 = arith.constant 0 : i32
    %c0_i32_1 = arith.constant 0 : i32
    %c0_i32_2 = arith.constant 0 : i32
    return %arg0, %c0_i32, %c0_i32_0, %c0_i32_1 : i32, i32, i32, i32
  }
  func.func @transform_5(%arg0: i32) -> (i32, i32, i32) {
    %c0_i32 = arith.constant 0 : i32
    %c0_i32_0 = arith.constant 0 : i32
    %c0_i32_1 = arith.constant 0 : i32
    return %arg0, %c0_i32, %c0_i32_0 : i32, i32, i32
  }
  func.func @transform_6(%arg0: i32) -> (i32, i32, i32) {
    %c0_i32 = arith.constant 0 : i32
    %c0_i32_0 = arith.constant 0 : i32
    %c0_i32_1 = arith.constant 0 : i32
    return %arg0, %c0_i32, %c0_i32_0 : i32, i32, i32
  }
}

module attributes {stable_mosaic.version = 11 : i64} {
  func.func @_matmul_stats_kernel(%arg0: i32, %arg1: memref<128x128xbf16, #tpu.memory_space<vmem>>, %arg2: memref<128x128xbf16, #tpu.memory_space<vmem>>, %arg3: memref<128x128xf32, #tpu.memory_space<vmem>>, %arg4: memref<1x1x128xf32, #tpu.memory_space<vmem>>, %arg5: memref<1x1x128xf32, #tpu.memory_space<vmem>>) attributes {dimension_semantics = [#tpu.dimension_semantics<parallel>], iteration_bounds = array<i64: 1>, scalar_prefetch = 0 : i64, scratch_operands = 0 : i64, tpu.core_type = #tpu.core_type<tc>, window_params = [{transform_indices = @transform_0, window_bounds = array<i64: 128, 128>}, {pipeline_mode = #tpu.pipeline_mode<synchronous>, transform_indices = @transform_1, window_bounds = array<i64: 128, 128>}, {transform_indices = @transform_2, window_bounds = array<i64: 128, 128>}, {transform_indices = @transform_3, window_bounds = array<i64: 1, 1, 128>}, {transform_indices = @transform_4, window_bounds = array<i64: 1, 1, 128>}]} {
    %c0 = arith.constant 0 : index
    %c0_0 = arith.constant 0 : index
    %0 = vector.load %arg1[%c0, %c0_0] : memref<128x128xbf16, #tpu.memory_space<vmem>>, vector<128x128xbf16>
    %c0_1 = arith.constant 0 : index
    %c0_2 = arith.constant 0 : index
    %1 = vector.load %arg2[%c0_1, %c0_2] : memref<128x128xbf16, #tpu.memory_space<vmem>>, vector<128x128xbf16>
    %cst = arith.constant dense<0.000000e+00> : vector<128x128xf32>
    %2 = tpu.matmul %0, %1, %cst {dimension_numbers = #tpu.dot_dimension_numbers<[1], [0], [0], [1], [0, 0, 1, 1], [], []>} : vector<128x128xbf16>, vector<128x128xbf16>, vector<128x128xf32> -> vector<128x128xf32>
    %c0_3 = arith.constant 0 : index
    %c0_4 = arith.constant 0 : index
    %3 = vector.load %arg3[%c0_3, %c0_4] : memref<128x128xf32, #tpu.memory_space<vmem>>, vector<128x128xf32>
    tpu.vector_store %arg3[%c0_3, %c0_4], %2 {strides = array<i32>} : memref<128x128xf32, #tpu.memory_space<vmem>>, vector<128x128xf32>,
    %cst_5 = arith.constant dense<0.000000e+00> : vector<128xf32>
    %4 = vector.multi_reduction <add>, %2, %cst_5 [0] : vector<128x128xf32> to vector<128xf32>
    %5 = vector.shape_cast %4 : vector<128xf32> to vector<1x1x128xf32>
    %c0_6 = arith.constant 0 : index
    %c0_7 = arith.constant 0 : index
    %c0_8 = arith.constant 0 : index
    %6 = vector.load %arg4[%c0_6, %c0_7, %c0_8] : memref<1x1x128xf32, #tpu.memory_space<vmem>>, vector<1x1x128xf32>
    tpu.vector_store %arg4[%c0_6, %c0_7, %c0_8], %5 {strides = array<i32>} : memref<1x1x128xf32, #tpu.memory_space<vmem>>, vector<1x1x128xf32>,
    %7 = arith.mulf %2, %2 : vector<128x128xf32>
    %cst_9 = arith.constant dense<0.000000e+00> : vector<128xf32>
    %8 = vector.multi_reduction <add>, %7, %cst_9 [0] : vector<128x128xf32> to vector<128xf32>
    %9 = vector.shape_cast %8 : vector<128xf32> to vector<1x1x128xf32>
    %c0_10 = arith.constant 0 : index
    %c0_11 = arith.constant 0 : index
    %c0_12 = arith.constant 0 : index
    %10 = vector.load %arg5[%c0_10, %c0_11, %c0_12] : memref<1x1x128xf32, #tpu.memory_space<vmem>>, vector<1x1x128xf32>
    tpu.vector_store %arg5[%c0_10, %c0_11, %c0_12], %9 {strides = array<i32>} : memref<1x1x128xf32, #tpu.memory_space<vmem>>, vector<1x1x128xf32>,
    return
  }
  func.func @transform_0(%arg0: i32) -> (i32, i32) {
    %c0_i32 = arith.constant 0 : i32
    %c0_i32_0 = arith.constant 0 : i32
    return %arg0, %c0_i32 : i32, i32
  }
  func.func @transform_1(%arg0: i32) -> (i32, i32) {
    %c0_i32 = arith.constant 0 : i32
    %c0_i32_0 = arith.constant 0 : i32
    %c0_i32_1 = arith.constant 0 : i32
    return %c0_i32, %c0_i32_0 : i32, i32
  }
  func.func @transform_2(%arg0: i32) -> (i32, i32) {
    %c0_i32 = arith.constant 0 : i32
    %c0_i32_0 = arith.constant 0 : i32
    return %arg0, %c0_i32 : i32, i32
  }
  func.func @transform_3(%arg0: i32) -> (i32, i32, i32) {
    %c0_i32 = arith.constant 0 : i32
    %c0_i32_0 = arith.constant 0 : i32
    %c0_i32_1 = arith.constant 0 : i32
    return %arg0, %c0_i32, %c0_i32_0 : i32, i32, i32
  }
  func.func @transform_4(%arg0: i32) -> (i32, i32, i32) {
    %c0_i32 = arith.constant 0 : i32
    %c0_i32_0 = arith.constant 0 : i32
    %c0_i32_1 = arith.constant 0 : i32
    return %arg0, %c0_i32, %c0_i32_0 : i32, i32, i32
  }
}

module attributes {stable_mosaic.version = 11 : i64} {
  func.func @_bn_add_relu_kernel(%arg0: i32, %arg1: memref<128x128xf32, #tpu.memory_space<vmem>>, %arg2: memref<1x128xf32, #tpu.memory_space<vmem>>, %arg3: memref<1x128xf32, #tpu.memory_space<vmem>>, %arg4: memref<128x128xf32, #tpu.memory_space<vmem>>, %arg5: memref<1x128xf32, #tpu.memory_space<vmem>>, %arg6: memref<1x128xf32, #tpu.memory_space<vmem>>, %arg7: memref<128x128xf32, #tpu.memory_space<vmem>>) attributes {dimension_semantics = [#tpu.dimension_semantics<parallel>], iteration_bounds = array<i64: 1>, scalar_prefetch = 0 : i64, scratch_operands = 0 : i64, tpu.core_type = #tpu.core_type<tc>, window_params = [{transform_indices = @transform_0, window_bounds = array<i64: 128, 128>}, {pipeline_mode = #tpu.pipeline_mode<synchronous>, transform_indices = @transform_1, window_bounds = array<i64: 1, 128>}, {pipeline_mode = #tpu.pipeline_mode<synchronous>, transform_indices = @transform_2, window_bounds = array<i64: 1, 128>}, {transform_indices = @transform_3, window_bounds = array<i64: 128, 128>}, {pipeline_mode = #tpu.pipeline_mode<synchronous>, transform_indices = @transform_4, window_bounds = array<i64: 1, 128>}, {pipeline_mode = #tpu.pipeline_mode<synchronous>, transform_indices = @transform_5, window_bounds = array<i64: 1, 128>}, {transform_indices = @transform_6, window_bounds = array<i64: 128, 128>}]} {
    %c0 = arith.constant 0 : index
    %c0_0 = arith.constant 0 : index
    %0 = vector.load %arg1[%c0, %c0_0] : memref<128x128xf32, #tpu.memory_space<vmem>>, vector<128x128xf32>
    %c0_1 = arith.constant 0 : index
    %c0_2 = arith.constant 0 : index
    %1 = vector.load %arg2[%c0_1, %c0_2] : memref<1x128xf32, #tpu.memory_space<vmem>>, vector<1x128xf32>
    %2 = vector.broadcast %1 : vector<1x128xf32> to vector<128x128xf32>
    %3 = arith.mulf %0, %2 : vector<128x128xf32>
    %c0_3 = arith.constant 0 : index
    %c0_4 = arith.constant 0 : index
    %4 = vector.load %arg3[%c0_3, %c0_4] : memref<1x128xf32, #tpu.memory_space<vmem>>, vector<1x128xf32>
    %5 = vector.broadcast %4 : vector<1x128xf32> to vector<128x128xf32>
    %6 = arith.addf %3, %5 : vector<128x128xf32>
    %c0_5 = arith.constant 0 : index
    %c0_6 = arith.constant 0 : index
    %7 = vector.load %arg4[%c0_5, %c0_6] : memref<128x128xf32, #tpu.memory_space<vmem>>, vector<128x128xf32>
    %c0_7 = arith.constant 0 : index
    %c0_8 = arith.constant 0 : index
    %8 = vector.load %arg5[%c0_7, %c0_8] : memref<1x128xf32, #tpu.memory_space<vmem>>, vector<1x128xf32>
    %9 = vector.broadcast %8 : vector<1x128xf32> to vector<128x128xf32>
    %10 = arith.mulf %7, %9 : vector<128x128xf32>
    %c0_9 = arith.constant 0 : index
    %c0_10 = arith.constant 0 : index
    %11 = vector.load %arg6[%c0_9, %c0_10] : memref<1x128xf32, #tpu.memory_space<vmem>>, vector<1x128xf32>
    %12 = vector.broadcast %11 : vector<1x128xf32> to vector<128x128xf32>
    %13 = arith.addf %10, %12 : vector<128x128xf32>
    %14 = arith.addf %6, %13 : vector<128x128xf32>
    %cst = arith.constant 0.000000e+00 : f32
    %15 = vector.broadcast %cst : f32 to vector<128x128xf32>
    %16 = arith.maximumf %14, %15 : vector<128x128xf32>
    %c0_11 = arith.constant 0 : index
    %c0_12 = arith.constant 0 : index
    %17 = vector.load %arg7[%c0_11, %c0_12] : memref<128x128xf32, #tpu.memory_space<vmem>>, vector<128x128xf32>
    tpu.vector_store %arg7[%c0_11, %c0_12], %16 {strides = array<i32>} : memref<128x128xf32, #tpu.memory_space<vmem>>, vector<128x128xf32>,
    return
  }
  func.func @transform_0(%arg0: i32) -> (i32, i32) {
    %c0_i32 = arith.constant 0 : i32
    %c0_i32_0 = arith.constant 0 : i32
    return %arg0, %c0_i32 : i32, i32
  }
  func.func @transform_1(%arg0: i32) -> (i32, i32) {
    %c0_i32 = arith.constant 0 : i32
    %c0_i32_0 = arith.constant 0 : i32
    %c0_i32_1 = arith.constant 0 : i32
    return %c0_i32, %c0_i32_0 : i32, i32
  }
  func.func @transform_2(%arg0: i32) -> (i32, i32) {
    %c0_i32 = arith.constant 0 : i32
    %c0_i32_0 = arith.constant 0 : i32
    %c0_i32_1 = arith.constant 0 : i32
    return %c0_i32, %c0_i32_0 : i32, i32
  }
  func.func @transform_3(%arg0: i32) -> (i32, i32) {
    %c0_i32 = arith.constant 0 : i32
    %c0_i32_0 = arith.constant 0 : i32
    return %arg0, %c0_i32 : i32, i32
  }
  func.func @transform_4(%arg0: i32) -> (i32, i32) {
    %c0_i32 = arith.constant 0 : i32
    %c0_i32_0 = arith.constant 0 : i32
    %c0_i32_1 = arith.constant 0 : i32
    return %c0_i32, %c0_i32_0 : i32, i32
  }
  func.func @transform_5(%arg0: i32) -> (i32, i32) {
    %c0_i32 = arith.constant 0 : i32
    %c0_i32_0 = arith.constant 0 : i32
    %c0_i32_1 = arith.constant 0 : i32
    return %c0_i32, %c0_i32_0 : i32, i32
  }
  func.func @transform_6(%arg0: i32) -> (i32, i32) {
    %c0_i32 = arith.constant 0 : i32
    %c0_i32_0 = arith.constant 0 : i32
    return %arg0, %c0_i32 : i32, i32
  }
}

</mosaic_0001>

<bundles_post_ra>
// kernel: basic_block_forward.4
= control target key start
LH: loop header
LB: loop body
LE: loop exit
PB: predicated region body
PF: predicated region fallthrough
CT: control target
= control target key end

     0   :  { %s3083_s15 = smov 0   ;;  %s3456_s0 = inlined_call_operand.vmem [shape: bf16[2,4,9,9,128], index: 0, kind: input, shape index: {}]   ;;  %s3457_s1 = inlined_call_operand.vmem [shape: bf16[9,128,128], index: 1, kind: input, shape index: {}]   ;;  %s3458_s2 = inlined_call_operand.vmem [shape: f32[2,8,8,128], index: 2, kind: output, shape index: {0}]   ;;  %s3459_s3 = inlined_call_operand.vmem [shape: f32[2,1,128], index: 3, kind: output, shape index: {1}]   ;;  %s3460_s4 = inlined_call_operand.vmem [shape: f32[2,1,128], index: 4, kind: output, shape index: {2}]  }
   0x1 LB: > { %s2222_s16 = sadd.s32 4294967295, %s3056_s15   ;;  %p2226_p0 = scmp.ge.s32.totalorder %s3056_s15, 1  ;;  %s3056_s15 = sphi %s3083_s15, %s15_s15  }
   0x2   : > { %p167_p1 = scmp.lt.s32.totalorder %s3056_s15, 3 }
   0x4   : > { %p168_p2 = pnand %p2226_p0, %p167_p1 }
   0x5   : > { %v2954_v0 = vld [vmem:[%s3457_s1 + $0x40] sm:$0xff] (!%p168_p2)   ;;  %p199_p3 = scmp.lt.s32.totalorder (!%p168_p2), %s2222_s16, 1  ;;  %v2956_v2 = vld [vmem:[%s3457_s1 + $0x48] sm:$0xff] (!%p168_p2)   ;;  %v2958_v4 = vld [vmem:[%s3457_s1 + $0x50] sm:$0xff] (!%p168_p2)   ;;  %vm556_vm0 = vsmask.f32 (!%p168_p2), 3328 }
   0x6   : > { %171 = sbr.rel (%p168_p2) target bundleno = 413 (0x19d), region = 28  ;;  %v2955_v1 = vld [vmem:[%s3457_s1 + $0x100] sm:$0xff] (!%p168_p2)   ;;  %2649 = vmatprep.subr.bf16.mxu1 (!%p168_p2), %v2954_v0  ;;  %v2957_v3 = vld [vmem:[%s3457_s1 + $0x108] sm:$0xff] (!%p168_p2)   ;;  %v2959_v5 = vld [vmem:[%s3457_s1 + $0x110] sm:$0xff] (!%p168_p2)   ;;  %vm557_vm1 = vsmask.f32 (!%p168_p2), 7440 }
   0x7   : > { %2745 = vmatprep.subr.bf16.mxu0 (!%p168_p2), %v2955_v1  ;;  %2650 = vmatpush3.bf16.msra.mxu1 (!%p168_p2), %v2954_v0  ;;  %v2960_v6 = vld [vmem:[%s3457_s1 + $0x58] sm:$0xff] (!%p168_p2)   ;;  %v2962_v8 = vld [vmem:[%s3457_s1 + $0x60] sm:$0xff] (!%p168_p2)   ;;  %v2964_v10 = vld [vmem:[%s3457_s1 + $0x68] sm:$0xff] (!%p168_p2)  }
   0x8   : > { %2746 = vmatpush3.bf16.msra.mxu0 (!%p168_p2), %v2955_v1  ;;  %2651 = vmatprep.subr.bf16.mxu1 (!%p168_p2), %v2956_v2  ;;  %v2961_v7 = vld [vmem:[%s3457_s1 + $0x118] sm:$0xff] (!%p168_p2)   ;;  %v2963_v9 = vld [vmem:[%s3457_s1 + $0x120] sm:$0xff] (!%p168_p2)   ;;  %v2965_v12 = vld [vmem:[%s3457_s1 + $0x128] sm:$0xff] (!%p168_p2)  }
   0x9   : > { %2747 = vmatprep.subr.bf16.mxu0 (!%p168_p2), %v2957_v3  ;;  %v2966_v14 = vld [vmem:[%s3457_s1 + $0x70] sm:$0xff] (!%p168_p2)   ;;  %v2968_v16 = vld [vmem:[%s3457_s1 + $0x78] sm:$0xff] (!%p168_p2)   ;;  %v2971_v18 = vld [vmem:[%s3457_s1] sm:$0xff] (!%p168_p2)  }
   0xa   : > { %v2967_v15 = vld [vmem:[%s3457_s1 + $0x130] sm:$0xff] (!%p168_p2)   ;;  %v2969_v17 = vld [vmem:[%s3457_s1 + $0x138] sm:$0xff] (!%p168_p2)   ;;  %v2973_v19 = vld [vmem:[%s3457_s1 + $0x140] sm:$0xff] (!%p168_p2)  }
   0xb   : > { %2652 = vmatpush3.bf16.msra.mxu1 (!%p168_p2), %v2956_v2  ;;  %v2976_v22 = vld [vmem:[%s3457_s1 + $0x8] sm:$0xff] (!%p168_p2)   ;;  %v2978_v26 = vld [vmem:[%s3457_s1 + $0x10] sm:$0xff] (!%p168_p2)   ;;  %v2980_v28 = vld [vmem:[%s3457_s1 + $0x18] sm:$0xff] (!%p168_p2)  }
   0xc   : > { %2748 = vmatpush3.bf16.msra.mxu0 (!%p168_p2), %v2957_v3  ;;  %2653 = vmatprep.subr.bf16.mxu1 (!%p168_p2), %v2958_v4  ;;  %v2977_v23 = vld [vmem:[%s3457_s1 + $0x148] sm:$0xff] (!%p168_p2)   ;;  %v2979_v27 = vld [vmem:[%s3457_s1 + $0x150] sm:$0xff] (!%p168_p2)   ;;  %v2981_v31 = vld [vmem:[%s3457_s1 + $0x158] sm:$0xff] (!%p168_p2)  }
   0xd   : > { %s3464_s16 = smov (!%p199_p3, %s2222_s16), 1  ;;  %2749 = vmatprep.subr.bf16.mxu0 %v2959_v5  ;;  %v2982_v38 = vld [vmem:[%s3457_s1 + $0x20] sm:$0xff]   ;;  %v2984_v47 = vld [vmem:[%s3457_s1 + $0x28] sm:$0xff]   ;;  %vm3198_vm2 = vmor %vm556_vm0, %vm557_vm1 }
   0xe   : > { %s2945_s7 = smul.u32 288, %s3464_s16  ;;  %v2983_v43 = vld [vmem:[%s3457_s1 + $0x160] sm:$0xff]   ;;  %v2985_v50 = vld [vmem:[%s3457_s1 + $0x168] sm:$0xff]   ;;  %v2987_v2 = vld [vmem:[%s3457_s1 + $0x30] sm:$0xff]   ;;  %s2540_s25 = sshll.u32 %s3464_s16, 6 }
   0xf   : > { %2654 = vmatpush3.bf16.msra.mxu1 %v2958_v4  ;;  %s208_s28 = scalar_lea.vmem %s3458_s2, %s2540_s25  ;;  %s211_s5 = scalar_lea.vmem %s3459_s3, %s3464_s16 }
  0x10   : > { %2750 = vmatpush3.bf16.msra.mxu0 %v2959_v5  ;;  %2655 = vmatprep.subr.bf16.mxu1 %v2960_v6  ;;  %s3127_s14 = scalar_lea.vmem %s3456_s0, %s2945_s7  ;;  %s214_s8 = scalar_lea.vmem %s3460_s4, %s3464_s16 }
  0x11   : > { %2751 = vmatprep.subr.bf16.mxu0 %v2961_v7  ;;  %v2970_v11 = vld [vmem:[%s3127_s14 + $0x48] ss:$8 sps:$4 sm:$0xff]   ;;  %v2972_v13 = vld [vmem:[%s3127_s14 + $0xd8] ss:$8 sps:$4 sm:$0xff]   ;;  %v2379_v34 = vld [vmem:[%s3127_s14 + $0x94] sm:$0x1] }
  0x12   : > { %2665 = vmatprep.mubr.bf16.mxu1 %v2970_v11  ;;  %2761 = vmatprep.mubr.bf16.mxu0 %v2972_v13  ;;  %v2974_v20 = vld [vmem:[%s3127_s14 + $0x58] ss:$8 sps:$4 sm:$0xff]   ;;  %v2975_v21 = vld [vmem:[%s3127_s14 + $0xe8] ss:$8 sps:$4 sm:$0xff]   ;;  %v2381_v39 = vld [vmem:[%s3127_s14 + $0x9c] sm:$0x1] }
  0x13   : > { %2656 = vmatpush3.bf16.msra.mxu1 %v2960_v6  ;;  %v2986_v24 = vld [vmem:[%s3127_s14 + $0x68] ss:$8 sps:$4 sm:$0xff]   ;;  %v2988_v25 = vld [vmem:[%s3127_s14 + $0xf8] ss:$8 sps:$4 sm:$0xff]   ;;  %v1193_v40 = vshll.u32 %v2379_v34, 16  ;;  %v1207_v46 = vshll.u32 %v2381_v39, 16 }
  0x14   : > { %2752 = vmatpush3.bf16.msra.mxu0 %v2961_v7  ;;  %2657 = vmatprep.subr.bf16.mxu1 %v2962_v8  ;;  %v2990_v29 = vld [vmem:[%s3127_s14 + $0x78] ss:$8 sps:$4 sm:$0xff]   ;;  %v2991_v30 = vld [vmem:[%s3127_s14 + $0x108] ss:$8 sps:$4 sm:$0xff]   ;;  %v2383_v57 = vld [vmem:[%s3127_s14 + $0xa4] sm:$0x1] }
  0x15   : > { %2753 = vmatprep.subr.bf16.mxu0 %v2963_v9  ;;  %v2994_v32 = vld [vmem:[%s3127_s14] ss:$8 sps:$4 sm:$0xff]   ;;  %v2378_v33 = vld [vmem:[%s3127_s14 + $0x90] sm:$0xf]  ;;  %v2380_v35 = vld [vmem:[%s3127_s14 + $0x98] sm:$0xf] }
  0x16   : > { %v1184_v36 = vshrl.u32 %v2378_v33, 16  ;;  %v1187_v37 = vshll.u32 %v2378_v33, 16  ;;  %v1198_v41 = vshrl.u32 %v2380_v35, 16  ;;  %v1201_v42 = vshll.u32 %v2380_v35, 16  ;;  %v2382_v56 = vld [vmem:[%s3127_s14 + $0xa0] sm:$0xf] }
  0x17   : > { %2658 = vmatpush3.bf16.msra.mxu1 %v2962_v8  ;;  %v1195_v52 = vrot.slane %v1193_v40, 5  ;;  %v1209_v55 = vrot.slane %v1207_v46, 5  ;;  %v2384_v59 = vld [vmem:[%s3127_s14 + $0xa8] sm:$0xf]  ;;  %v2385_v60 = vld [vmem:[%s3127_s14 + $0xac] sm:$0x1] }
  0x18   : > { %2754 = vmatpush3.bf16.msra.mxu0 %v2963_v9  ;;  %2659 = vmatprep.subr.bf16.mxu1 %v2964_v10  ;;  %v1186_v44 = vrot.slane %v1184_v36, 4  ;;  %v1189_v45 = vrot.slane %v1187_v37, 5  ;;  %v1200_v48 = vrot.slane %v1198_v41, 4  ;;  %v1203_v49 = vrot.slane %v1201_v42, 5  ;;  %v2989_v6 = vld [vmem:[%s3457_s1 + $0x170] sm:$0xff]  }
  0x19   : > { %2755 = vmatprep.subr.bf16.mxu0 %v2965_v12  ;;  %v1212_v61 = vshrl.u32 %v2382_v56, 16  ;;  %v1215_v63 = vshll.u32 %v2382_v56, 16  ;;  %v1221_v0 = vshll.u32 %v2383_v57, 16  ;;  %v1226_v1 = vshrl.u32 %v2384_v59, 16  ;;  %v3008_v37 = vld [vmem:[%s3127_s14 + $0x20] ss:$8 sps:$4 sm:$0xff]  }
  0x1a   : > { %v1190_v51 = vor.u32 %v1189_v45, %v1186_v44  ;;  %v1204_v54 = vor.u32 %v1203_v49, %v1200_v48  ;;  %v1229_v5 = vshll.u32 %v2384_v59, 16  ;;  %v3011_v48 = vld [vmem:[%s3127_s14 + $0x30] ss:$8 sps:$4 sm:$0xff]   ;;  %v2390_v49 = vld [vmem:[%s3127_s14 + $0xc0] sm:$0xf] }
  0x1b   : > { %2660 = vmatpush3.bf16.msra.mxu1 %v2964_v10  ;;  %v1214_v4 = vrot.slane %v1212_v61, 4  ;;  %v1217_v8 = vrot.slane %v1215_v63, 5  ;;  %v1228_v9 = vrot.slane %v1226_v1, 4  ;;  %v1235_v10 = vshll.u32 %v2385_v60, 16  ;;  %v3002_v59 = vld [vmem:[%s3457_s1 + $0x98] sm:$0xff]  }
  0x1c   : > { %2756 = vmatpush3.bf16.msra.mxu0 %v2965_v12  ;;  %2661 = vmatprep.subr.bf16.mxu1 %v2966_v14  ;;  %v1191_v58 = vrot.slane %v1190_v51, 4  ;;  %v1205_v62 = vrot.slane %v1204_v54, 4  ;;  %v1223_v12 = vrot.slane %v1221_v0, 5  ;;  %v1231_v13 = vrot.slane %v1229_v5, 5  ;;  %v2392_v51 = vld [vmem:[%s3127_s14 + $0xc8] sm:$0xf] }
  0x1d   : > { %2757 = vmatprep.subr.bf16.mxu0 %v2967_v15  ;;  %v1268_v56 = vshrl.u32 %v2390_v49, 16  ;;  %v1271_v57 = vshll.u32 %v2390_v49, 16  ;;  %v1282_v61 = vshrl.u32 %v2392_v51, 16 }
  0x1e   : > { %v1196_v3 = vsel %vm3198_vm2, %v1191_v58, %v1195_v52  ;;  %v1210_v7 = vsel %vm3198_vm2, %v1205_v62, %v1209_v55  ;;  %v3001_v52 = vld [vmem:[%s3457_s1 + $0x190] sm:$0xff]   ;;  %v2393_v55 = vld [vmem:[%s3127_s14 + $0xcc] sm:$0x1]  ;;  %v1285_v62 = vshll.u32 %v2392_v51, 16 }
  0x1f   : > { %2662 = vmatpush3.bf16.msra.mxu1 %v2966_v14  ;;  %v2410_v11 = vcombine.low %v1196_v3, %v1210_v7  ;;  %v2992_v14 = vld [vmem:[%s3457_s1 + $0x38] sm:$0xff]   ;;  %v1291_v63 = vshll.u32 %v2393_v55, 16  ;;  %v1270_v1 = vrot.slane %v1268_v56, 4 }
  0x20   : > { %2758 = vmatpush3.bf16.msra.mxu0 %v2967_v15  ;;  %2663 = vmatprep.subr.bf16.mxu1 %v2968_v16  ;;  %v1218_v15 = vor.u32 %v1217_v8, %v1214_v4  ;;  %v3003_v4 = vld [vmem:[%s3457_s1 + $0x198] sm:$0xff]   ;;  %v1287_v7 = vrot.slane %v1285_v62, 5 }
  0x21   : > { %2759 = vmatprep.subr.bf16.mxu0 %v2969_v17  ;;  %v1293_v8 = vrot.slane %v1291_v63, 5 }
  0x23   : > { %2664 = vmatpush3.bf16.msra.mxu1 %v2968_v16  ;;  %v1232_v16 = vor.u32 %v1231_v13, %v1228_v9  ;;  %v3004_v13 = vld [vmem:[%s3457_s1 + $0xa0] sm:$0xff]  }
  0x24   : > { %2760 = vmatpush3.bf16.msra.mxu0 %v2969_v17  ;;  %2673 = vmatprep.subr.bf16.mxu1 %v2971_v18  ;;  %v1219_v17 = vrot.slane %v1218_v15, 4 }
  0x25   : > { %2769 = vmatprep.subr.bf16.mxu0 %v2973_v19 }
  0x26   : > { %2666 = vmatmul.mubr.bf16.vlgmr.msra.gmra.mrb[0].mxu1 %v2974_v20  ;;  %v1233_v20 = vrot.slane %v1232_v16, 4  ;;  %v542_v16 = vld [vmem:[%s3127_s14 + $0x8] sm:$0xf] }
  0x27   : > { %2674 = vmatpush3.bf16.msra.mxu1 %v2971_v18  ;;  %2762 = vmatmul.mubr.bf16.vlgmr.msra.gmra.mrb[0].mxu0 %v2975_v21  ;;  %v1237_v18 = vrot.slane %v1235_v10, 5  ;;  %v2995_v21 = vld [vmem:[%s3457_s1 + $0x80] sm:$0xff]  }
  0x28   : > { %2770 = vmatpush3.bf16.msra.mxu0 %v2973_v19  ;;  %2675 = vmatprep.subr.bf16.mxu1 %v2976_v22  ;;  %v2993_v19 = vld [vmem:[%s3457_s1 + $0x178] sm:$0xff]  }
  0x29   : > { %2771 = vmatprep.subr.bf16.mxu0 %v2977_v23  ;;  %2669 = vmatprep.mubr.bf16.mxu1 %v2986_v24  ;;  %v2996_v24 = vld [vmem:[%s3457_s1 + $0x180] sm:$0xff]  }
  0x2a   : > { %2765 = vmatprep.mubr.bf16.mxu0 %v2988_v25  ;;  %v2997_v25 = vld [vmem:[%s3127_s14 + $0x10] ss:$8 sps:$4 sm:$0xff]  }
  0x2b   : > { %2676 = vmatpush3.bf16.msra.mxu1 %v2976_v22  ;;  %v1224_v22 = vsel %vm3198_vm2, %v1219_v17, %v1223_v12  ;;  %v541_v12 = vld [vmem:[%s3127_s14 + $0x4] sm:$0x1]  ;;  %v543_v17 = vld [vmem:[%s3127_s14 + $0xc] sm:$0x1] }
  0x2c   : > { %2772 = vmatpush3.bf16.msra.mxu0 %v2977_v23  ;;  %2677 = vmatprep.subr.bf16.mxu1 %v2978_v26  ;;  %v1238_v23 = vsel %vm3198_vm2, %v1233_v20, %v1237_v18 }
  0x2d   : > { %2773 = vmatprep.subr.bf16.mxu0 %v2979_v27 }
  0x2e   : > { %2670 = vmatmul.mubr.bf16.gmra.mrb[4].mxu1 %v2990_v29  ;;  %v2999_v29 = vld [vmem:[%s3457_s1 + $0x188] sm:$0xff]  }
  0x2f   : > { %2678 = vmatpush3.bf16.msra.mxu1 %v2978_v26  ;;  %2766 = vmatmul.mubr.bf16.gmra.mrb[4].mxu0 %v2991_v30  ;;  %v2998_v26 = vld [vmem:[%s3457_s1 + $0x88] sm:$0xff]   ;;  %v2387_v30 = vld [vmem:[%s3127_s14 + $0xb4] sm:$0x1] }
  0x30   : > { %2774 = vmatpush3.bf16.msra.mxu0 %v2979_v27  ;;  %2679 = vmatprep.subr.bf16.mxu1 %v2980_v28  ;;  %v2386_v27 = vld [vmem:[%s3127_s14 + $0xb0] sm:$0xf]  ;;  %v1249_v35 = vshll.u32 %v2387_v30, 16 }
  0x31   : > { %2775 = vmatprep.subr.bf16.mxu0 %v2981_v31  ;;  %2689 = vmatprep.mubr.bf16.mxu1 %v2994_v32  ;;  %v2389_v32 = vld [vmem:[%s3127_s14 + $0xbc] sm:$0x1]  ;;  %v1240_v33 = vshrl.u32 %v2386_v27, 16  ;;  %v1243_v34 = vshll.u32 %v2386_v27, 16  ;;  %v583_v27 = vshll.u32 %v543_v17, 16 }
  0x32   : > { %2785 = vmatprep.mubr.bf16.mxu0 %v2410_v11  ;;  %v1263_v39 = vshll.u32 %v2389_v32, 16  ;;  %v1251_v44 = vrot.slane %v1249_v35, 5  ;;  %v540_v11 = vld [vmem:[%s3127_s14] sm:$0xf]  ;;  %v3006_v32 = vld [vmem:[%s3457_s1 + $0xa8] sm:$0xff]  }
  0x33   : > { %2680 = vmatpush3.bf16.msra.mxu1 %v2980_v28  ;;  %v2411_v28 = vcombine.low %v1224_v22, %v1238_v23  ;;  %v1242_v40 = vrot.slane %v1240_v33, 4  ;;  %v1245_v41 = vrot.slane %v1243_v34, 5  ;;  %v560_v18 = vshrl.u32 %v540_v11, 16  ;;  %v551_v17 = vld [vmem:[%s3127_s14 + $0x2c] sm:$0x1] }
  0x34   : > { %2776 = vmatpush3.bf16.msra.mxu0 %v2981_v31  ;;  %2681 = vmatprep.subr.bf16.mxu1 %v2982_v38  ;;  %v2388_v31 = vld [vmem:[%s3127_s14 + $0xb8] sm:$0xf]  ;;  %v1265_v46 = vrot.slane %v1263_v39, 5  ;;  %v574_v22 = vshrl.u32 %v542_v16, 16  ;;  %v577_v23 = vshll.u32 %v542_v16, 16 }
  0x35   : > { %2777 = vmatprep.subr.bf16.mxu0 %v2983_v43  ;;  %v1254_v36 = vshrl.u32 %v2388_v31, 16  ;;  %v550_v16 = vld [vmem:[%s3127_s14 + $0x28] sm:$0xf] }
  0x36   : > { %v576_v30 = vrot.slane %v574_v22, 4  ;;  %v630_v22 = vshrl.u32 %v550_v16, 16 }
  0x37   : > { %2682 = vmatpush3.bf16.msra.mxu1 %v2982_v38  ;;  %v1257_v38 = vshll.u32 %v2388_v31, 16  ;;  %v1256_v42 = vrot.slane %v1254_v36, 4  ;;  %v579_v31 = vrot.slane %v577_v23, 5  ;;  %v585_v36 = vrot.slane %v583_v27, 5 }
  0x38   : > { %2778 = vmatpush3.bf16.msra.mxu0 %v2983_v43  ;;  %2683 = vmatprep.subr.bf16.mxu1 %v2984_v47  ;;  %v3000_v43 = vld [vmem:[%s3457_s1 + $0x90] sm:$0xff]   ;;  %v633_v23 = vshll.u32 %v550_v16, 16  ;;  %v2495_v16 = vld [vmem:[%s3127_s14 + $0xc] sm:$0x1] }
  0x39   : > { %2779 = vmatprep.subr.bf16.mxu0 %v2985_v50  ;;  %v1259_v45 = vrot.slane %v1257_v38, 5  ;;  %v3007_v38 = vld [vmem:[%s3457_s1 + $0x1a8] sm:$0xff]  }
  0x3b   : > { %2684 = vmatpush3.bf16.msra.mxu1 %v2984_v47  ;;  %v1246_v47 = vor.u32 %v1245_v41, %v1242_v40  ;;  %v1260_v54 = vor.u32 %v1259_v45, %v1256_v42  ;;  %v580_v40 = vor.u32 %v579_v31, %v576_v30  ;;  %v544_v41 = vld [vmem:[%s3127_s14 + $0x10] sm:$0xf]  ;;  %v635_v31 = vrot.slane %v633_v23, 5 }
  0x3c   : > { %2780 = vmatpush3.bf16.msra.mxu0 %v2985_v50  ;;  %2685 = vmatprep.subr.bf16.mxu1 %v2987_v2  ;;  %v2391_v50 = vld [vmem:[%s3127_s14 + $0xc4] sm:$0x1]  ;;  %v588_v45 = vshrl.u32 %v544_v41, 16  ;;  %v552_v30 = vld [vmem:[%s3127_s14 + $0x30] sm:$0xf] }
  0x3d   : > { %2781 = vmatprep.subr.bf16.mxu0 %v2989_v6  ;;  %v1277_v58 = vshll.u32 %v2391_v50, 16  ;;  %v1247_v60 = vrot.slane %v1246_v47, 4  ;;  %v1261_v0 = vrot.slane %v1260_v54, 4  ;;  %v547_v47 = vld [vmem:[%s3127_s14 + $0x1c] sm:$0x1] }
  0x3f   : > { %2686 = vmatpush3.bf16.msra.mxu1 %v2987_v2  ;;  %v1273_v2 = vrot.slane %v1271_v57, 5  ;;  %v1279_v3 = vrot.slane %v1277_v58, 5  ;;  %v1252_v5 = vsel %vm3198_vm2, %v1247_v60, %v1251_v44  ;;  %v1266_v9 = vsel %vm3198_vm2, %v1261_v0, %v1265_v46  ;;  %v546_v44 = vld [vmem:[%s3127_s14 + $0x18] sm:$0xf]  ;;  %v3010_v60 = vld [vmem:[%s3457_s1 + $0x1b0] sm:$0xff]  }
  0x40   : > { %2782 = vmatpush3.bf16.msra.mxu0 %v2989_v6  ;;  %2687 = vmatprep.subr.bf16.mxu1 %v2992_v14  ;;  %v1284_v6 = vrot.slane %v1282_v61, 4  ;;  %v581_v46 = vrot.slane %v580_v40, 4  ;;  %v602_v50 = vshrl.u32 %v546_v44, 16  ;;  %v605_v54 = vshll.u32 %v546_v44, 16 }
  0x41   : > { %2783 = vmatprep.subr.bf16.mxu0 %v2993_v19  ;;  %v1274_v10 = vor.u32 %v1273_v2, %v1270_v1  ;;  %v611_v58 = vshll.u32 %v547_v47, 16 }
  0x42   : > { %v1288_v15 = vor.u32 %v1287_v7, %v1284_v6  ;;  %v586_v55 = vsel %vm3198_vm2, %v581_v46, %v585_v36  ;;  %v604_v57 = vrot.slane %v602_v50, 4  ;;  %v607_v63 = vrot.slane %v605_v54, 5  ;;  %v3013_v6 = vld [vmem:[%s3457_s1 + $0x1b8] sm:$0xff]   ;;  %v3014_v7 = vld [vmem:[%s3457_s1 + $0xc0] sm:$0xff]  }
  0x43   : > { %2688 = vmatpush3.bf16.msra.mxu1 %v2992_v14  ;;  %v2412_v14 = vcombine.low %v1252_v5, %v1266_v9  ;;  %v1275_v20 = vrot.slane %v1274_v10, 4  ;;  %v3016_v10 = vld [vmem:[%s3457_s1 + $0x1c0] sm:$0xff]   ;;  %v3022_v50 = vld [vmem:[%s3457_s1 + $0xd8] sm:$0xff]  }
  0x44   : > { %2784 = vmatpush3.bf16.msra.mxu0 %v2993_v19  ;;  %2697 = vmatprep.subr.bf16.mxu1 %v2995_v21  ;;  %v563_v19 = vshll.u32 %v540_v11, 16  ;;  %v608_v1 = vor.u32 %v607_v63, %v604_v57  ;;  %v3017_v11 = vld [vmem:[%s3127_s14 + $0x18] ss:$8 sps:$4 sm:$0xff]  }
  0x45   : > { %2793 = vmatprep.subr.bf16.mxu0 %v2996_v24 }
  0x46   : > { %2690 = vmatmul.mubr.bf16.vlgmr.msra.gmra.mrb[0].mxu1 %v2997_v25  ;;  %v562_v25 = vrot.slane %v560_v18, 4  ;;  %v609_v5 = vrot.slane %v608_v1, 4  ;;  %v3019_v18 = vld [vmem:[%s3457_s1 + $0x1c8] sm:$0xff]   ;;  %v3024_v1 = vld [vmem:[%s3457_s1 + $0xe0] sm:$0xff]  }
  0x47   : > { %2698 = vmatpush3.bf16.msra.mxu1 %v2995_v21  ;;  %2786 = vmatmul.mubr.bf16.vlgmr.msra.gmra.mrb[0].mxu0 %v2411_v28  ;;  %v569_v21 = vshll.u32 %v541_v12, 16  ;;  %v3005_v28 = vld [vmem:[%s3457_s1 + $0x1a0] sm:$0xff]  }
  0x48   : > { %2794 = vmatpush3.bf16.msra.mxu0 %v2996_v24  ;;  %2699 = vmatprep.subr.bf16.mxu1 %v2998_v26  ;;  %v1289_v24 = vrot.slane %v1288_v15, 4  ;;  %v548_v12 = vld [vmem:[%s3127_s14 + $0x20] sm:$0xf]  ;;  %v549_v15 = vld [vmem:[%s3127_s14 + $0x24] sm:$0x1] }
  0x49   : > { %2795 = vmatprep.subr.bf16.mxu0 %v2999_v29  ;;  %2693 = vmatprep.mubr.bf16.mxu1 %v3008_v37  ;;  %v571_v35 = vrot.slane %v569_v21, 5  ;;  %v3015_v37 = vld [vmem:[%s3127_s14 + $0x8] ss:$8 sps:$4 sm:$0xff]   ;;  %v625_v21 = vshll.u32 %v549_v15, 16 }
  0x4a   : > { %2789 = vmatprep.mubr.bf16.mxu0 %v2412_v14  ;;  %v1294_v33 = vsel %vm3198_vm2, %v1289_v24, %v1293_v8  ;;  %v3018_v14 = vld [vmem:[%s3457_s1 + $0xc8] sm:$0xff]   ;;  %v639_v24 = vshll.u32 %v551_v17, 16  ;;  %v2496_v17 = vld [vmem:[%s3127_s14 + $0x10] sm:$0xf] }
  0x4b   : > { %2700 = vmatpush3.bf16.msra.mxu1 %v2998_v26  ;;  %v565_v26 = vrot.slane %v563_v19, 5  ;;  %v616_v19 = vshrl.u32 %v548_v12, 16  ;;  %v2494_v15 = vld [vmem:[%s3127_s14 + $0x8] sm:$0xf]  ;;  %v1825_v23 = vshll.u32 %v2496_v17, 16 }
  0x4c   : > { %2796 = vmatpush3.bf16.msra.mxu0 %v2999_v29  ;;  %2701 = vmatprep.subr.bf16.mxu1 %v3000_v43  ;;  %v1280_v29 = vsel %vm3198_vm2, %v1275_v20, %v1279_v3  ;;  %v613_v3 = vrot.slane %v611_v58, 5  ;;  %v619_v20 = vshll.u32 %v548_v12, 16  ;;  %v3030_v58 = vld [vmem:[%s3127_s14 + $0x38] ss:$8 sps:$4 sm:$0xff]  }
  0x4d   : > { %2797 = vmatprep.subr.bf16.mxu0 %v3001_v52  ;;  %v566_v34 = vor.u32 %v565_v26, %v562_v25  ;;  %v2413_v39 = vcombine.low %v1280_v29, %v1294_v33  ;;  %v3028_v25 = vld [vmem:[%s3127_s14 + $0x28] ss:$8 sps:$4 sm:$0xff]   ;;  %v618_v26 = vrot.slane %v616_v19, 4  ;;  %v632_v29 = vrot.slane %v630_v22, 4  ;;  %v553_v33 = vld [vmem:[%s3127_s14 + $0x34] sm:$0x1] }
  0x4e   : > { %2694 = vmatmul.mubr.bf16.gmra.mrb[4].mxu1 %v3011_v48  ;;  %v591_v48 = vshll.u32 %v544_v41, 16  ;;  %v614_v9 = vsel %vm3198_vm2, %v609_v5, %v613_v3  ;;  %v621_v27 = vrot.slane %v619_v20, 5  ;;  %v653_v40 = vshll.u32 %v553_v33, 16  ;;  %v3021_v41 = vld [vmem:[%s3457_s1 + $0x1d0] sm:$0xff]   ;;  %v3025_v5 = vld [vmem:[%s3457_s1 + $0x1e0] sm:$0xff]   ;;  %v3032_v12 = vld [vmem:[%s3457_s1 + $0xf8] sm:$0xff]  }
  0x4f   : > { %2702 = vmatpush3.bf16.msra.mxu1 %v3000_v43  ;;  %v567_v42 = vrot.slane %v566_v34, 4  ;;  %v545_v43 = vld [vmem:[%s3127_s14 + $0x14] sm:$0x1]  ;;  %2790 = vmatmul.mubr.bf16.gmra.mrb[4].mxu0 %v2413_v39  ;;  %v554_v34 = vld [vmem:[%s3127_s14 + $0x38] sm:$0xf]  ;;  %v647_v39 = vshll.u32 %v552_v30, 16 }
  0x50   : > { %2798 = vmatpush3.bf16.msra.mxu0 %v3001_v52  ;;  %2703 = vmatprep.subr.bf16.mxu1 %v3002_v59  ;;  %v597_v49 = vshll.u32 %v545_v43, 16  ;;  %v590_v52 = vrot.slane %v588_v45, 4  ;;  %v593_v56 = vrot.slane %v591_v48, 5  ;;  %v622_v36 = vor.u32 %v621_v27, %v618_v26  ;;  %v2505_v33 = vld [vmem:[%s3127_s14 + $0x34] sm:$0x1] }
  0x51   : > { %2799 = vmatprep.subr.bf16.mxu0 %v3003_v4  ;;  %v572_v51 = vsel %vm3198_vm2, %v567_v42, %v571_v35  ;;  %2809 = vmatprep.mubr.bf16.mxu0 %v3015_v37  ;;  %v3020_v35 = vld [vmem:[%s3457_s1 + $0xd0] sm:$0xff]   ;;  %v555_v37 = vld [vmem:[%s3127_s14 + $0x3c] sm:$0x1]  ;;  %v636_v42 = vor.u32 %v635_v31, %v632_v29  ;;  %v658_v43 = vshrl.u32 %v554_v34, 16  ;;  %v661_v44 = vshll.u32 %v554_v34, 16 }
  0x52   : > { %v2294_v61 = vcombine.low %v572_v51, %v586_v55  ;;  %v599_v62 = vrot.slane %v597_v49, 5  ;;  %v594_v0 = vor.u32 %v593_v56, %v590_v52  ;;  %v667_v45 = vshll.u32 %v555_v37, 16  ;;  %v2504_v29 = vld [vmem:[%s3127_s14 + $0x30] sm:$0xf]  ;;  %v3037_v34 = vld [vmem:[%s3127_s14 + $0x60] ss:$8 sps:$4 sm:$0xff]  }
  0x53   : > { %2704 = vmatpush3.bf16.msra.mxu1 %v3002_v59  ;;  %v3009_v59 = vld [vmem:[%s3457_s1 + $0xb0] sm:$0xff]   ;;  %v623_v46 = vrot.slane %v622_v36, 4  ;;  %v649_v48 = vrot.slane %v647_v39, 5  ;;  %v655_v49 = vrot.slane %v653_v40, 5  ;;  %v637_v51 = vrot.slane %v636_v42, 4  ;;  %v3039_v39 = vld [vmem:[%s3457_s1 + $0x208] sm:$0xff]  }
  0x54   : > { %2800 = vmatpush3.bf16.msra.mxu0 %v3003_v4  ;;  %2705 = vmatprep.subr.bf16.mxu1 %v3004_v13  ;;  %v595_v2 = vrot.slane %v594_v0, 4  ;;  %v3012_v4 = vld [vmem:[%s3457_s1 + $0xb8] sm:$0xff]   ;;  %v660_v52 = vrot.slane %v658_v43, 4  ;;  %v663_v54 = vrot.slane %v661_v44, 5  ;;  %v669_v55 = vrot.slane %v667_v45, 5 }
  0x55   : > { %2801 = vmatprep.subr.bf16.mxu0 %v3005_v28  ;;  %2713 = vmatprep.mubr.bf16.mxu1 %v2294_v61  ;;  %v3023_v61 = vld [vmem:[%s3457_s1 + $0x1d8] sm:$0xff]   ;;  %v1808_v19 = vshrl.u32 %v2494_v15, 16  ;;  %v1811_v20 = vshll.u32 %v2494_v15, 16  ;;  %v1822_v22 = vshrl.u32 %v2496_v17, 16  ;;  %v1881_v42 = vshll.u32 %v2504_v29, 16  ;;  %v3046_v15 = vld [vmem:[%s3457_s1 + $0x220] sm:$0xff]  }
  0x56   : > { %v600_v8 = vsel %vm3198_vm2, %v595_v2, %v599_v62  ;;  %v1887_v43 = vshll.u32 %v2505_v33, 16  ;;  %v3040_v44 = vld [vmem:[%s3127_s14 + $0xb0] ss:$8 sps:$4 sm:$0xff]  }
  0x57   : > { %2706 = vmatpush3.bf16.msra.mxu1 %v3004_v13  ;;  %v2295_v13 = vcombine.low %v600_v8, %v614_v9  ;;  %v3026_v8 = vld [vmem:[%s3457_s1 + $0xe8] sm:$0xff]   ;;  %v1810_v26 = vrot.slane %v1808_v19, 4  ;;  %v1813_v27 = vrot.slane %v1811_v20, 5  ;;  %v1824_v31 = vrot.slane %v1822_v22, 4 }
  0x58   : > { %2802 = vmatpush3.bf16.msra.mxu0 %v3005_v28  ;;  %2707 = vmatprep.subr.bf16.mxu1 %v3006_v32  ;;  %v627_v28 = vrot.slane %v625_v21, 5  ;;  %v3027_v9 = vld [vmem:[%s3457_s1 + $0x1e8] sm:$0xff]   ;;  %v1817_v21 = vshll.u32 %v2495_v16, 16 }
  0x59   : > { %2803 = vmatprep.subr.bf16.mxu0 %v3007_v38  ;;  %v3047_v20 = vld [vmem:[%s3457_s1 + $0x228] sm:$0xff]  }
  0x5a   : > { %v628_v56 = vsel %vm3198_vm2, %v623_v46, %v627_v28  ;;  %v2503_v28 = vld [vmem:[%s3127_s14 + $0x2c] sm:$0x1]  ;;  %v1819_v45 = vrot.slane %v1817_v21, 5  ;;  %v2507_v21 = vld [vmem:[%s3127_s14 + $0x3c] sm:$0x1] }
  0x5b   : > { %2708 = vmatpush3.bf16.msra.mxu1 %v3006_v32  ;;  %v641_v32 = vrot.slane %v639_v24, 5 }
  0x5c   : > { %2804 = vmatpush3.bf16.msra.mxu0 %v3007_v38  ;;  %2709 = vmatprep.subr.bf16.mxu1 %v3009_v59  ;;  %v644_v38 = vshrl.u32 %v552_v30, 16  ;;  %v3036_v30 = vld [vmem:[%s3127_s14 + $0xa0] ss:$8 sps:$4 sm:$0xff]  }
  0x5d   : > { %2805 = vmatprep.subr.bf16.mxu0 %v3010_v60 }
  0x5e   : > { %v646_v47 = vrot.slane %v644_v38, 4  ;;  %v1873_v38 = vshll.u32 %v2503_v28, 16 }
  0x5f   : > { %2710 = vmatpush3.bf16.msra.mxu1 %v3009_v59  ;;  %v642_v59 = vsel %vm3198_vm2, %v637_v51, %v641_v32  ;;  %v1827_v32 = vrot.slane %v1825_v23, 5 }
  0x60   : > { %2806 = vmatpush3.bf16.msra.mxu0 %v3010_v60  ;;  %2711 = vmatprep.subr.bf16.mxu1 %v3012_v4  ;;  %v650_v57 = vor.u32 %v649_v48, %v646_v47  ;;  %v664_v60 = vor.u32 %v663_v54, %v660_v52  ;;  %v2296_v62 = vcombine.low %v628_v56, %v642_v59  ;;  %v1883_v54 = vrot.slane %v1881_v42, 5 }
  0x61   : > { %2807 = vmatprep.subr.bf16.mxu0 %v3013_v6  ;;  %v1828_v40 = vor.u32 %v1827_v32, %v1824_v31  ;;  %v1875_v56 = vrot.slane %v1873_v38, 5  ;;  %v1889_v59 = vrot.slane %v1887_v43, 5  ;;  %v2499_v31 = vld [vmem:[%s3127_s14 + $0x1c] sm:$0x1]  ;;  %v2501_v32 = vld [vmem:[%s3127_s14 + $0x24] sm:$0x1] }
  0x62   : > { %v651_v63 = vrot.slane %v650_v57, 4  ;;  %v665_v0 = vrot.slane %v664_v60, 4  ;;  %v3044_v57 = vld [vmem:[%s3457_s1 + $0x210] sm:$0xff]  }
  0x63   : > { %2712 = vmatpush3.bf16.msra.mxu1 %v3012_v4  ;;  %v3035_v4 = vld [vmem:[%s3127_s14 + $0x50] ss:$8 sps:$4 sm:$0xff]   ;;  %v1829_v51 = vrot.slane %v1828_v40, 4 }
  0x64   : > { %2808 = vmatpush3.bf16.msra.mxu0 %v3013_v6  ;;  %2721 = vmatprep.subr.bf16.mxu1 %v3014_v7  ;;  %v656_v2 = vsel %vm3198_vm2, %v651_v63, %v655_v49  ;;  %v670_v3 = vsel %vm3198_vm2, %v665_v0, %v669_v55  ;;  %v3041_v49 = vld [vmem:[%s3127_s14 + $0x70] ss:$8 sps:$4 sm:$0xff]  }
  0x65   : > { %2817 = vmatprep.subr.bf16.mxu0 %v3016_v10  ;;  %v2297_v6 = vcombine.low %v656_v2, %v670_v3  ;;  %v3045_v3 = vld [vmem:[%s3457_s1 + $0x218] sm:$0xff]  }
  0x66   : > { %2714 = vmatmul.mubr.bf16.vlgmr.msra.gmra.mrb[0].mxu1 %v2295_v13  ;;  %v3033_v13 = vld [vmem:[%s3457_s1 + $0x1f8] sm:$0xff]  }
  0x67   : > { %2722 = vmatpush3.bf16.msra.mxu1 %v3014_v7  ;;  %2810 = vmatmul.mubr.bf16.vlgmr.msra.gmra.mrb[0].mxu0 %v3017_v11  ;;  %v3034_v7 = vld [vmem:[%s3127_s14 + $0x90] ss:$8 sps:$4 sm:$0xff]  }
  0x68   : > { %2818 = vmatpush3.bf16.msra.mxu0 %v3016_v10  ;;  %2723 = vmatprep.subr.bf16.mxu1 %v3018_v14  ;;  %v3029_v10 = vld [vmem:[%s3457_s1 + $0xf0] sm:$0xff]  }
  0x69   : > { %2819 = vmatprep.subr.bf16.mxu0 %v3019_v18  ;;  %2813 = vmatprep.mubr.bf16.mxu0 %v3028_v25  ;;  %v3031_v11 = vld [vmem:[%s3457_s1 + $0x1f0] sm:$0xff]   ;;  %v2502_v25 = vld [vmem:[%s3127_s14 + $0x28] sm:$0xf] }
  0x6a   : > { %2717 = vmatprep.mubr.bf16.mxu1 %v2296_v62  ;;  %v1864_v36 = vshrl.u32 %v2502_v25, 16  ;;  %v1867_v37 = vshll.u32 %v2502_v25, 16 }
  0x6b   : > { %2724 = vmatpush3.bf16.msra.mxu1 %v3018_v14  ;;  %v3038_v14 = vld [vmem:[%s3457_s1 + $0x200] sm:$0xff]  }
  0x6c   : > { %2820 = vmatpush3.bf16.msra.mxu0 %v3019_v18  ;;  %2725 = vmatprep.subr.bf16.mxu1 %v3020_v35  ;;  %v2497_v18 = vld [vmem:[%s3127_s14 + $0x14] sm:$0x1]  ;;  %v1866_v47 = vrot.slane %v1864_v36, 4  ;;  %v1869_v48 = vrot.slane %v1867_v37, 5 }
  0x6d   : > { %2821 = vmatprep.subr.bf16.mxu0 %v3021_v41  ;;  %v1831_v24 = vshll.u32 %v2497_v18, 16  ;;  %v3048_v37 = vld [vmem:[%s3457_s1 + $0x230] sm:$0xff]  }
  0x6e   : > { %2718 = vmatmul.mubr.bf16.gmra.mrb[4].mxu1 %v2297_v6  ;;  %v1870_v55 = vor.u32 %v1869_v48, %v1866_v47  ;;  %v2508_v6 = vld [vmem:[%s3127_s14 + $0x40] sm:$0xf] }
  0x6f   : > { %2726 = vmatpush3.bf16.msra.mxu1 %v3020_v35  ;;  %2814 = vmatmul.mubr.bf16.gmra.mrb[4].mxu0 %v3030_v58  ;;  %v1814_v35 = vor.u32 %v1813_v27, %v1810_v26  ;;  %v1833_v46 = vrot.slane %v1831_v24, 5 }
  0x70   : > { %2822 = vmatpush3.bf16.msra.mxu0 %v3021_v41  ;;  %2727 = vmatprep.subr.bf16.mxu1 %v3022_v50  ;;  %v1878_v41 = vshrl.u32 %v2504_v29, 16  ;;  %v1871_v60 = vrot.slane %v1870_v55, 4 }
  0x71   : > { %2823 = vmatprep.subr.bf16.mxu0 %v3023_v61  ;;  %2833 = vmatprep.mubr.bf16.mxu0 %v3035_v4  ;;  %v1834_v63 = vsel %vm3198_vm2, %v1829_v51, %v1833_v46  ;;  %v3049_v46 = vld [vmem:[%s3457_s1 + $0x238] sm:$0xff]  }
  0x72   : > { %2737 = vmatprep.mubr.bf16.mxu1 %v3034_v7  ;;  %v1880_v52 = vrot.slane %v1878_v41, 4  ;;  %v1876_v2 = vsel %vm3198_vm2, %v1871_v60, %v1875_v56  ;;  %v1859_v41 = vshll.u32 %v2501_v32, 16 }
  0x73   : > { %2728 = vmatpush3.bf16.msra.mxu1 %v3022_v50  ;;  %v1815_v50 = vrot.slane %v1814_v35, 4 }
  0x74   : > { %2824 = vmatpush3.bf16.msra.mxu0 %v3023_v61  ;;  %2729 = vmatprep.subr.bf16.mxu1 %v3024_v1  ;;  %v1884_v58 = vor.u32 %v1883_v54, %v1880_v52  ;;  %v3042_v61 = vld [vmem:[%s3127_s14 + $0xc0] ss:$8 sps:$4 sm:$0xff]  }
  0x75   : > { %2825 = vmatprep.subr.bf16.mxu0 %v3025_v5  ;;  %v1820_v62 = vsel %vm3198_vm2, %v1815_v50, %v1819_v45  ;;  %v1861_v50 = vrot.slane %v1859_v41, 5 }
  0x76   : > { %v1885_v0 = vrot.slane %v1884_v58, 4  ;;  %v2526_v7 = vcombine.low %v1820_v62, %v1834_v63 }
  0x77   : > { %2730 = vmatpush3.bf16.msra.mxu1 %v3024_v1  ;;  %v3043_v1 = vld [vmem:[%s3127_s14 + $0x80] ss:$8 sps:$4 sm:$0xff]  }
  0x78   : > { %2826 = vmatpush3.bf16.msra.mxu0 %v3025_v5  ;;  %2731 = vmatprep.subr.bf16.mxu1 %v3026_v8  ;;  %v1890_v4 = vsel %vm3198_vm2, %v1885_v0, %v1889_v59  ;;  %v2506_v5 = vld [vmem:[%s3127_s14 + $0x38] sm:$0xf] }
  0x79   : > { %2827 = vmatprep.subr.bf16.mxu0 %v3027_v9 }
  0x7b   : > { %2732 = vmatpush3.bf16.msra.mxu1 %v3026_v8  ;;  %v2498_v8 = vld [vmem:[%s3127_s14 + $0x18] sm:$0xf] }
  0x7c   : > { %2828 = vmatpush3.bf16.msra.mxu0 %v3027_v9  ;;  %2733 = vmatprep.subr.bf16.mxu1 %v3029_v10  ;;  %v2500_v9 = vld [vmem:[%s3127_s14 + $0x20] sm:$0xf]  ;;  %v1836_v16 = vshrl.u32 %v2498_v8, 16  ;;  %v1839_v17 = vshll.u32 %v2498_v8, 16 }
  0x7d   : > { %2829 = vmatprep.subr.bf16.mxu0 %v3031_v11  ;;  %v1850_v18 = vshrl.u32 %v2500_v9, 16  ;;  %v1853_v19 = vshll.u32 %v2500_v9, 16 }
  0x7e   : > { %v1838_v26 = vrot.slane %v1836_v16, 4  ;;  %v1841_v27 = vrot.slane %v1839_v17, 5 }
  0x7f   : > { %2734 = vmatpush3.bf16.msra.mxu1 %v3029_v10  ;;  %v2528_v10 = vcombine.low %v1876_v2, %v1890_v4  ;;  %v1852_v28 = vrot.slane %v1850_v18, 4  ;;  %v1855_v29 = vrot.slane %v1853_v19, 5 }
  0x80   : > { %2830 = vmatpush3.bf16.msra.mxu0 %v3031_v11  ;;  %2735 = vmatprep.subr.bf16.mxu1 %v3032_v12  ;;  %v1892_v11 = vshrl.u32 %v2506_v5, 16  ;;  %v1842_v38 = vor.u32 %v1841_v27, %v1838_v26 }
  0x81   : > { %2831 = vmatprep.subr.bf16.mxu0 %v3033_v13  ;;  %v1856_v40 = vor.u32 %v1855_v29, %v1852_v28 }
  0x82   : > { %v1894_v22 = vrot.slane %v1892_v11, 4  ;;  %v1843_v47 = vrot.slane %v1842_v38, 4 }
  0x83   : > { %2736 = vmatpush3.bf16.msra.mxu1 %v3032_v12  ;;  %v1895_v12 = vshll.u32 %v2506_v5, 16 }
  0x84   : > { %2832 = vmatpush3.bf16.msra.mxu0 %v3033_v13  ;;  %2865 = vmatprep.subr.bf16.mxu1 %v3038_v14  ;;  %v1906_v13 = vshrl.u32 %v2508_v6, 16 }
  0x85   : > { %2841 = vmatprep.subr.bf16.mxu0 %v3038_v14  ;;  %v1897_v23 = vrot.slane %v1895_v12, 5 }
  0x86   : > { %2738 = vmatmul.mubr.bf16.vlgmr.msra.gmra.mrb[0].mxu1 %v3036_v30  ;;  %v1908_v24 = vrot.slane %v1906_v13, 4  ;;  %v2509_v30 = vld [vmem:[%s3127_s14 + $0x44] sm:$0x1] }
  0x87   : > { %2834 = vmatmul.mubr.bf16.vlgmr.msra.gmra.mrb[0].mxu0 %v3037_v34  ;;  %2873 = vmatpush3.bf16.msra.mxu1 %v3038_v14  ;;  %v1898_v33 = vor.u32 %v1897_v23, %v1894_v22  ;;  %v1901_v34 = vshll.u32 %v2507_v21, 16  ;;  %v1915_v36 = vshll.u32 %v2509_v30, 16 }
  0x88   : > { %2842 = vmatpush3.bf16.msra.mxu0 %v3038_v14  ;;  %2866 = vmatprep.subr.bf16.mxu1 %v3039_v39  ;;  %v1909_v14 = vshll.u32 %v2508_v6, 16 }
  0x89   : > { %2843 = vmatprep.subr.bf16.mxu0 %v3039_v39  ;;  %2741 = vmatprep.mubr.bf16.mxu1 %v3040_v44  ;;  %v1899_v42 = vrot.slane %v1898_v33, 4  ;;  %v1903_v43 = vrot.slane %v1901_v34, 5  ;;  %v1917_v45 = vrot.slane %v1915_v36, 5 }
  0x8a   : > { %2837 = vmatprep.mubr.bf16.mxu0 %v3041_v49  ;;  %v1911_v25 = vrot.slane %v1909_v14, 5  ;;  %v1857_v49 = vrot.slane %v1856_v40, 4 }
  0x8b   : > { %2874 = vmatpush3.bf16.msra.mxu1 %v3039_v39  ;;  %v1904_v51 = vsel %vm3198_vm2, %v1899_v42, %v1903_v43 }
  0x8c   : > { %2844 = vmatpush3.bf16.msra.mxu0 %v3039_v39  ;;  %2867 = vmatprep.subr.bf16.mxu1 %v3044_v57  ;;  %v1912_v35 = vor.u32 %v1911_v25, %v1908_v24  ;;  %v1845_v39 = vshll.u32 %v2499_v31, 16  ;;  %v1862_v55 = vsel %vm3198_vm2, %v1857_v49, %v1861_v50 }
  0x8d   : > { %2845 = vmatprep.subr.bf16.mxu0 %v3044_v57 }
  0x8e   : > { %2742 = vmatmul.mubr.bf16.gmra.mrb[4].mxu1 %v3042_v61  ;;  %v1913_v44 = vrot.slane %v1912_v35, 4  ;;  %v1847_v48 = vrot.slane %v1845_v39, 5 }
  0x8f   : > { %2838 = vmatmul.mubr.bf16.gmra.mrb[4].mxu0 %v3043_v1  ;;  %2875 = vmatpush3.bf16.msra.mxu1 %v3044_v57 }
  0x90   : > { %2846 = vmatpush3.bf16.msra.mxu0 %v3044_v57  ;;  %2868 = vmatprep.subr.bf16.mxu1 %v3045_v3  ;;  %v1918_v52 = vsel %vm3198_vm2, %v1913_v44, %v1917_v45  ;;  %v1848_v54 = vsel %vm3198_vm2, %v1843_v47, %v1847_v48 }
  0x91   : > { %2847 = vmatprep.subr.bf16.mxu0 %v3045_v3  ;;  %2857 = vmatprep.mubr.bf16.mxu0 %v2526_v7  ;;  %v2529_v56 = vcombine.low %v1904_v51, %v1918_v52  ;;  %v2527_v57 = vcombine.low %v1848_v54, %v1862_v55 }
  0x92   : > { %2861 = vmatprep.mubr.bf16.mxu1 %v2528_v10 }
  0x93   : > { %2876 = vmatpush3.bf16.msra.mxu1 %v3045_v3 }
  0x94   : > { %2848 = vmatpush3.bf16.msra.mxu0 %v3045_v3  ;;  %2869 = vmatprep.subr.bf16.mxu1 %v3046_v15 }
  0x95   : > { %2849 = vmatprep.subr.bf16.mxu0 %v3046_v15 }
  0x97   : > { %2877 = vmatpush3.bf16.msra.mxu1 %v3046_v15 }
  0x98   : > { %2850 = vmatpush3.bf16.msra.mxu0 %v3046_v15  ;;  %2870 = vmatprep.subr.bf16.mxu1 %v3047_v20 }
  0x99   : > { %2851 = vmatprep.subr.bf16.mxu0 %v3047_v20 }
  0x9b   : > { %2878 = vmatpush3.bf16.msra.mxu1 %v3047_v20 }
  0x9c   : > { %2852 = vmatpush3.bf16.msra.mxu0 %v3047_v20  ;;  %2871 = vmatprep.subr.bf16.mxu1 %v3048_v37 }
  0x9d   : > { %2853 = vmatprep.subr.bf16.mxu0 %v3048_v37 }
  0x9f   : > { %2879 = vmatpush3.bf16.msra.mxu1 %v3048_v37 }
  0xa0   : > { %2854 = vmatpush3.bf16.msra.mxu0 %v3048_v37  ;;  %2872 = vmatprep.subr.bf16.mxu1 %v3049_v46 }
  0xa1   : > { %2855 = vmatprep.subr.bf16.mxu0 %v3049_v46 }
  0xa3   : > { %2880 = vmatpush3.bf16.msra.mxu1 %v3049_v46 }
  0xa4   : > { %2856 = vmatpush3.bf16.msra.mxu0 %v3049_v46 }
  0xa6   : > { %2862 = vmatmul.mubr.bf16.vlgmr.msra.gmra.mrb[8].mxu1 %v2529_v56 }
  0xa7   : > { %2858 = vmatmul.mubr.bf16.vlgmr.msra.gmra.mrb[0].mxu0 %v2527_v57 }
 0x159   : > { %v2739_v58 = vpop.f32.mrb[0].mxu1 }
 0x15a   : > { %v957_v59 = vpop.f32.mrb[1].mxu1 }
 0x15b   : > { %v2740_v60 = vpop.f32.mrb[2].mxu1 }
 0x15c   : > { %v960_v61 = vpop.f32.mrb[3].mxu1 }
 0x161   : > { %v2743_v62 = vpop.f32.mrb[4].mxu1 }
 0x162   : > { %v2839_v63 = vpop.f32.mrb[4].mxu0  ;;  %v973_v0 = vpop.f32.mrb[5].mxu1 }
 0x163   : > { %v2885_v1 = vadd.f32 %v2839_v63, %v2743_v62  ;;  %v1768_v2 = vpop.f32.mrb[5].mxu0  ;;  %v2744_v3 = vpop.f32.mrb[6].mxu1 }
 0x164   : > { %v2887_v53 = vadd.f32 %v1768_v2, %v973_v0  ;;  %v2840_v4 = vpop.f32.mrb[6].mxu0  ;;  %v976_v5 = vpop.f32.mrb[7].mxu1 }
 0x165   : > { %v2889_v6 = vadd.f32 %v2840_v4, %v2744_v3  ;;  %v1771_v7 = vpop.f32.mrb[7].mxu0 }
 0x166   : > { %v2891_v8 = vadd.f32 %v1771_v7, %v976_v5 }
 0x179   : > { %v2863_v9 = vpop.f32.mrb[8].mxu1 }
 0x17a   : > { %v2859_v10 = vpop.f32.mrb[0].mxu0  ;;  %v2886_v11 = vadd.f32 %v2885_v1, %v2863_v9  ;;  %v2050_v12 = vpop.f32.mrb[9].mxu1 }
 0x17b   : > { %v2881_v13 = vadd.f32 %v2859_v10, %v2739_v58  ;;  %v2034_v14 = vpop.f32.mrb[1].mxu0  ;;  %v2888_v15 = vadd.f32 %v2887_v53, %v2050_v12  ;;  %v2864_v16 = vpop.f32.mrb[10].mxu1 }
 0x17c   : > { %2079 = vst [vmem:[%s208_s28 + $0x30] sm:$0xff] %v2886_v11  ;;  %v2882_v17 = vadd.f32 %v2034_v14, %v957_v59  ;;  %v2860_v18 = vpop.f32.mrb[2].mxu0  ;;  %v2890_v19 = vadd.f32 %v2889_v6, %v2864_v16  ;;  %v2053_v20 = vpop.f32.mrb[11].mxu1  ;;  %v2101_v40 = vmul.f32 %v2886_v11, %v2886_v11 }
 0x17d   : > { %2075 = vst [vmem:[%s208_s28 + $0x10] sm:$0xff] %v2881_v13  ;;  %2077 = vst [vmem:[%s208_s28 + $0x20] sm:$0xff] %v2888_v15  ;;  %v2883_v21 = vadd.f32 %v2860_v18, %v2740_v60  ;;  %v2037_v22 = vpop.f32.mrb[3].mxu0  ;;  %v2892_v23 = vadd.f32 %v2891_v8, %v2053_v20  ;;  %v2097_v28 = vmul.f32 %v2881_v13, %v2881_v13 }
 0x17e   : > { %2073 = vst [vmem:[%s208_s28] sm:$0xff] %v2882_v17  ;;  %2080 = vst [vmem:[%s208_s28 + $0x38] sm:$0xff] %v2890_v19  ;;  %v2884_v24 = vadd.f32 %v2037_v22, %v960_v61  ;;  %v2095_v25 = vmul.f32 %v2882_v17, %v2882_v17  ;;  %v2099_v34 = vmul.f32 %v2888_v15, %v2888_v15 }
 0x17f   : > { %2076 = vst [vmem:[%s208_s28 + $0x18] sm:$0xff] %v2883_v21  ;;  %2078 = vst [vmem:[%s208_s28 + $0x28] sm:$0xff] %v2892_v23  ;;  %v2098_v31 = vmul.f32 %v2883_v21, %v2883_v21  ;;  %v2100_v38 = vmul.f32 %v2892_v23, %v2892_v23  ;;  %v2102_v43 = vmul.f32 %v2890_v19, %v2890_v19 }
 0x180   : > { %2074 = vst [vmem:[%s208_s28 + $0x8] sm:$0xff] %v2884_v24  ;;  %v2081_v26 = vadd.f32 %v2884_v24, %v2882_v17  ;;  %v2096_v27 = vmul.f32 %v2884_v24, %v2884_v24 }
 0x182   : > { %v2082_v29 = vadd.f32 %v2881_v13, %v2081_v26  ;;  %v2103_v30 = vadd.f32 %v2096_v27, %v2095_v25 }
 0x184   : > { %v2104_v32 = vadd.f32 %v2103_v30, %v2097_v28  ;;  %v2083_v33 = vadd.f32 %v2883_v21, %v2082_v29 }
 0x186   : > { %v2084_v35 = vadd.f32 %v2888_v15, %v2083_v33  ;;  %v2105_v36 = vadd.f32 %v2104_v32, %v2098_v31 }
 0x188   : > { %v2085_v37 = vadd.f32 %v2892_v23, %v2084_v35  ;;  %v2106_v39 = vadd.f32 %v2105_v36, %v2099_v34 }
 0x18a   : > { %v2086_v41 = vadd.f32 %v2886_v11, %v2085_v37  ;;  %v2107_v42 = vadd.f32 %v2106_v39, %v2100_v38 }
 0x18c   : > { %v2087_v44 = vadd.f32 %v2890_v19, %v2086_v41  ;;  %v2108_v45 = vadd.f32 %v2107_v42, %v2101_v40 }
 0x18e   : > { %v2088_v46 = vrot.slane %v2087_v44, 4  ;;  %v2109_v47 = vadd.f32 %v2108_v45, %v2102_v43 }
 0x190   : > { %v2089_v48 = vadd.f32 %v2088_v46, %v2087_v44  ;;  %v2110_v49 = vrot.slane %v2109_v47, 4 }
 0x192   : > { %v2090_v50 = vrot.slane %v2089_v48, 2  ;;  %v2111_v51 = vadd.f32 %v2110_v49, %v2109_v47 }
 0x194   : > { %v2091_v52 = vadd.f32 %v2090_v50, %v2089_v48  ;;  %v2112_v54 = vrot.slane %v2111_v51, 2 }
 0x196   : > { %v2092_v55 = vrot.slane %v2091_v52, 1  ;;  %v2113_v56 = vadd.f32 %v2112_v54, %v2111_v51 }
 0x198   : > { %v2093_v57 = vadd.f32 %v2092_v55, %v2091_v52  ;;  %v2114_v58 = vrot.slane %v2113_v56, 1 }
 0x19a   : > { %2094 = vst [vmem:[%s211_s5] sm:$0x1] %v2093_v57  ;;  %v2115_v59 = vadd.f32 %v2114_v58, %v2113_v56 }
 0x19c   : > { %2116 = vst [vmem:[%s214_s8] sm:$0x1] %v2115_v59 }
 0x19d PF: > { %s15_s15 = sadd.s32 1, %s3056_s15  }
 0x19e   : > { %p12_p4 = scmp.ge.s32.totalorder %s15_s15, 4  }
 0x1a0   :  { %14 = sbr.rel (!%p12_p4) target bundleno = 1 (0x1), region = 95 }

// kernel: basic_block_forward.6
= control target key start
LH: loop header
LB: loop body
LE: loop exit
PB: predicated region body
PF: predicated region fallthrough
CT: control target
= control target key end

     0   :  { %s3452_s21 = smov 0   ;;  %s4112_s0 = inlined_call_operand.vmem [shape: f32[2,8,8,128], index: 0, kind: input, shape index: {}]   ;;  %s4113_s1 = inlined_call_operand.vmem [shape: f32[1,128], index: 1, kind: input, shape index: {}]   ;;  %s4114_s2 = inlined_call_operand.vmem [shape: f32[1,128], index: 2, kind: input, shape index: {}]   ;;  %s4115_s3 = inlined_call_operand.vmem [shape: bf16[9,128,128], index: 3, kind: input, shape index: {}]   ;;  %s4116_s4 = inlined_call_operand.vmem [shape: f32[2,8,8,128], index: 4, kind: output, shape index: {0}]   ;;  %s4117_s5 = inlined_call_operand.vmem [shape: f32[2,1,128], index: 5, kind: output, shape index: {1}]   ;;  %s4118_s6 = inlined_call_operand.vmem [shape: f32[2,1,128], index: 6, kind: output, shape index: {2}]  }
   0x1 LB: > { %s2620_s22 = sadd.s32 4294967295, %s3414_s21   ;;  %p2624_p0 = scmp.ge.s32.totalorder %s3414_s21, 1  ;;  %s3414_s21 = sphi %s3452_s21, %s17_s21  }
   0x2   : > { %p217_p1 = scmp.lt.s32.totalorder %s3414_s21, 3 }
   0x4   : > { %p218_p2 = pnand %p2624_p0, %p217_p1 }
   0x5   : > { %v3324_v0 = vld [vmem:[%s4115_s3 + $0x40] sm:$0xff] (!%p218_p2)   ;;  %v3326_v2 = vld [vmem:[%s4115_s3 + $0x48] sm:$0xff] (!%p218_p2)   ;;  %p3471_p3 = scmp.lt.s32.totalorder (!%p218_p2), %s2620_s22, 1  ;;  %v3416_v3 = vmov (!%p218_p2), 0   ;;  %v3328_v5 = vld [vmem:[%s4115_s3 + $0x50] sm:$0xff] (!%p218_p2)   ;;  %vm449_vm0 = vcmask (!%p218_p2), 1043456  }
   0x6   : > { %221 = sbr.rel (%p218_p2) target bundleno = 450 (0x1c2), region = 36  ;;  %v3325_v1 = vld [vmem:[%s4115_s3 + $0x100] sm:$0xff] (!%p218_p2)   ;;  %3019 = vmatprep.subr.bf16.mxu1 (!%p218_p2), %v3324_v0  ;;  %316 = vst [vmem:[#allocation2] sm:$0xf] (!%p218_p2), %v3416_v3  ;;  %317 = vst [vmem:[#allocation2 + $0x4] sm:$0x1] (!%p218_p2), %v3416_v3 }
   0x7   : > { %318 = vst [vmem:[#allocation2 + $0x8] sm:$0xf] (!%p218_p2), %v3416_v3  ;;  %319 = vst [vmem:[#allocation2 + $0xc] sm:$0x1] (!%p218_p2), %v3416_v3  ;;  %3115 = vmatprep.subr.bf16.mxu0 (!%p218_p2), %v3325_v1  ;;  %3020 = vmatpush3.bf16.msra.mxu1 (!%p218_p2), %v3324_v0  ;;  %v3327_v4 = vld [vmem:[%s4115_s3 + $0x108] sm:$0xff] (!%p218_p2)   ;;  %v3329_v6 = vld [vmem:[%s4115_s3 + $0x110] sm:$0xff] (!%p218_p2)  }
   0x8   : > { %320 = vst [vmem:[#allocation2 + $0x10] sm:$0xf] (!%p218_p2), %v3416_v3  ;;  %321 = vst [vmem:[#allocation2 + $0x14] sm:$0x1] (!%p218_p2), %v3416_v3  ;;  %3116 = vmatpush3.bf16.msra.mxu0 (!%p218_p2), %v3325_v1  ;;  %3021 = vmatprep.subr.bf16.mxu1 (!%p218_p2), %v3326_v2  ;;  %v3330_v7 = vld [vmem:[%s4115_s3 + $0x58] sm:$0xff] (!%p218_p2)   ;;  %v3332_v9 = vld [vmem:[%s4115_s3 + $0x60] sm:$0xff] (!%p218_p2)  }
   0x9   : > { %322 = vst [vmem:[#allocation2 + $0x18] sm:$0xf] (!%p218_p2), %v3416_v3  ;;  %323 = vst [vmem:[#allocation2 + $0x1c] sm:$0x1] (!%p218_p2), %v3416_v3  ;;  %3117 = vmatprep.subr.bf16.mxu0 (!%p218_p2), %v3327_v4  ;;  %v3331_v8 = vld [vmem:[%s4115_s3 + $0x118] sm:$0xff] (!%p218_p2)   ;;  %v3333_v10 = vld [vmem:[%s4115_s3 + $0x120] sm:$0xff] (!%p218_p2)  }
   0xa   : > { %324 = vst [vmem:[#allocation2 + $0x20] sm:$0xf] (!%p218_p2), %v3416_v3  ;;  %325 = vst [vmem:[#allocation2 + $0x24] sm:$0x1] (!%p218_p2), %v3416_v3  ;;  %v3334_v11 = vld [vmem:[%s4115_s3 + $0x68] sm:$0xff] (!%p218_p2)   ;;  %v3336_v18 = vld [vmem:[%s4115_s3 + $0x70] sm:$0xff] (!%p218_p2)  }
   0xb   : > { %326 = vst [vmem:[#allocation2 + $0x28] sm:$0xf] (!%p218_p2), %v3416_v3  ;;  %327 = vst [vmem:[#allocation2 + $0x2c] sm:$0x1] (!%p218_p2), %v3416_v3  ;;  %3022 = vmatpush3.bf16.msra.mxu1 (!%p218_p2), %v3326_v2  ;;  %v3516_v12 = vld [vmem:[%s4113_s1] ss:$0 sm:$0xff] (!%p218_p2) }
   0xc   : > { %328 = vst [vmem:[#allocation2 + $0x30] sm:$0xf] (!%p218_p2), %v3416_v3  ;;  %329 = vst [vmem:[#allocation2 + $0x34] sm:$0x1] (!%p218_p2), %v3416_v3  ;;  %3118 = vmatpush3.bf16.msra.mxu0 (!%p218_p2), %v3327_v4  ;;  %3023 = vmatprep.subr.bf16.mxu1 (!%p218_p2), %v3328_v5  ;;  %v3521_v13 = vld [vmem:[%s4114_s2] ss:$0 sm:$0xff] (!%p218_p2) }
   0xd   : > { %330 = vst [vmem:[#allocation2 + $0x38] sm:$0xf] %v3416_v3  ;;  %331 = vst [vmem:[#allocation2 + $0x3c] sm:$0x1] %v3416_v3  ;;  %s4129_s22 = smov (!%p3471_p3, %s2620_s22), 1  ;;  %3119 = vmatprep.subr.bf16.mxu0 %v3329_v6  ;;  %v3335_v15 = vld [vmem:[%s4115_s3 + $0x128] sm:$0xff]  }
   0xe   : > { %332 = vst [vmem:[#allocation2 + $0x40] sm:$0xf] %v3416_v3  ;;  %333 = vst [vmem:[#allocation2 + $0x44] sm:$0x1] %v3416_v3  ;;  %s2901_s16 = sshll.u32 %s4129_s22, 6  ;;  %v3337_v19 = vld [vmem:[%s4115_s3 + $0x130] sm:$0xff]   ;;  %s265_s8 = scalar_lea.vmem %s4117_s5, %s4129_s22 }
   0xf   : > { %334 = vst [vmem:[#allocation2 + $0x48] sm:$0xf] %v3416_v3  ;;  %335 = vst [vmem:[#allocation2 + $0x4c] sm:$0x1] %v3416_v3  ;;  %3024 = vmatpush3.bf16.msra.mxu1 %v3328_v5  ;;  %s3508_s25 = scalar_lea.vmem %s4112_s0, %s2901_s16  ;;  %vm450_vm1 = vsmask.f32 7938  ;;  %s262_s30 = scalar_lea.vmem %s4116_s4, %s2901_s16 }
  0x10   : > { %3120 = vmatpush3.bf16.msra.mxu0 %v3329_v6  ;;  %3025 = vmatprep.subr.bf16.mxu1 %v3330_v7  ;;  %v272_v14 = vld [vmem:[%s3508_s25] sm:$0xff]  ;;  %v273_v21 = vld [vmem:[%s3508_s25 + $0x8] sm:$0xff]  ;;  %v274_v23 = vld [vmem:[%s3508_s25 + $0x10] sm:$0xff]  ;;  %vm455_vm2 = vcmask 1040384   ;;  %vm456_vm3 = vsmask.f32 256  ;;  %s268_s11 = scalar_lea.vmem %s4118_s6, %s4129_s22 }
  0x11   : > { %3121 = vmatprep.subr.bf16.mxu0 %v3331_v8  ;;  %v286_v16 = vmul.f32 %v3516_v12, %v272_v14  ;;  %v287_v22 = vmul.f32 %v3516_v12, %v273_v21  ;;  %v3538_v25 = vld [vmem:[#allocation2] sm:$0xf]  ;;  %v288_v26 = vmul.f32 %v3516_v12, %v274_v23  ;;  %v3338_v27 = vld [vmem:[%s4115_s3 + $0x78] sm:$0xff]   ;;  %vm3552_vm4 = vmand %vm449_vm0, %vm450_vm1  ;;  %vm535_vm6 = vsmask.f32 3328 }
  0x12   : > { %v275_v29 = vld [vmem:[%s3508_s25 + $0x18] sm:$0xff]  ;;  %v452_v35 = vld [vmem:[#allocation2 + $0x8] sm:$0xf]  ;;  %v458_v36 = vld [vmem:[#allocation2 + $0xc] sm:$0x1]  ;;  %v539_v37 = vshrl.u32 %v3538_v25, 16 }
  0x13   : > { %3026 = vmatpush3.bf16.msra.mxu1 %v3330_v7  ;;  %v300_v17 = vadd.f32 %v3521_v13, %v286_v16  ;;  %v301_v28 = vadd.f32 %v3521_v13, %v287_v22  ;;  %v3339_v30 = vld [vmem:[%s4115_s3 + $0x138] sm:$0xff]   ;;  %v302_v33 = vadd.f32 %v3521_v13, %v288_v26  ;;  %v289_v39 = vmul.f32 %v3516_v12, %v275_v29  ;;  %vm3560_vm5 = vmand %vm455_vm2, %vm456_vm3  ;;  %v3564_v43 = vld [vmem:[#allocation2 + $0x4] sm:$0x1] }
  0x14   : > { %3122 = vmatpush3.bf16.msra.mxu0 %v3331_v8  ;;  %3027 = vmatprep.subr.bf16.mxu1 %v3332_v9  ;;  %v542_v44 = vshll.u32 %v3538_v25, 16  ;;  %v3570_v45 = vld [vmem:[%s4115_s3] sm:$0xff]   ;;  %v541_v52 = vrot.slane %v539_v37, 4  ;;  %v461_v58 = vld [vmem:[#allocation2 + $0x10] sm:$0xf]  ;;  %v548_v3 = vshll.u32 %v3564_v43, 16 }
  0x15   : > { %3123 = vmatprep.subr.bf16.mxu0 %v3333_v10  ;;  %v308_v20 = vmax.f32 %v300_v17, 0.0  ;;  %v309_v38 = vmax.f32 %v301_v28, 0.0  ;;  %v310_v42 = vmax.f32 %v302_v33, 0.0  ;;  %v303_v47 = vadd.f32 %v3521_v13, %v289_v39  ;;  %v3576_v50 = vld [vmem:[%s4115_s3 + $0x140] sm:$0xff]   ;;  %v464_v59 = vld [vmem:[#allocation2 + $0x14] sm:$0x1] }
  0x16   : > { %vm536_vm7 = vsmask.f32 7440  ;;  %v544_v62 = vrot.slane %v542_v44, 5  ;;  %v467_v0 = vld [vmem:[#allocation2 + $0x18] sm:$0xf]  ;;  %v3589_v17 = vrot.slane %v548_v3, 5 }
  0x17   : > { %3028 = vmatpush3.bf16.msra.mxu1 %v3332_v9  ;;  %v2903_v24 = vpack.c.bf16 %v308_v20, %v308_v20  ;;  %v2904_v46 = vpack.c.bf16 %v309_v38, %v309_v38  ;;  %v2905_v51 = vpack.c.bf16 %v310_v42, %v310_v42  ;;  %v311_v55 = vmax.f32 %v303_v47, 0.0  ;;  %v470_v1 = vld [vmem:[#allocation2 + $0x1c] sm:$0x1]  ;;  %v473_v21 = vld [vmem:[#allocation2 + $0x20] sm:$0xf]  ;;  %vm3613_vm8 = vmor %vm535_vm6, %vm536_vm7 }
  0x18   : > { %3124 = vmatpush3.bf16.msra.mxu0 %v3333_v10  ;;  %3029 = vmatprep.subr.bf16.mxu1 %v3334_v11  ;;  %v276_v26 = vld [vmem:[%s3508_s25 + $0x20] sm:$0xff]  ;;  %vm957_vm9 = vcmask 1042432   ;;  %vm958_vm10 = vcmask 1046532  }
  0x19   : > { %3125 = vmatprep.subr.bf16.mxu0 %v3335_v15  ;;  %v369_v31 = vshrl.u32 %v2903_v24, 16  ;;  %v372_v32 = vshll.u32 %v2903_v24, 16  ;;  %v377_v53 = vshrl.u32 %v2904_v46, 16  ;;  %v380_v54 = vshll.u32 %v2904_v46, 16  ;;  %v476_v24 = vld [vmem:[#allocation2 + $0x24] sm:$0x1]  ;;  %vm3811_vm11 = vmor %vm957_vm9, %vm958_vm10 }
  0x1a   : > { %v385_v60 = vshrl.u32 %v2905_v51, 16  ;;  %v388_v61 = vshll.u32 %v2905_v51, 16  ;;  %v2906_v2 = vpack.c.bf16 %v311_v55, %v311_v55  ;;  %v290_v39 = vmul.f32 %v3516_v12, %v276_v26  ;;  %v3404_v47 = vld [vmem:[%s4115_s3 + $0x220] sm:$0xff]  }
  0x1b   : > { %3030 = vmatpush3.bf16.msra.mxu1 %v3334_v11  ;;  %v371_v40 = vrot.slane %v369_v31, 7  ;;  %v379_v63 = vrot.slane %v377_v53, 7  ;;  %v545_v11 = vor.u32 %v544_v62, %v541_v52 }
  0x1c   : > { %3126 = vmatpush3.bf16.msra.mxu0 %v3335_v15  ;;  %3031 = vmatprep.subr.bf16.mxu1 %v3336_v18  ;;  %v387_v4 = vrot.slane %v385_v60, 7  ;;  %v393_v7 = vshrl.u32 %v2906_v2, 16  ;;  %v396_v8 = vshll.u32 %v2906_v2, 16 }
  0x1d   : > { %3127 = vmatprep.subr.bf16.mxu0 %v3337_v19  ;;  %v374_v48 = vor.u32 %v372_v32, %v371_v40  ;;  %v375_v49 = vrot.slane %v371_v40, 4  ;;  %v382_v5 = vor.u32 %v380_v54, %v379_v63  ;;  %v383_v6 = vrot.slane %v379_v63, 4 }
  0x1e   : > { %v390_v9 = vor.u32 %v388_v61, %v387_v4  ;;  %v391_v10 = vrot.slane %v387_v4, 4  ;;  %v395_v16 = vrot.slane %v393_v7, 7  ;;  %v3634_v4 = vadd.f32 %v3521_v13, %v290_v39 }
  0x1f   : > { %3032 = vmatpush3.bf16.msra.mxu1 %v3336_v18  ;;  %v453_v56 = vsel %vm3552_vm4, %v374_v48, %v452_v35  ;;  %v459_v57 = vsel %vm3560_vm5, %v375_v49, %v458_v36  ;;  %v462_v14 = vsel %vm3552_vm4, %v382_v5, %v461_v58  ;;  %v465_v15 = vsel %vm3560_vm5, %v383_v6, %v464_v59 }
  0x20   : > { %3128 = vmatpush3.bf16.msra.mxu0 %v3337_v19  ;;  %3033 = vmatprep.subr.bf16.mxu1 %v3338_v27  ;;  %454 = vst [vmem:[#allocation2 + $0x8] sm:$0xf] %v453_v56  ;;  %460 = vst [vmem:[#allocation2 + $0xc] sm:$0x1] %v459_v57  ;;  %v962_v18 = vrot.slane %v3564_v43, 5  ;;  %v468_v19 = vsel %vm3552_vm4, %v390_v9, %v467_v0  ;;  %v471_v20 = vsel %vm3560_vm5, %v391_v10, %v470_v1  ;;  %v277_v57 = vld [vmem:[%s3508_s25 + $0x28] sm:$0xff] }
  0x21   : > { %3129 = vmatprep.subr.bf16.mxu0 %v3339_v30  ;;  %463 = vst [vmem:[#allocation2 + $0x10] sm:$0xf] %v462_v14  ;;  %466 = vst [vmem:[#allocation2 + $0x14] sm:$0x1] %v465_v15  ;;  %v398_v22 = vor.u32 %v396_v8, %v395_v16  ;;  %v399_v23 = vrot.slane %v395_v16, 4  ;;  %v291_v9 = vmul.f32 %v3516_v12, %v277_v57  ;;  %v278_v10 = vld [vmem:[%s3508_s25 + $0x30] sm:$0xff] }
  0x22   : > { %469 = vst [vmem:[#allocation2 + $0x18] sm:$0xf] %v468_v19  ;;  %472 = vst [vmem:[#allocation2 + $0x1c] sm:$0x1] %v471_v20 }
  0x23   : > { %3034 = vmatpush3.bf16.msra.mxu1 %v3338_v27  ;;  %v474_v46 = vsel %vm3552_vm4, %v398_v22, %v473_v21  ;;  %v477_v52 = vsel %vm3560_vm5, %v399_v23, %v476_v24 }
  0x24   : > { %3130 = vmatpush3.bf16.msra.mxu0 %v3339_v30  ;;  %3043 = vmatprep.subr.bf16.mxu1 %v3570_v45  ;;  %v546_v30 = vrot.slane %v545_v11, 4  ;;  %475 = vst [vmem:[#allocation2 + $0x20] sm:$0xf] %v474_v46  ;;  %478 = vst [vmem:[#allocation2 + $0x24] sm:$0x1] %v477_v52 }
  0x25   : > { %3139 = vmatprep.subr.bf16.mxu0 %v3576_v50 }
  0x26   : > { %v551_v63 = vsel %vm3613_vm8, %v546_v30, %v3589_v17  ;;  %v292_v30 = vmul.f32 %v3516_v12, %v278_v10 }
  0x27   : > { %v3597_v27 = vld [vmem:[#allocation2 + $0x8] sm:$0xf]  ;;  %v3599_v28 = vld [vmem:[#allocation2 + $0xc] sm:$0x1] }
  0x28   : > { %v1316_v29 = vld [vmem:[#allocation2 + $0x8] sm:$0xf]  ;;  %v553_v31 = vshrl.u32 %v3597_v27, 16  ;;  %v556_v32 = vshll.u32 %v3597_v27, 16  ;;  %v562_v33 = vshll.u32 %v3599_v28, 16  ;;  %v966_v36 = vrot.slane %v3599_v28, 5 }
  0x29   : > { %v3604_v35 = vld [vmem:[#allocation2 + $0xc] sm:$0x1]  ;;  %v1333_v37 = vshrl.u32 %v1316_v29, 16  ;;  %v1336_v38 = vshll.u32 %v1316_v29, 16  ;;  %v1318_v55 = vld [vmem:[#allocation2 + $0x10] sm:$0xf] }
  0x2a   : > { %v555_v40 = vrot.slane %v553_v31, 4  ;;  %v558_v42 = vrot.slane %v556_v32, 5  ;;  %v1342_v44 = vshll.u32 %v3604_v35, 16  ;;  %v1624_v51 = vrot.slane %v3604_v35, 5  ;;  %v3620_v56 = vld [vmem:[#allocation2 + $0x14] sm:$0x1] }
  0x2b   : > { %v1335_v48 = vrot.slane %v1333_v37, 4  ;;  %v1338_v49 = vrot.slane %v1336_v38, 5  ;;  %v564_v54 = vrot.slane %v562_v33, 5  ;;  %v1347_v59 = vshrl.u32 %v1318_v55, 16  ;;  %v3624_v62 = vld [vmem:[#allocation2 + $0x10] sm:$0xf] }
  0x2c   : > { %v559_v53 = vor.u32 %v558_v42, %v555_v40  ;;  %v1350_v60 = vshll.u32 %v1318_v55, 16  ;;  %v1356_v61 = vshll.u32 %v3620_v56, 16  ;;  %v1344_v1 = vrot.slane %v1342_v44, 5  ;;  %v3629_v2 = vld [vmem:[#allocation2 + $0x18] sm:$0xf] }
  0x2d   : > { %v1339_v58 = vor.u32 %v1338_v49, %v1335_v48  ;;  %v3631_v3 = vld [vmem:[#allocation2 + $0x14] sm:$0x1]  ;;  %v1349_v6 = vrot.slane %v1347_v59, 4  ;;  %v3636_v8 = vld [vmem:[#allocation2 + $0x1c] sm:$0x1]  ;;  %v567_v14 = vshrl.u32 %v3624_v62, 16 }
  0x2e   : > { %v560_v0 = vrot.slane %v559_v53, 4  ;;  %v1352_v7 = vrot.slane %v1350_v60, 5  ;;  %v570_v15 = vshll.u32 %v3624_v62, 16  ;;  %v576_v16 = vshll.u32 %v3631_v3, 16  ;;  %v1320_v17 = vld [vmem:[#allocation2 + $0x18] sm:$0xf] }
  0x2f   : > { %v1340_v5 = vrot.slane %v1339_v58, 4  ;;  %v1358_v21 = vrot.slane %v1356_v61, 5  ;;  %v581_v22 = vshrl.u32 %v3629_v2, 16  ;;  %v569_v23 = vrot.slane %v567_v14, 4  ;;  %v3647_v29 = vld [vmem:[#allocation2 + $0x1c] sm:$0x1] }
  0x30   : > { %v565_v11 = vsel %vm3613_vm8, %v560_v0, %v564_v54  ;;  %v1353_v20 = vor.u32 %v1352_v7, %v1349_v6  ;;  %v572_v24 = vrot.slane %v570_v15, 5  ;;  %v584_v26 = vshll.u32 %v3629_v2, 16  ;;  %v1322_v42 = vld [vmem:[#allocation2 + $0x20] sm:$0xf]  ;;  %v3655_v49 = vld [vmem:[#allocation2 + $0x24] sm:$0x1] }
  0x31   : > { %v2655_v19 = vcombine.low %v551_v63, %v565_v11  ;;  %v1345_v31 = vsel %vm3613_vm8, %v1340_v5, %v1344_v1  ;;  %v583_v33 = vrot.slane %v581_v22, 4  ;;  %v590_v37 = vshll.u32 %v3636_v8, 16  ;;  %v3658_v63 = vld [vmem:[#allocation2 + $0x20] sm:$0xf] }
  0x32   : > { %v1354_v32 = vrot.slane %v1353_v20, 4  ;;  %v573_v38 = vor.u32 %v572_v24, %v569_v23  ;;  %v578_v39 = vrot.slane %v576_v16, 5  ;;  %v586_v40 = vrot.slane %v584_v26, 5 }
  0x33   : > { %3035 = vmatprep.mubr.bf16.mxu1 %v2655_v19  ;;  %v1361_v44 = vshrl.u32 %v1320_v17, 16  ;;  %v592_v48 = vrot.slane %v590_v37, 5  ;;  %v1364_v52 = vshll.u32 %v1320_v17, 16  ;;  %v1370_v53 = vshll.u32 %v3647_v29, 16 }
  0x34   : > { %v1359_v46 = vsel %vm3613_vm8, %v1354_v32, %v1358_v21  ;;  %v574_v55 = vrot.slane %v573_v38, 4  ;;  %v587_v57 = vor.u32 %v586_v40, %v583_v33  ;;  %v1375_v60 = vshrl.u32 %v1322_v42, 16  ;;  %v279_v33 = vld [vmem:[%s3508_s25 + $0x38] sm:$0xff] }
  0x35   : > { %v2759_v54 = vcombine.low %v1345_v31, %v1359_v46  ;;  %v1363_v58 = vrot.slane %v1361_v44, 4  ;;  %v1366_v59 = vrot.slane %v1364_v52, 5  ;;  %v1378_v61 = vshll.u32 %v1322_v42, 16  ;;  %v3344_v52 = vld [vmem:[%s4115_s3 + $0x10] sm:$0xff]  }
  0x36   : > { %v305_v0 = vadd.f32 %v3521_v13, %v291_v9  ;;  %v579_v1 = vsel %vm3613_vm8, %v574_v55, %v578_v39  ;;  %v588_v5 = vrot.slane %v587_v57, 4  ;;  %v1384_v6 = vshll.u32 %v3655_v49, 16  ;;  %v3342_v9 = vld [vmem:[%s4115_s3 + $0x8] sm:$0xff]  }
  0x37   : > { %3131 = vmatprep.mubr.bf16.mxu0 %v2759_v54  ;;  %v306_v7 = vadd.f32 %v3521_v13, %v292_v30  ;;  %v1367_v10 = vor.u32 %v1366_v59, %v1363_v58  ;;  %v1372_v11 = vrot.slane %v1370_v53, 5  ;;  %v1377_v14 = vrot.slane %v1375_v60, 4  ;;  %v479_v53 = vld [vmem:[#allocation2 + $0x28] sm:$0xf]  ;;  %v482_v54 = vld [vmem:[#allocation2 + $0x2c] sm:$0x1] }
  0x38   : > { %v1380_v15 = vrot.slane %v1378_v61, 5  ;;  %v593_v16 = vsel %vm3613_vm8, %v588_v5, %v592_v48  ;;  %v1386_v17 = vrot.slane %v1384_v6, 5  ;;  %v312_v19 = vmax.f32 %v3634_v4, 0.0  ;;  %v3343_v59 = vld [vmem:[%s4115_s3 + $0x148] sm:$0xff]   ;;  %v3691_v61 = vld [vmem:[#allocation2 + $0x24] sm:$0x1] }
  0x39   : > { %v595_v20 = vshrl.u32 %v3658_v63, 16  ;;  %v2656_v21 = vcombine.low %v579_v1, %v593_v16  ;;  %v1368_v22 = vrot.slane %v1367_v10, 4  ;;  %v598_v24 = vshll.u32 %v3658_v63, 16  ;;  %v485_v6 = vld [vmem:[#allocation2 + $0x30] sm:$0xf] }
  0x3a   : > { %v1381_v23 = vor.u32 %v1380_v15, %v1377_v14  ;;  %v1628_v26 = vrot.slane %v3620_v56, 5  ;;  %v970_v30 = vrot.slane %v3631_v3, 5  ;;  %v2907_v31 = vpack.c.bf16 %v312_v19, %v312_v19  ;;  %v494_v19 = vld [vmem:[#allocation2 + $0x3c] sm:$0x1]  ;;  %v934_v56 = vld [vmem:[#allocation2 + $0x8] sm:$0xe] }
  0x3b   : > { %v313_v32 = vmax.f32 %v305_v0, 0.0  ;;  %3036 = vmatmul.mubr.bf16.vlgmr.msra.gmra.mrb[0].mxu1 %v2656_v21  ;;  %v974_v37 = vrot.slane %v3636_v8, 5  ;;  %v1373_v4 = vsel %vm3613_vm8, %v1368_v22, %v1372_v11  ;;  %v314_v39 = vmax.f32 %v306_v7, 0.0  ;;  %v488_v7 = vld [vmem:[#allocation2 + $0x34] sm:$0x1] }
  0x3c   : > { %v1382_v38 = vrot.slane %v1381_v23, 4  ;;  %3044 = vmatpush3.bf16.msra.mxu1 %v3570_v45  ;;  %v401_v40 = vshrl.u32 %v2907_v31, 16  ;;  %v404_v42 = vshll.u32 %v2907_v31, 16  ;;  %v3680_v44 = vrot.slane %v595_v20, 4  ;;  %v3346_v20 = vld [vmem:[%s4115_s3 + $0x18] sm:$0xff]  }
  0x3d   : > { %v2908_v46 = vpack.c.bf16 %v313_v32, %v313_v32  ;;  %3045 = vmatprep.subr.bf16.mxu1 %v3342_v9  ;;  %v600_v55 = vrot.slane %v598_v24, 5  ;;  %v2909_v57 = vpack.c.bf16 %v314_v39, %v314_v39  ;;  %v293_v58 = vmul.f32 %v3516_v12, %v279_v33  ;;  %v3708_v33 = vld [vmem:[#allocation2 + $0x8] sm:$0xe] }
  0x3e   : > { %v1387_v48 = vsel %vm3613_vm8, %v1382_v38, %v1386_v17  ;;  %v403_v60 = vrot.slane %v401_v40, 7  ;;  %v1632_v5 = vrot.slane %v3647_v29, 5  ;;  %v491_v17 = vld [vmem:[#allocation2 + $0x38] sm:$0xf]  ;;  %v604_v22 = vshll.u32 %v3691_v61, 16  ;;  %v3348_v38 = vld [vmem:[%s4115_s3 + $0x20] sm:$0xff]  }
  0x3f   : > { %v2760_v45 = vcombine.low %v1373_v4, %v1387_v48  ;;  %v409_v0 = vshrl.u32 %v2908_v46, 16  ;;  %v412_v1 = vshll.u32 %v2908_v46, 16  ;;  %v417_v10 = vshrl.u32 %v2909_v57, 16 }
  0x40   : > { %v420_v11 = vshll.u32 %v2909_v57, 16  ;;  %v307_v14 = vadd.f32 %v3521_v13, %v293_v58  ;;  %3046 = vmatpush3.bf16.msra.mxu1 %v3342_v9  ;;  %v406_v12 = vor.u32 %v404_v42, %v403_v60  ;;  %v407_v15 = vrot.slane %v403_v60, 4  ;;  %v3345_v9 = vld [vmem:[%s4115_s3 + $0x150] sm:$0xff]  }
  0x41   : > { %3132 = vmatmul.mubr.bf16.vlgmr.msra.gmra.mrb[0].mxu0 %v2760_v45  ;;  %v411_v16 = vrot.slane %v409_v0, 7  ;;  %3047 = vmatprep.subr.bf16.mxu1 %v3344_v52  ;;  %v601_v21 = vor.u32 %v600_v55, %v3680_v44  ;;  %v419_v23 = vrot.slane %v417_v10, 7  ;;  %v1636_v4 = vrot.slane %v3655_v49, 5  ;;  %v3347_v44 = vld [vmem:[%s4115_s3 + $0x158] sm:$0xff]   ;;  %v497_v0 = vld [vmem:[#allocation2 + $0x40] sm:$0xf] }
  0x42   : > { %3140 = vmatpush3.bf16.msra.mxu0 %v3576_v50  ;;  %v315_v13 = vmax.f32 %v307_v14, 0.0  ;;  %v480_v24 = vsel %vm3552_vm4, %v406_v12, %v479_v53  ;;  %v483_v50 = vsel %vm3560_vm5, %v407_v15, %v482_v54  ;;  %v3721_v53 = vld [vmem:[#allocation2 + $0x10] sm:$0xe]  ;;  %v3729_v45 = vrot.slane %v604_v22, 5 }
  0x43   : > { %3141 = vmatprep.subr.bf16.mxu0 %v3343_v59  ;;  %v414_v31 = vor.u32 %v412_v1, %v411_v16  ;;  %v415_v32 = vrot.slane %v411_v16, 4  ;;  %481 = vst [vmem:[#allocation2 + $0x28] sm:$0xf] %v480_v24  ;;  %484 = vst [vmem:[#allocation2 + $0x2c] sm:$0x1] %v483_v50  ;;  %v422_v39 = vor.u32 %v420_v11, %v419_v23  ;;  %v423_v40 = vrot.slane %v419_v23, 4 }
  0x44   : > { %v2910_v42 = vpack.c.bf16 %v315_v13, %v315_v13  ;;  %3048 = vmatpush3.bf16.msra.mxu1 %v3344_v52  ;;  %v3727_v58 = vrot.slane %v601_v21, 4  ;;  %v500_v1 = vld [vmem:[#allocation2 + $0x44] sm:$0x1]  ;;  %v2772_v14 = vrot.slane %v3721_v53, 9  ;;  %v3352_v21 = vld [vmem:[%s4115_s3 + $0x30] sm:$0xff]   ;;  %v3351_v13 = vld [vmem:[%s4115_s3 + $0x168] sm:$0xff]  }
  0x45   : > { %v486_v46 = vsel %vm3552_vm4, %v414_v31, %v485_v6  ;;  %v489_v48 = vsel %vm3560_vm5, %v415_v32, %v488_v7  ;;  %3049 = vmatprep.subr.bf16.mxu1 %v3346_v20  ;;  %v492_v54 = vsel %vm3552_vm4, %v422_v39, %v491_v17  ;;  %v495_v52 = vsel %vm3560_vm5, %v423_v40, %v494_v19  ;;  %v3349_v7 = vld [vmem:[%s4115_s3 + $0x160] sm:$0xff]   ;;  %v3362_v49 = vld [vmem:[%s4115_s3 + $0x90] sm:$0xff]  }
  0x46   : > { %3142 = vmatpush3.bf16.msra.mxu0 %v3343_v59  ;;  %487 = vst [vmem:[#allocation2 + $0x30] sm:$0xf] %v486_v46  ;;  %490 = vst [vmem:[#allocation2 + $0x34] sm:$0x1] %v489_v48  ;;  %v425_v55 = vshrl.u32 %v2910_v42, 16  ;;  %v428_v57 = vshll.u32 %v2910_v42, 16  ;;  %v607_v41 = vsel %vm3613_vm8, %v3727_v58, %v3729_v45 }
  0x47   : > { %3143 = vmatprep.subr.bf16.mxu0 %v3345_v9  ;;  %493 = vst [vmem:[#allocation2 + $0x38] sm:$0xf] %v492_v54  ;;  %496 = vst [vmem:[#allocation2 + $0x3c] sm:$0x1] %v495_v52  ;;  %v3350_v59 = vld [vmem:[%s4115_s3 + $0x28] sm:$0xff]   ;;  %v2771_v6 = vrot.slane %v3708_v33, 9 }
  0x48   : > { %v427_v60 = vrot.slane %v425_v55, 7  ;;  %3050 = vmatpush3.bf16.msra.mxu1 %v3346_v20  ;;  %v3354_v58 = vld [vmem:[%s4115_s3 + $0x38] sm:$0xff]  }
  0x49   : > { %3051 = vmatprep.subr.bf16.mxu1 %v3348_v38 }
  0x4a   : > { %3144 = vmatpush3.bf16.msra.mxu0 %v3345_v9  ;;  %v430_v10 = vor.u32 %v428_v57, %v427_v60  ;;  %v431_v11 = vrot.slane %v427_v60, 4  ;;  %v3739_v12 = vld [vmem:[#allocation2 + $0x28] sm:$0xf]  ;;  %v3741_v15 = vld [vmem:[#allocation2 + $0x2c] sm:$0x1] }
  0x4b   : > { %3145 = vmatprep.subr.bf16.mxu0 %v3347_v44  ;;  %v1324_v16 = vld [vmem:[#allocation2 + $0x28] sm:$0xf]  ;;  %v609_v17 = vshrl.u32 %v3739_v12, 16  ;;  %v612_v19 = vshll.u32 %v3739_v12, 16  ;;  %v618_v20 = vshll.u32 %v3741_v15, 16  ;;  %v2669_v43 = vcombine.low %v3658_v63, %v3739_v12  ;;  %v3364_v12 = vld [vmem:[%s4115_s3 + $0x98] sm:$0xff]  }
  0x4c   : > { %v3749_v22 = vld [vmem:[#allocation2 + $0x2c] sm:$0x1]  ;;  %v1389_v23 = vshrl.u32 %v1324_v16, 16  ;;  %3052 = vmatpush3.bf16.msra.mxu1 %v3348_v38  ;;  %v1392_v50 = vshll.u32 %v1324_v16, 16  ;;  %v498_v32 = vsel %vm3552_vm4, %v430_v10, %v497_v0  ;;  %v501_v39 = vsel %vm3560_vm5, %v431_v11, %v500_v1 }
  0x4d   : > { %v1326_v9 = vld [vmem:[#allocation2 + $0x30] sm:$0xf]  ;;  %v3754_v24 = vld [vmem:[#allocation2 + $0x34] sm:$0x1]  ;;  %v1398_v31 = vshll.u32 %v3749_v22, 16  ;;  %3053 = vmatprep.subr.bf16.mxu1 %v3350_v59  ;;  %v611_v40 = vrot.slane %v609_v17, 4 }
  0x4e   : > { %3146 = vmatpush3.bf16.msra.mxu0 %v3347_v44  ;;  %v614_v38 = vrot.slane %v612_v19, 5  ;;  %v620_v42 = vrot.slane %v618_v20, 5  ;;  %v1391_v46 = vrot.slane %v1389_v23, 4  ;;  %v3761_v48 = vld [vmem:[#allocation2 + $0x30] sm:$0xf]  ;;  %v1394_v54 = vrot.slane %v1392_v50, 5 }
  0x4f   : > { %499 = vst [vmem:[#allocation2 + $0x40] sm:$0xf] %v498_v32  ;;  %502 = vst [vmem:[#allocation2 + $0x44] sm:$0x1] %v501_v39  ;;  %3147 = vmatprep.subr.bf16.mxu0 %v3349_v7  ;;  %v1400_v52 = vrot.slane %v1398_v31, 5  ;;  %v1403_v34 = vshrl.u32 %v1326_v9, 16 }
  0x50   : > { %v1406_v55 = vshll.u32 %v1326_v9, 16  ;;  %v3763_v57 = vld [vmem:[#allocation2 + $0x38] sm:$0xf]  ;;  %v615_v44 = vor.u32 %v614_v38, %v611_v40  ;;  %v1412_v60 = vshll.u32 %v3754_v24, 16  ;;  %v3770_v0 = vld [vmem:[#allocation2 + $0x34] sm:$0x1]  ;;  %3054 = vmatpush3.bf16.msra.mxu1 %v3350_v59  ;;  %v1395_v11 = vor.u32 %v1394_v54, %v1391_v46 }
  0x51   : > { %v3772_v1 = vld [vmem:[#allocation2 + $0x3c] sm:$0x1]  ;;  %v623_v10 = vshrl.u32 %v3761_v48, 16  ;;  %v1405_v16 = vrot.slane %v1403_v34, 4  ;;  %v626_v19 = vshll.u32 %v3761_v48, 16  ;;  %3055 = vmatprep.subr.bf16.mxu1 %v3352_v21  ;;  %v632_v50 = vshll.u32 %v3770_v0, 16 }
  0x52   : > { %v1408_v17 = vrot.slane %v1406_v55, 5  ;;  %v1328_v20 = vld [vmem:[#allocation2 + $0x38] sm:$0xf]  ;;  %3148 = vmatpush3.bf16.msra.mxu0 %v3349_v7  ;;  %v616_v45 = vrot.slane %v615_v44, 4  ;;  %v1414_v23 = vrot.slane %v1412_v60, 5  ;;  %v1396_v59 = vrot.slane %v1395_v11, 4 }
  0x53   : > { %v625_v9 = vrot.slane %v623_v10, 4  ;;  %v3780_v31 = vld [vmem:[#allocation2 + $0x3c] sm:$0x1]  ;;  %3149 = vmatprep.subr.bf16.mxu0 %v3351_v13  ;;  %v3353_v39 = vld [vmem:[%s4115_s3 + $0x170] sm:$0xff]   ;;  %v628_v40 = vrot.slane %v626_v19, 5  ;;  %v637_v38 = vshrl.u32 %v3763_v57, 16 }
  0x54   : > { %v1409_v32 = vor.u32 %v1408_v17, %v1405_v16  ;;  %v621_v7 = vsel %vm3613_vm8, %v616_v45, %v620_v42  ;;  %v634_v46 = vrot.slane %v632_v50, 5  ;;  %v640_v54 = vshll.u32 %v3763_v57, 16  ;;  %3056 = vmatpush3.bf16.msra.mxu1 %v3352_v21  ;;  %v3355_v16 = vld [vmem:[%s4115_s3 + $0x178] sm:$0xff]  }
  0x55   : > { %v646_v34 = vshll.u32 %v3772_v1, 16  ;;  %v2657_v55 = vcombine.low %v607_v41, %v621_v7  ;;  %v1401_v44 = vsel %vm3613_vm8, %v1396_v59, %v1400_v52  ;;  %v629_v10 = vor.u32 %v628_v40, %v625_v9  ;;  %v3795_v17 = vld [vmem:[#allocation2 + $0x18] sm:$0xe]  ;;  %3057 = vmatprep.subr.bf16.mxu1 %v3354_v58  ;;  %v3797_v41 = vld [vmem:[#allocation2 + $0x20] sm:$0xe] }
  0x56   : > { %v1410_v60 = vrot.slane %v1409_v32, 4  ;;  %v1330_v11 = vld [vmem:[#allocation2 + $0x40] sm:$0xf]  ;;  %3150 = vmatpush3.bf16.msra.mxu0 %v3351_v13  ;;  %v639_v42 = vrot.slane %v637_v38, 4  ;;  %v642_v19 = vrot.slane %v640_v54, 5  ;;  %v1417_v50 = vshrl.u32 %v1328_v20, 16 }
  0x57   : > { %v648_v45 = vrot.slane %v646_v34, 5  ;;  %3039 = vmatprep.mubr.bf16.mxu1 %v2657_v55  ;;  %3151 = vmatprep.subr.bf16.mxu0 %v3353_v39  ;;  %v630_v21 = vrot.slane %v629_v10, 4  ;;  %v3801_v9 = vld [vmem:[#allocation2 + $0x44] sm:$0x1]  ;;  %v1420_v59 = vshll.u32 %v1328_v20, 16  ;;  %v1426_v32 = vshll.u32 %v3780_v31, 16 }
  0x58   : > { %v1415_v52 = vsel %vm3613_vm8, %v1410_v60, %v1414_v23  ;;  %v3807_v13 = vld [vmem:[%s4115_s3 + $0x80] sm:$0xff]   ;;  %v643_v38 = vor.u32 %v642_v19, %v639_v42  ;;  %v1419_v7 = vrot.slane %v1417_v50, 4  ;;  %v1431_v54 = vshrl.u32 %v1330_v11, 16  ;;  %3058 = vmatpush3.bf16.msra.mxu1 %v3354_v58  ;;  %v3817_v10 = vld [vmem:[#allocation2 + $0x28] sm:$0xe] }
  0x59   : > { %v2761_v40 = vcombine.low %v1401_v44, %v1415_v52  ;;  %v1422_v34 = vrot.slane %v1420_v59, 5  ;;  %v1434_v55 = vshll.u32 %v1330_v11, 16  ;;  %v2773_v20 = vrot.slane %v3795_v17, 9  ;;  %v3825_v11 = vld [vmem:[%s4115_s3 + $0x180] sm:$0xff]   ;;  %v1603_v50 = vld [vmem:[#allocation2 + $0x30] sm:$0xe]  ;;  %3067 = vmatprep.subr.bf16.mxu1 %v3807_v13 }
  0x5a   : > { %v2774_v60 = vrot.slane %v3797_v41, 9  ;;  %v635_v44 = vsel %vm3613_vm8, %v630_v21, %v634_v46  ;;  %v644_v42 = vrot.slane %v643_v38, 4  ;;  %v1433_v19 = vrot.slane %v1431_v54, 4  ;;  %3152 = vmatpush3.bf16.msra.mxu0 %v3353_v39  ;;  %v3828_v59 = vld [vmem:[#allocation2 + $0x38] sm:$0xe] }
  0x5b   : > { %3135 = vmatprep.mubr.bf16.mxu0 %v2761_v40  ;;  %v1440_v58 = vshll.u32 %v3801_v9, 16  ;;  %v1423_v17 = vor.u32 %v1422_v34, %v1419_v7  ;;  %v1428_v52 = vrot.slane %v1426_v32, 5  ;;  %v1436_v41 = vrot.slane %v1434_v55, 5  ;;  %3153 = vmatprep.subr.bf16.mxu0 %v3355_v16  ;;  %v1605_v40 = vld [vmem:[#allocation2 + $0x40] sm:$0xe] }
  0x5c   : > { %v649_v46 = vsel %vm3613_vm8, %v644_v42, %v648_v45  ;;  %v2667_v39 = vcombine.low %v3538_v25, %v3597_v27  ;;  %v1625_v21 = vsel %vm3811_vm11, %v2771_v6, %v1624_v51  ;;  %v1629_v32 = vsel %vm3811_vm11, %v2772_v14, %v1628_v26  ;;  %v933_v25 = vld [vmem:[#allocation2] sm:$0xe] }
  0x5d   : > { %v2658_v38 = vcombine.low %v635_v44, %v649_v46  ;;  %v1424_v45 = vrot.slane %v1423_v17, 4  ;;  %v1437_v7 = vor.u32 %v1436_v41, %v1433_v19  ;;  %v1442_v54 = vrot.slane %v1440_v58, 5  ;;  %v935_v58 = vld [vmem:[#allocation2 + $0x10] sm:$0xe]  ;;  %v3368_v41 = vld [vmem:[%s4115_s3 + $0xa8] sm:$0xff]  }
  0x5e   : > { %3154 = vmatpush3.bf16.msra.mxu0 %v3355_v16  ;;  %v2775_v27 = vrot.slane %v3817_v10, 9  ;;  %v1640_v35 = vrot.slane %v3749_v22, 5  ;;  %v2776_v33 = vrot.slane %v1603_v50, 9  ;;  %v1644_v51 = vrot.slane %v3754_v24, 5  ;;  %v936_v50 = vld [vmem:[#allocation2 + $0x18] sm:$0xe] }
  0x5f   : > { %3040 = vmatmul.mubr.bf16.gmra.mrb[4].mxu1 %v2658_v38  ;;  %v1429_v53 = vsel %vm3613_vm8, %v1424_v45, %v1428_v52  ;;  %v1438_v26 = vrot.slane %v1437_v7, 4  ;;  %3163 = vmatprep.subr.bf16.mxu0 %v3825_v11  ;;  %v2777_v6 = vrot.slane %v3828_v59, 9  ;;  %v2679_v14 = vrot.slane %v933_v25, 9  ;;  %v3367_v59 = vld [vmem:[%s4115_s3 + $0x1a0] sm:$0xff]   ;;  %v3369_v46 = vld [vmem:[%s4115_s3 + $0x1a8] sm:$0xff]   ;;  %v3372_v38 = vld [vmem:[%s4115_s3 + $0x1b0] sm:$0xff]  }
  0x60   : > { %3059 = vmatprep.mubr.bf16.mxu1 %v2667_v39  ;;  %v2680_v16 = vrot.slane %v934_v56, 9  ;;  %v2795_v22 = vcombine.low %v1625_v21, %v1629_v32  ;;  %v1648_v55 = vrot.slane %v3780_v31, 5  ;;  %v2778_v24 = vrot.slane %v1605_v40, 9  ;;  %v3360_v31 = vld [vmem:[%s4115_s3 + $0x88] sm:$0xff]   ;;  %v3371_v39 = vld [vmem:[%s4115_s3 + $0xb0] sm:$0xff]   ;;  %v3374_v40 = vld [vmem:[%s4115_s3 + $0xb8] sm:$0xff]  }
  0x61   : > { %v1443_v34 = vsel %vm3613_vm8, %v1438_v26, %v1442_v54  ;;  %v2668_v44 = vcombine.low %v3624_v62, %v3629_v2  ;;  %v963_v42 = vsel %vm3811_vm11, %v2679_v14, %v962_v18  ;;  %v1652_v17 = vrot.slane %v3801_v9, 5  ;;  %v937_v21 = vld [vmem:[#allocation2 + $0x20] sm:$0xe]  ;;  %v938_v32 = vld [vmem:[#allocation2 + $0x28] sm:$0xe] }
  0x62   : > { %v2762_v10 = vcombine.low %v1429_v53, %v1443_v34  ;;  %v967_v19 = vsel %vm3811_vm11, %v2680_v16, %v966_v36  ;;  %v2681_v62 = vrot.slane %v935_v58, 9  ;;  %v2682_v2 = vrot.slane %v936_v50, 9  ;;  %v1979_v45 = vld [vmem:[#allocation2 + $0x10] sm:$0xf]  ;;  %v1981_v7 = vld [vmem:[#allocation2 + $0x18] sm:$0xf] }
  0x63   : > { %v2703_v52 = vcombine.low %v963_v42, %v967_v19  ;;  %v1633_v18 = vsel %vm3811_vm11, %v2773_v20, %v1632_v5  ;;  %v1637_v28 = vsel %vm3811_vm11, %v2774_v60, %v1636_v4  ;;  %v1641_v3 = vsel %vm3811_vm11, %v2775_v27, %v1640_v35  ;;  %v3366_v20 = vld [vmem:[%s4115_s3 + $0xa0] sm:$0xff]   ;;  %v940_v16 = vld [vmem:[#allocation2 + $0x38] sm:$0xe] }
  0x64   : > { %3136 = vmatmul.mubr.bf16.gmra.mrb[4].mxu0 %v2762_v10  ;;  %v3884_v36 = vsel %vm3811_vm11, %v2681_v62, %v970_v30  ;;  %v3890_v63 = vsel %vm3811_vm11, %v2682_v2, %v974_v37  ;;  %v1645_v30 = vsel %vm3811_vm11, %v2776_v33, %v1644_v51  ;;  %v2796_v8 = vcombine.low %v1633_v18, %v1637_v28  ;;  %v3361_v37 = vld [vmem:[%s4115_s3 + $0x188] sm:$0xff]   ;;  %v939_v33 = vld [vmem:[#allocation2 + $0x30] sm:$0xe]  ;;  %v3378_v2 = vld [vmem:[%s4115_s3 + $0x1c0] sm:$0xff]  }
  0x65   : > { %3155 = vmatprep.mubr.bf16.mxu0 %v2795_v22  ;;  %v2704_v29 = vcombine.low %v3884_v36, %v3890_v63  ;;  %v2797_v5 = vcombine.low %v1641_v3, %v1645_v30  ;;  %v2670_v4 = vcombine.low %v3761_v48, %v3763_v57  ;;  %v1649_v9 = vsel %vm3811_vm11, %v2777_v6, %v1648_v55  ;;  %v3363_v48 = vld [vmem:[%s4115_s3 + $0x190] sm:$0xff]   ;;  %v3365_v57 = vld [vmem:[%s4115_s3 + $0x198] sm:$0xff]   ;;  %v3379_v18 = vld [vmem:[#allocation2 + $0x20] ss:$8 sps:$4 sm:$0xff]  }
  0x66   : > { %v2683_v54 = vrot.slane %v937_v21, 9  ;;  %v978_v25 = vrot.slane %v3691_v61, 5  ;;  %v2684_v27 = vrot.slane %v938_v32, 9  ;;  %v982_v35 = vrot.slane %v3741_v15, 5  ;;  %v3375_v6 = vld [vmem:[%s4115_s3 + $0x1b8] sm:$0xff]   ;;  %v3376_v61 = vld [vmem:[%s4115_s3 + $0xc0] sm:$0xff]  }
  0x67   : > { %3060 = vmatmul.mubr.bf16.vlgmr.msra.gmra.mrb[0].mxu1 %v2668_v44  ;;  %v1996_v51 = vshrl.u32 %v1979_v45, 16  ;;  %v1999_v56 = vshll.u32 %v1979_v45, 16  ;;  %v2010_v53 = vshrl.u32 %v1981_v7, 16  ;;  %v2013_v26 = vshll.u32 %v1981_v7, 16  ;;  %v3954_v22 = vld [vmem:[#allocation2 + $0x14] sm:$0x1] }
  0x68   : > { %3068 = vmatpush3.bf16.msra.mxu1 %v3807_v13  ;;  %3063 = vmatprep.mubr.bf16.mxu1 %v2669_v43  ;;  %v1653_v13 = vsel %vm3811_vm11, %v2778_v24, %v1652_v17  ;;  %v979_v15 = vsel %vm3811_vm11, %v2683_v54, %v978_v25  ;;  %v983_v14 = vsel %vm3811_vm11, %v2684_v27, %v982_v35  ;;  %v2685_v34 = vrot.slane %v939_v33, 9  ;;  %v3956_v55 = vld [vmem:[#allocation2 + $0x1c] sm:$0x1]  ;;  %v3380_v17 = vld [vmem:[%s4115_s3 + $0xc8] sm:$0xff]   ;;  %v3387_v25 = vld [vmem:[%s4115_s3 + $0x1e0] sm:$0xff]  }
  0x69   : > { %3069 = vmatprep.subr.bf16.mxu1 %v3360_v31  ;;  %v2798_v60 = vcombine.low %v1649_v9, %v1653_v13  ;;  %v1998_v24 = vrot.slane %v1996_v51, 4  ;;  %v2001_v10 = vrot.slane %v1999_v56, 5  ;;  %v2012_v44 = vrot.slane %v2010_v53, 4  ;;  %v3381_v28 = vld [vmem:[%s4115_s3 + $0x1c8] sm:$0xff]   ;;  %v1983_v9 = vld [vmem:[#allocation2 + $0x20] sm:$0xf] }
  0x6a   : > { %v2015_v42 = vrot.slane %v2013_v26, 5  ;;  %v2705_v19 = vcombine.low %v979_v15, %v983_v14  ;;  %v986_v58 = vrot.slane %v3770_v0, 5  ;;  %v2686_v50 = vrot.slane %v940_v16, 9  ;;  %v3382_v0 = vld [vmem:[%s4115_s3 + $0xd0] sm:$0xff]   ;;  %v3388_v27 = vld [vmem:[%s4115_s3 + $0xe8] sm:$0xff]  }
  0x6b   : > { %v2019_v62 = vshll.u32 %v3956_v55, 16  ;;  %v2027_v21 = vshll.u32 %v1983_v9, 16  ;;  %v4003_v35 = vld [vmem:[#allocation2 + $0x24] sm:$0x1]  ;;  %v4005_v26 = vld [vmem:[#allocation2 + $0x2c] sm:$0x1] }
  0x6c   : > { %3156 = vmatmul.mubr.bf16.vlgmr.msra.gmra.mrb[0].mxu0 %v2796_v8  ;;  %3070 = vmatpush3.bf16.msra.mxu1 %v3360_v31  ;;  %v990_v31 = vrot.slane %v3772_v1, 5  ;;  %v2002_v1 = vor.u32 %v2001_v10, %v1998_v24  ;;  %v2016_v43 = vor.u32 %v2015_v42, %v2012_v44  ;;  %v987_v3 = vsel %vm3811_vm11, %v2685_v34, %v986_v58  ;;  %v4007_v16 = vld [vmem:[#allocation2 + $0x34] sm:$0x1]  ;;  %v4009_v34 = vld [vmem:[#allocation2 + $0x3c] sm:$0x1]  ;;  %v3389_v42 = vld [vmem:[%s4115_s3 + $0x1e8] sm:$0xff]  }
  0x6d   : > { %3164 = vmatpush3.bf16.msra.mxu0 %v3825_v11  ;;  %3071 = vmatprep.subr.bf16.mxu1 %v3362_v49  ;;  %v3377_v11 = vld [vmem:[#allocation2 + $0x10] ss:$8 sps:$4 sm:$0xff]   ;;  %v2029_v51 = vrot.slane %v2027_v21, 5  ;;  %v1991_v10 = vld [vmem:[#allocation2 + $0x40] sm:$0xf]  ;;  %v2033_v58 = vshll.u32 %v4003_v35, 16 }
  0x6e   : > { %3165 = vmatprep.subr.bf16.mxu0 %v3361_v37  ;;  %3159 = vmatprep.mubr.bf16.mxu0 %v2797_v5  ;;  %v991_v36 = vsel %vm3811_vm11, %v2686_v50, %v990_v31  ;;  %v2003_v8 = vrot.slane %v2002_v1, 4  ;;  %v3396_v5 = vld [vmem:[#allocation2 + $0x8] ss:$8 sps:$4 sm:$0xff]   ;;  %v2047_v31 = vshll.u32 %v4005_v26, 16  ;;  %v2083_v1 = vshll.u32 %v1991_v10, 16 }
  0x6f   : > { %3064 = vmatmul.mubr.bf16.gmra.mrb[4].mxu1 %v2670_v4  ;;  %v2706_v30 = vcombine.low %v987_v3, %v991_v36  ;;  %v3384_v4 = vld [vmem:[%s4115_s3 + $0xd8] sm:$0xff]   ;;  %v3391_v24 = vld [vmem:[%s4115_s3 + $0xf0] sm:$0xff]   ;;  %v1993_v44 = vld [vmem:[#allocation2 + $0x48] sm:$0xf]  ;;  %v2035_v36 = vrot.slane %v2033_v58, 5 }
  0x70   : > { %3072 = vmatpush3.bf16.msra.mxu1 %v3362_v49  ;;  %3083 = vmatprep.mubr.bf16.mxu1 %v2703_v52  ;;  %v2005_v52 = vshll.u32 %v3954_v22, 16  ;;  %v3390_v49 = vld [vmem:[#allocation2 + $0x30] ss:$8 sps:$4 sm:$0xff]  }
  0x71   : > { %3166 = vmatpush3.bf16.msra.mxu0 %v3361_v37  ;;  %3073 = vmatprep.subr.bf16.mxu1 %v3364_v12  ;;  %v2017_v37 = vrot.slane %v2016_v43, 4  ;;  %v2094_v43 = vshrl.u32 %v1993_v44, 16 }
  0x72   : > { %3167 = vmatprep.subr.bf16.mxu0 %v3363_v48  ;;  %v2007_v63 = vrot.slane %v2005_v52, 5  ;;  %v2061_v52 = vshll.u32 %v4007_v16, 16 }
  0x74   : > { %3074 = vmatpush3.bf16.msra.mxu1 %v3364_v12  ;;  %3160 = vmatmul.mubr.bf16.gmra.mrb[4].mxu0 %v2798_v60  ;;  %v3383_v12 = vld [vmem:[%s4115_s3 + $0x1d0] sm:$0xff]   ;;  %v2008_v13 = vsel %vm3613_vm8, %v2003_v8, %v2007_v63  ;;  %v2063_v8 = vrot.slane %v2061_v52, 5 }
  0x75   : > { %3168 = vmatpush3.bf16.msra.mxu0 %v3363_v48  ;;  %3075 = vmatprep.subr.bf16.mxu1 %v3366_v20  ;;  %v1987_v60 = vld [vmem:[#allocation2 + $0x30] sm:$0xf] }
  0x76   : > { %3169 = vmatprep.subr.bf16.mxu0 %v3365_v57  ;;  %3179 = vmatprep.mubr.bf16.mxu0 %v3377_v11  ;;  %v1989_v11 = vld [vmem:[#allocation2 + $0x38] sm:$0xf]  ;;  %v2055_v45 = vshll.u32 %v1987_v60, 16 }
  0x77   : > { %v2066_v7 = vshrl.u32 %v1989_v11, 16  ;;  %v2069_v54 = vshll.u32 %v1989_v11, 16  ;;  %v2265_v11 = vld [vmem:[#allocation2 + $0x30] sm:$0xe] }
  0x78   : > { %3076 = vmatpush3.bf16.msra.mxu1 %v3366_v20  ;;  %v3392_v20 = vld [vmem:[#allocation2 + $0x40] ss:$8 sps:$4 sm:$0xff]  }
  0x79   : > { %3170 = vmatpush3.bf16.msra.mxu0 %v3365_v57  ;;  %3077 = vmatprep.subr.bf16.mxu1 %v3368_v41  ;;  %v1985_v57 = vld [vmem:[#allocation2 + $0x28] sm:$0xf]  ;;  %v2068_v15 = vrot.slane %v2066_v7, 4  ;;  %v2071_v14 = vrot.slane %v2069_v54, 5 }
  0x7a   : > { %3171 = vmatprep.subr.bf16.mxu0 %v3367_v59  ;;  %v2038_v32 = vshrl.u32 %v1985_v57, 16 }
  0x7c   : > { %3078 = vmatpush3.bf16.msra.mxu1 %v3368_v41  ;;  %v3386_v41 = vld [vmem:[%s4115_s3 + $0xe0] sm:$0xff]   ;;  %v2040_v56 = vrot.slane %v2038_v32, 4 }
  0x7d   : > { %3172 = vmatpush3.bf16.msra.mxu0 %v3367_v59  ;;  %3079 = vmatprep.subr.bf16.mxu1 %v3371_v39  ;;  %v2024_v59 = vshrl.u32 %v1983_v9, 16 }
  0x7e   : > { %3173 = vmatprep.subr.bf16.mxu0 %v3369_v46 }
  0x7f   : > { %v2026_v33 = vrot.slane %v2024_v59, 4  ;;  %v3397_v59 = vld [vmem:[#allocation2 + $0x18] ss:$8 sps:$4 sm:$0xff]  }
  0x80   : > { %3080 = vmatpush3.bf16.msra.mxu1 %v3371_v39 }
  0x81   : > { %3174 = vmatpush3.bf16.msra.mxu0 %v3369_v46  ;;  %3081 = vmatprep.subr.bf16.mxu1 %v3374_v40  ;;  %v3385_v46 = vld [vmem:[%s4115_s3 + $0x1d8] sm:$0xff]  }
  0x82   : > { %3175 = vmatprep.subr.bf16.mxu0 %v3372_v38 }
  0x84   : > { %3082 = vmatpush3.bf16.msra.mxu1 %v3374_v40  ;;  %v2041_v40 = vshll.u32 %v1985_v57, 16 }
  0x85   : > { %3176 = vmatpush3.bf16.msra.mxu0 %v3372_v38  ;;  %3091 = vmatprep.subr.bf16.mxu1 %v3376_v61  ;;  %v2052_v38 = vshrl.u32 %v1987_v60, 16  ;;  %v3395_v60 = vld [vmem:[%s4115_s3 + $0x1f8] sm:$0xff]  }
  0x86   : > { %3177 = vmatprep.subr.bf16.mxu0 %v3375_v6  ;;  %v2043_v53 = vrot.slane %v2041_v40, 5  ;;  %v3400_v40 = vld [vmem:[#allocation2 + $0x28] ss:$8 sps:$4 sm:$0xff]  }
  0x87   : > { %3084 = vmatmul.mubr.bf16.vlgmr.msra.gmra.mrb[0].mxu1 %v2704_v29  ;;  %v2021_v29 = vrot.slane %v2019_v62, 5  ;;  %v2072_v62 = vor.u32 %v2071_v14, %v2068_v15  ;;  %v2261_v14 = vld [vmem:[#allocation2 + $0x10] sm:$0xe] }
  0x88   : > { %3092 = vmatpush3.bf16.msra.mxu1 %v3376_v61  ;;  %3087 = vmatprep.mubr.bf16.mxu1 %v2705_v19  ;;  %v2057_v61 = vrot.slane %v2055_v45, 5  ;;  %v2030_v19 = vor.u32 %v2029_v51, %v2026_v33  ;;  %v2044_v50 = vor.u32 %v2043_v53, %v2040_v56  ;;  %v2303_v33 = vrot.slane %v4007_v16, 5 }
  0x89   : > { %3178 = vmatpush3.bf16.msra.mxu0 %v3375_v6  ;;  %3093 = vmatprep.subr.bf16.mxu1 %v3380_v17  ;;  %v2022_v48 = vsel %vm3613_vm8, %v2017_v37, %v2021_v29  ;;  %v2054_v6 = vrot.slane %v2052_v38, 4  ;;  %v2049_v29 = vrot.slane %v2047_v31, 5  ;;  %v2073_v37 = vrot.slane %v2072_v62, 4 }
  0x8a   : > { %3187 = vmatprep.subr.bf16.mxu0 %v3378_v2  ;;  %v2851_v39 = vcombine.low %v2008_v13, %v2022_v48  ;;  %v2031_v3 = vrot.slane %v2030_v19, 4  ;;  %v2045_v63 = vrot.slane %v2044_v50, 4  ;;  %v2085_v13 = vrot.slane %v2083_v1, 5  ;;  %v3401_v19 = vld [vmem:[#allocation2 + $0x38] ss:$8 sps:$4 sm:$0xff]  }
  0x8b   : > { %v2096_v48 = vrot.slane %v2094_v43, 4  ;;  %v2307_v56 = vrot.slane %v4009_v34, 5  ;;  %v2863_v58 = vrot.slane %v2261_v14, 9  ;;  %v2287_v50 = vrot.slane %v3954_v22, 5 }
  0x8c   : > { %3180 = vmatmul.mubr.bf16.vlgmr.msra.gmra.mrb[0].mxu0 %v3379_v18  ;;  %3094 = vmatpush3.bf16.msra.mxu1 %v3380_v17  ;;  %v2058_v17 = vor.u32 %v2057_v61, %v2054_v6  ;;  %v2097_v18 = vshll.u32 %v1993_v44, 16 }
  0x8d   : > { %3188 = vmatpush3.bf16.msra.mxu0 %v3378_v2  ;;  %3095 = vmatprep.subr.bf16.mxu1 %v3382_v0  ;;  %v2075_v2 = vshll.u32 %v4009_v34, 16  ;;  %v2288_v22 = vsel %vm3811_vm11, %v2863_v58, %v2287_v50 }
  0x8e   : > { %3189 = vmatprep.subr.bf16.mxu0 %v3381_v28  ;;  %3183 = vmatprep.mubr.bf16.mxu0 %v3390_v49  ;;  %v3393_v49 = vld [vmem:[%s4115_s3 + $0x1f0] sm:$0xff]   ;;  %v2099_v57 = vrot.slane %v2097_v18, 5  ;;  %v3405_v18 = vld [vmem:[%s4115_s3 + $0x228] sm:$0xff]  }
  0x8f   : > { %3088 = vmatmul.mubr.bf16.gmra.mrb[4].mxu1 %v2706_v30  ;;  %v2059_v30 = vrot.slane %v2058_v17, 4  ;;  %v2291_v17 = vrot.slane %v3956_v55, 5 }
  0x90   : > { %3096 = vmatpush3.bf16.msra.mxu1 %v3382_v0  ;;  %3107 = vmatprep.mubr.bf16.mxu1 %v3396_v5  ;;  %v2080_v0 = vshrl.u32 %v1991_v10, 16  ;;  %v2077_v5 = vrot.slane %v2075_v2, 5  ;;  %v2100_v54 = vor.u32 %v2099_v57, %v2096_v48  ;;  %v2299_v57 = vrot.slane %v4005_v26, 5 }
  0x91   : > { %3190 = vmatpush3.bf16.msra.mxu0 %v3381_v28  ;;  %3097 = vmatprep.subr.bf16.mxu1 %v3384_v4  ;;  %v3394_v28 = vld [vmem:[%s4115_s3 + $0xf8] sm:$0xff]   ;;  %v2064_v38 = vsel %vm3613_vm8, %v2059_v30, %v2063_v8 }
  0x92   : > { %3191 = vmatprep.subr.bf16.mxu0 %v3383_v12  ;;  %v2082_v9 = vrot.slane %v2080_v0, 4  ;;  %v2078_v45 = vsel %vm3613_vm8, %v2073_v37, %v2077_v5  ;;  %v2101_v44 = vrot.slane %v2100_v54, 4  ;;  %v3403_v0 = vld [vmem:[%s4115_s3 + $0x218] sm:$0xff]   ;;  %v2263_v37 = vld [vmem:[#allocation2 + $0x20] sm:$0xe] }
  0x93   : > { %v2853_v6 = vcombine.low %v2064_v38, %v2078_v45  ;;  %v3407_v8 = vld [vmem:[%s4115_s3 + $0x238] sm:$0xff]   ;;  %v2264_v5 = vld [vmem:[#allocation2 + $0x28] sm:$0xe] }
  0x94   : > { %3098 = vmatpush3.bf16.msra.mxu1 %v3384_v4  ;;  %3184 = vmatmul.mubr.bf16.gmra.mrb[4].mxu0 %v3392_v20  ;;  %v4027_v4 = vld [vmem:[#allocation2 + $0x44] sm:$0x1]  ;;  %v2086_v7 = vor.u32 %v2085_v13, %v2082_v9  ;;  %v2295_v13 = vrot.slane %v4003_v35, 5  ;;  %v2866_v48 = vrot.slane %v2264_v5, 9 }
  0x95   : > { %3192 = vmatpush3.bf16.msra.mxu0 %v3383_v12  ;;  %3099 = vmatprep.subr.bf16.mxu1 %v3386_v41  ;;  %v4029_v12 = vld [vmem:[#allocation2 + $0x4c] sm:$0x1]  ;;  %v3398_v20 = vld [vmem:[%s4115_s3 + $0x200] sm:$0xff]   ;;  %v2089_v21 = vshll.u32 %v4027_v4, 16 }
  0x96   : > { %3193 = vmatprep.subr.bf16.mxu0 %v3385_v46  ;;  %3203 = vmatprep.mubr.bf16.mxu0 %v2851_v39  ;;  %v2050_v39 = vsel %vm3613_vm8, %v2045_v63, %v2049_v29  ;;  %v2103_v32 = vshll.u32 %v4029_v12, 16  ;;  %v2087_v10 = vrot.slane %v2086_v7, 4  ;;  %v2315_v63 = vrot.slane %v4029_v12, 5 }
  0x97   : > { %v2091_v61 = vrot.slane %v2089_v21, 5  ;;  %v2865_v12 = vrot.slane %v2263_v37, 9 }
  0x98   : > { %3100 = vmatpush3.bf16.msra.mxu1 %v3386_v41  ;;  %v2266_v41 = vld [vmem:[#allocation2 + $0x38] sm:$0xe]  ;;  %v2105_v15 = vrot.slane %v2103_v32, 5 }
  0x99   : > { %3194 = vmatpush3.bf16.msra.mxu0 %v3385_v46  ;;  %3101 = vmatprep.subr.bf16.mxu1 %v3388_v27  ;;  %v2036_v46 = vsel %vm3613_vm8, %v2031_v3, %v2035_v36  ;;  %v2868_v51 = vrot.slane %v2266_v41, 9  ;;  %v2092_v62 = vsel %vm3613_vm8, %v2087_v10, %v2091_v61  ;;  %v2268_v3 = vld [vmem:[#allocation2 + $0x48] sm:$0xe]  ;;  %v2311_v36 = vrot.slane %v4027_v4, 5 }
  0x9a   : > { %3195 = vmatprep.subr.bf16.mxu0 %v3387_v25  ;;  %v2852_v53 = vcombine.low %v2036_v46, %v2050_v39  ;;  %v2106_v2 = vsel %vm3613_vm8, %v2101_v44, %v2105_v15  ;;  %v2870_v30 = vrot.slane %v2268_v3, 9 }
  0x9b   : > { %v2308_v34 = vsel %vm3811_vm11, %v2868_v51, %v2307_v56  ;;  %v2854_v1 = vcombine.low %v2092_v62, %v2106_v2 }
  0x9c   : > { %3102 = vmatpush3.bf16.msra.mxu1 %v3388_v27  ;;  %v2867_v27 = vrot.slane %v2265_v11, 9  ;;  %v2316_v4 = vsel %vm3811_vm11, %v2870_v30, %v2315_v63  ;;  %v2300_v11 = vsel %vm3811_vm11, %v2866_v48, %v2299_v57 }
  0x9d   : > { %3196 = vmatpush3.bf16.msra.mxu0 %v3387_v25  ;;  %3103 = vmatprep.subr.bf16.mxu1 %v3391_v24  ;;  %v3399_v25 = vld [vmem:[%s4115_s3 + $0x208] sm:$0xff]  }
  0x9e   : > { %3197 = vmatprep.subr.bf16.mxu0 %v3389_v42  ;;  %v2304_v16 = vsel %vm3811_vm11, %v2867_v27, %v2303_v33 }
  0x9f   : > { %v2889_v52 = vcombine.low %v2304_v16, %v2308_v34 }
  0xa0   : > { %3104 = vmatpush3.bf16.msra.mxu1 %v3391_v24  ;;  %v2262_v24 = vld [vmem:[#allocation2 + $0x18] sm:$0xe] }
  0xa1   : > { %3198 = vmatpush3.bf16.msra.mxu0 %v3389_v42  ;;  %3105 = vmatprep.subr.bf16.mxu1 %v3394_v28  ;;  %v3402_v42 = vld [vmem:[%s4115_s3 + $0x210] sm:$0xff]   ;;  %v2864_v31 = vrot.slane %v2262_v24, 9 }
  0xa2   : > { %3199 = vmatprep.subr.bf16.mxu0 %v3393_v49 }
  0xa3   : > { %v2292_v55 = vsel %vm3811_vm11, %v2864_v31, %v2291_v17 }
  0xa4   : > { %3106 = vmatpush3.bf16.msra.mxu1 %v3394_v28  ;;  %v2887_v43 = vcombine.low %v2288_v22, %v2292_v55  ;;  %v3406_v28 = vld [vmem:[%s4115_s3 + $0x230] sm:$0xff]  }
  0xa5   : > { %3200 = vmatpush3.bf16.msra.mxu0 %v3393_v49  ;;  %3235 = vmatprep.subr.bf16.mxu1 %v3398_v20  ;;  %v2267_v49 = vld [vmem:[#allocation2 + $0x40] sm:$0xe] }
  0xa6   : > { %3201 = vmatprep.subr.bf16.mxu0 %v3395_v60  ;;  %v2869_v29 = vrot.slane %v2267_v49, 9 }
  0xa7   : > { %3108 = vmatmul.mubr.bf16.vlgmr.msra.gmra.mrb[0].mxu1 %v3397_v59 }
  0xa8   : > { %3243 = vmatpush3.bf16.msra.mxu1 %v3398_v20  ;;  %3111 = vmatprep.mubr.bf16.mxu1 %v3400_v40  ;;  %v2312_v9 = vsel %vm3811_vm11, %v2869_v29, %v2311_v36 }
  0xa9   : > { %3202 = vmatpush3.bf16.msra.mxu0 %v3395_v60  ;;  %3236 = vmatprep.subr.bf16.mxu1 %v3399_v25  ;;  %v2296_v60 = vsel %vm3811_vm11, %v2865_v12, %v2295_v13 }
  0xaa   : > { %3211 = vmatprep.subr.bf16.mxu0 %v3398_v20  ;;  %v2888_v41 = vcombine.low %v2296_v60, %v2300_v11 }
  0xac   : > { %3204 = vmatmul.mubr.bf16.vlgmr.msra.gmra.mrb[0].mxu0 %v2852_v53  ;;  %3244 = vmatpush3.bf16.msra.mxu1 %v3399_v25 }
  0xad   : > { %3212 = vmatpush3.bf16.msra.mxu0 %v3398_v20  ;;  %3207 = vmatprep.mubr.bf16.mxu0 %v2853_v6  ;;  %v2890_v20 = vcombine.low %v2312_v9, %v2316_v4 }
  0xae   : > { %3213 = vmatprep.subr.bf16.mxu0 %v3399_v25  ;;  %3237 = vmatprep.subr.bf16.mxu1 %v3402_v42 }
  0xaf   : > { %3112 = vmatmul.mubr.bf16.gmra.mrb[4].mxu1 %v3401_v19 }
  0xb0   : > { %3245 = vmatpush3.bf16.msra.mxu1 %v3402_v42  ;;  %3231 = vmatprep.mubr.bf16.mxu1 %v2889_v52 }
  0xb1   : > { %3214 = vmatpush3.bf16.msra.mxu0 %v3399_v25  ;;  %3238 = vmatprep.subr.bf16.mxu1 %v3403_v0 }
  0xb2   : > { %3215 = vmatprep.subr.bf16.mxu0 %v3402_v42 }
  0xb4   : > { %3208 = vmatmul.mubr.bf16.gmra.mrb[4].mxu0 %v2854_v1  ;;  %3246 = vmatpush3.bf16.msra.mxu1 %v3403_v0 }
  0xb5   : > { %3216 = vmatpush3.bf16.msra.mxu0 %v3402_v42  ;;  %3239 = vmatprep.subr.bf16.mxu1 %v3404_v47 }
  0xb6   : > { %3217 = vmatprep.subr.bf16.mxu0 %v3403_v0  ;;  %3227 = vmatprep.mubr.bf16.mxu0 %v2887_v43 }
  0xb8   : > { %3247 = vmatpush3.bf16.msra.mxu1 %v3404_v47 }
  0xb9   : > { %3218 = vmatpush3.bf16.msra.mxu0 %v3403_v0  ;;  %3240 = vmatprep.subr.bf16.mxu1 %v3405_v18 }
  0xba   : > { %3219 = vmatprep.subr.bf16.mxu0 %v3404_v47 }
  0xbc   : > { %3248 = vmatpush3.bf16.msra.mxu1 %v3405_v18 }
  0xbd   : > { %3220 = vmatpush3.bf16.msra.mxu0 %v3404_v47  ;;  %3241 = vmatprep.subr.bf16.mxu1 %v3406_v28 }
  0xbe   : > { %3221 = vmatprep.subr.bf16.mxu0 %v3405_v18 }
  0xc0   : > { %3249 = vmatpush3.bf16.msra.mxu1 %v3406_v28 }
  0xc1   : > { %3222 = vmatpush3.bf16.msra.mxu0 %v3405_v18  ;;  %3242 = vmatprep.subr.bf16.mxu1 %v3407_v8 }
  0xc2   : > { %3223 = vmatprep.subr.bf16.mxu0 %v3406_v28 }
  0xc4   : > { %3250 = vmatpush3.bf16.msra.mxu1 %v3407_v8 }
  0xc5   : > { %3224 = vmatpush3.bf16.msra.mxu0 %v3406_v28 }
  0xc6   : > { %3225 = vmatprep.subr.bf16.mxu0 %v3407_v8 }
  0xc7   : > { %3232 = vmatmul.mubr.bf16.vlgmr.msra.gmra.mrb[8].mxu1 %v2890_v20 }
  0xc9   : > { %3226 = vmatpush3.bf16.msra.mxu0 %v3407_v8 }
  0xcc   : > { %3228 = vmatmul.mubr.bf16.vlgmr.msra.gmra.mrb[0].mxu0 %v2888_v41 }
 0x17a   : > { %v3109_v59 = vpop.f32.mrb[0].mxu1 }
 0x17b   : > { %v1277_v35 = vpop.f32.mrb[1].mxu1 }
 0x17c   : > { %v3110_v46 = vpop.f32.mrb[2].mxu1 }
 0x17d   : > { %v1280_v26 = vpop.f32.mrb[3].mxu1 }
 0x182   : > { %v3113_v39 = vpop.f32.mrb[4].mxu1 }
 0x183   : > { %v1293_v21 = vpop.f32.mrb[5].mxu1 }
 0x184   : > { %v3114_v32 = vpop.f32.mrb[6].mxu1 }
 0x185   : > { %v1296_v40 = vpop.f32.mrb[7].mxu1 }
 0x187   : > { %v3209_v38 = vpop.f32.mrb[4].mxu0 }
 0x188   : > { %v3255_v45 = vadd.f32 %v3209_v38, %v3113_v39  ;;  %v2238_v7 = vpop.f32.mrb[5].mxu0 }
 0x189   : > { %v3257_v54 = vadd.f32 %v2238_v7, %v1293_v21  ;;  %v3210_v23 = vpop.f32.mrb[6].mxu0 }
 0x18a   : > { %v3259_v25 = vadd.f32 %v3210_v23, %v3114_v32  ;;  %v2241_v27 = vpop.f32.mrb[7].mxu0 }
 0x18b   : > { %v3261_v33 = vadd.f32 %v2241_v27, %v1296_v40 }
 0x19a   : > { %v3233_v51 = vpop.f32.mrb[8].mxu1 }
 0x19b   : > { %v3256_v56 = vadd.f32 %v3255_v45, %v3233_v51  ;;  %v2448_v53 = vpop.f32.mrb[9].mxu1 }
 0x19c   : > { %v3258_v6 = vadd.f32 %v3257_v54, %v2448_v53  ;;  %v3234_v61 = vpop.f32.mrb[10].mxu1 }
 0x19d   : > { %2477 = vst [vmem:[%s262_s30 + $0x30] sm:$0xff] %v3256_v56  ;;  %v3260_v15 = vadd.f32 %v3259_v25, %v3234_v61  ;;  %v2451_v14 = vpop.f32.mrb[11].mxu1  ;;  %v2499_v36 = vmul.f32 %v3256_v56, %v3256_v56 }
 0x19e   : > { %2475 = vst [vmem:[%s262_s30 + $0x20] sm:$0xff] %v3258_v6  ;;  %v3262_v24 = vadd.f32 %v3261_v33, %v2451_v14  ;;  %v2497_v47 = vmul.f32 %v3258_v6, %v3258_v6 }
 0x19f   : > { %v3229_v10 = vpop.f32.mrb[0].mxu0  ;;  %2478 = vst [vmem:[%s262_s30 + $0x38] sm:$0xff] %v3260_v15  ;;  %v2500_v30 = vmul.f32 %v3260_v15, %v3260_v15 }
 0x1a0   : > { %v3251_v44 = vadd.f32 %v3229_v10, %v3109_v59  ;;  %v2432_v16 = vpop.f32.mrb[1].mxu0  ;;  %2476 = vst [vmem:[%s262_s30 + $0x28] sm:$0xff] %v3262_v24  ;;  %v2498_v49 = vmul.f32 %v3262_v24, %v3262_v24 }
 0x1a1   : > { %v3252_v34 = vadd.f32 %v2432_v16, %v1277_v35  ;;  %v3230_v42 = vpop.f32.mrb[2].mxu0 }
 0x1a2   : > { %2473 = vst [vmem:[%s262_s30 + $0x10] sm:$0xff] %v3251_v44  ;;  %v3253_v19 = vadd.f32 %v3230_v42, %v3110_v46  ;;  %v2435_v58 = vpop.f32.mrb[3].mxu0  ;;  %v2495_v62 = vmul.f32 %v3251_v44, %v3251_v44 }
 0x1a3   : > { %2471 = vst [vmem:[%s262_s30] sm:$0xff] %v3252_v34  ;;  %v3254_v50 = vadd.f32 %v2435_v58, %v1280_v26  ;;  %v2493_v31 = vmul.f32 %v3252_v34, %v3252_v34 }
 0x1a4   : > { %2474 = vst [vmem:[%s262_s30 + $0x18] sm:$0xff] %v3253_v19  ;;  %v2496_v22 = vmul.f32 %v3253_v19, %v3253_v19 }
 0x1a5   : > { %2472 = vst [vmem:[%s262_s30 + $0x8] sm:$0xff] %v3254_v50  ;;  %v2479_v17 = vadd.f32 %v3254_v50, %v3252_v34  ;;  %v2494_v52 = vmul.f32 %v3254_v50, %v3254_v50 }
 0x1a7   : > { %v2480_v2 = vadd.f32 %v3251_v44, %v2479_v17  ;;  %v2501_v0 = vadd.f32 %v2494_v52, %v2493_v31 }
 0x1a9   : > { %v2502_v55 = vadd.f32 %v2501_v0, %v2495_v62  ;;  %v2481_v1 = vadd.f32 %v3253_v19, %v2480_v2 }
 0x1ab   : > { %v2482_v43 = vadd.f32 %v3258_v6, %v2481_v1  ;;  %v2503_v18 = vadd.f32 %v2502_v55, %v2496_v22 }
 0x1ad   : > { %v2483_v28 = vadd.f32 %v3262_v24, %v2482_v43  ;;  %v2504_v3 = vadd.f32 %v2503_v18, %v2497_v47 }
 0x1af   : > { %v2484_v63 = vadd.f32 %v3256_v56, %v2483_v28  ;;  %v2505_v29 = vadd.f32 %v2504_v3, %v2498_v49 }
 0x1b1   : > { %v2485_v8 = vadd.f32 %v3260_v15, %v2484_v63  ;;  %v2506_v37 = vadd.f32 %v2505_v29, %v2499_v36 }
 0x1b3   : > { %v2486_v5 = vrot.slane %v2485_v8, 4  ;;  %v2507_v9 = vadd.f32 %v2506_v37, %v2500_v30 }
 0x1b5   : > { %v2487_v4 = vadd.f32 %v2486_v5, %v2485_v8  ;;  %v2508_v12 = vrot.slane %v2507_v9, 4 }
 0x1b7   : > { %v2488_v13 = vrot.slane %v2487_v4, 2  ;;  %v2509_v48 = vadd.f32 %v2508_v12, %v2507_v9 }
 0x1b9   : > { %v2489_v57 = vadd.f32 %v2488_v13, %v2487_v4  ;;  %v2510_v20 = vrot.slane %v2509_v48, 2 }
 0x1bb   : > { %v2490_v60 = vrot.slane %v2489_v57, 1  ;;  %v2511_v11 = vadd.f32 %v2510_v20, %v2509_v48 }
 0x1bd   : > { %v2491_v41 = vadd.f32 %v2490_v60, %v2489_v57  ;;  %v2512_v59 = vrot.slane %v2511_v11, 1 }
 0x1bf   : > { %2492 = vst [vmem:[%s265_s8] sm:$0x1] %v2491_v41  ;;  %v2513_v35 = vadd.f32 %v2512_v59, %v2511_v11 }
 0x1c1   : > { %2514 = vst [vmem:[%s268_s11] sm:$0x1] %v2513_v35 }
 0x1c2 PF: > { %s17_s21 = sadd.s32 1, %s3414_s21  }
 0x1c3   : > { %p14_p4 = scmp.ge.s32.totalorder %s17_s21, 4  }
 0x1c5   :  { %16 = sbr.rel (!%p14_p4) target bundleno = 1 (0x1), region = 100 }

// kernel: basic_block_forward.5
= control target key start
LH: loop header
LB: loop body
LE: loop exit
PB: predicated region body
PF: predicated region fallthrough
CT: control target
= control target key end

     0   :  { %s551_s1 = inlined_call_operand.vmem [shape: bf16[128,128], index: 1, kind: input, shape index: {}]   ;;  %s552_s0 = inlined_call_operand.vmem [shape: bf16[128,128], index: 0, kind: input, shape index: {}]   ;;  %s553_s2 = inlined_call_operand.vmem [shape: f32[128,128], index: 2, kind: output, shape index: {0}]   ;;  %s554_s3 = inlined_call_operand.vmem [shape: f32[1,1,128], index: 3, kind: output, shape index: {1}]   ;;  %s555_s4 = inlined_call_operand.vmem [shape: f32[1,1,128], index: 4, kind: output, shape index: {2}]  }
   0x1   :  { %v408_v0 = vld [vmem:[%s551_s1] sm:$0xff]   ;;  %v409_v1 = vld [vmem:[%s551_s1 + $0x8] sm:$0xff]   ;;  %v410_v2 = vld [vmem:[%s551_s1 + $0x10] sm:$0xff]  }
   0x2   :  { %360 = vmatprep.subr.bf16.mxu0 %v408_v0  ;;  %392 = vmatprep.subr.bf16.mxu1 %v408_v0  ;;  %v411_v3 = vld [vmem:[%s551_s1 + $0x18] sm:$0xff]   ;;  %v416_v4 = vld [vmem:[%s552_s0] sm:$0xff]   ;;  %v413_v7 = vld [vmem:[%s551_s1 + $0x28] sm:$0xff]  }
   0x3   :  { %361 = vmatpush3.bf16.msra.mxu0 %v408_v0  ;;  %400 = vmatpush3.bf16.msra.mxu1 %v408_v0  ;;  %v412_v5 = vld [vmem:[%s551_s1 + $0x20] sm:$0xff]   ;;  %v414_v8 = vld [vmem:[%s551_s1 + $0x30] sm:$0xff]   ;;  %v415_v9 = vld [vmem:[%s551_s1 + $0x38] sm:$0xff]  }
   0x4   :  { %362 = vmatprep.subr.bf16.mxu0 %v409_v1  ;;  %393 = vmatprep.subr.bf16.mxu1 %v409_v1  ;;  %v420_v6 = vld [vmem:[%s552_s0 + $0x20] sm:$0xff]   ;;  %v417_v10 = vld [vmem:[%s552_s0 + $0x8] sm:$0xff]   ;;  %v418_v12 = vld [vmem:[%s552_s0 + $0x10] sm:$0xff]  }
   0x5   :  { %376 = vmatprep.mubr.bf16.mxu0 %v416_v4  ;;  %384 = vmatprep.mubr.bf16.mxu1 %v420_v6  ;;  %v421_v11 = vld [vmem:[%s552_s0 + $0x28] sm:$0xff]   ;;  %v422_v13 = vld [vmem:[%s552_s0 + $0x30] sm:$0xff]   ;;  %v419_v14 = vld [vmem:[%s552_s0 + $0x18] sm:$0xff]  }
   0x6   :  { %v423_v15 = vld [vmem:[%s552_s0 + $0x38] sm:$0xff]  }
   0x7   :  { %363 = vmatpush3.bf16.msra.mxu0 %v409_v1  ;;  %401 = vmatpush3.bf16.msra.mxu1 %v409_v1 }
   0x8   :  { %364 = vmatprep.subr.bf16.mxu0 %v410_v2  ;;  %394 = vmatprep.subr.bf16.mxu1 %v410_v2 }
   0xb   :  { %365 = vmatpush3.bf16.msra.mxu0 %v410_v2  ;;  %402 = vmatpush3.bf16.msra.mxu1 %v410_v2 }
   0xc   :  { %366 = vmatprep.subr.bf16.mxu0 %v411_v3  ;;  %395 = vmatprep.subr.bf16.mxu1 %v411_v3 }
   0xf   :  { %367 = vmatpush3.bf16.msra.mxu0 %v411_v3  ;;  %403 = vmatpush3.bf16.msra.mxu1 %v411_v3 }
  0x10   :  { %368 = vmatprep.subr.bf16.mxu0 %v412_v5  ;;  %396 = vmatprep.subr.bf16.mxu1 %v412_v5 }
  0x13   :  { %369 = vmatpush3.bf16.msra.mxu0 %v412_v5  ;;  %404 = vmatpush3.bf16.msra.mxu1 %v412_v5 }
  0x14   :  { %370 = vmatprep.subr.bf16.mxu0 %v413_v7  ;;  %397 = vmatprep.subr.bf16.mxu1 %v413_v7 }
  0x17   :  { %371 = vmatpush3.bf16.msra.mxu0 %v413_v7  ;;  %405 = vmatpush3.bf16.msra.mxu1 %v413_v7 }
  0x18   :  { %372 = vmatprep.subr.bf16.mxu0 %v414_v8  ;;  %398 = vmatprep.subr.bf16.mxu1 %v414_v8 }
  0x1b   :  { %373 = vmatpush3.bf16.msra.mxu0 %v414_v8  ;;  %406 = vmatpush3.bf16.msra.mxu1 %v414_v8 }
  0x1c   :  { %374 = vmatprep.subr.bf16.mxu0 %v415_v9  ;;  %399 = vmatprep.subr.bf16.mxu1 %v415_v9 }
  0x1f   :  { %375 = vmatpush3.bf16.msra.mxu0 %v415_v9  ;;  %407 = vmatpush3.bf16.msra.mxu1 %v415_v9 }
  0x22   :  { %377 = vmatmul.mubr.bf16.vlgmr.msra.gmra.mrb[0].mxu0 %v417_v10  ;;  %385 = vmatmul.mubr.bf16.vlgmr.msra.gmra.mrb[0].mxu1 %v421_v11 }
  0x23   :  { %380 = vmatprep.mubr.bf16.mxu0 %v418_v12  ;;  %388 = vmatprep.mubr.bf16.mxu1 %v422_v13 }
  0x2a   :  { %381 = vmatmul.mubr.bf16.gmra.mrb[4].mxu0 %v419_v14  ;;  %389 = vmatmul.mubr.bf16.gmra.mrb[4].mxu1 %v423_v15 }
  0xf5   :  { %v378_v16 = vpop.f32.mrb[0].mxu0  ;;  %v386_v17 = vpop.f32.mrb[0].mxu1 }
  0xf6   :  { %242 = vst [vmem:[%s553_s2 + $0x10] sm:$0xff] %v378_v16  ;;  %v177_v18 = vpop.f32.mrb[1].mxu0  ;;  %250 = vst [vmem:[%s553_s2 + $0x50] sm:$0xff] %v386_v17  ;;  %v209_v19 = vpop.f32.mrb[1].mxu1  ;;  %v280_v27 = vmul.f32 %v378_v16, %v378_v16  ;;  %v288_v59 = vmul.f32 %v386_v17, %v386_v17 }
  0xf7   :  { %240 = vst [vmem:[%s553_s2] sm:$0xff] %v177_v18  ;;  %v379_v20 = vpop.f32.mrb[2].mxu0  ;;  %248 = vst [vmem:[%s553_s2 + $0x40] sm:$0xff] %v209_v19  ;;  %v387_v21 = vpop.f32.mrb[2].mxu1  ;;  %v278_v24 = vmul.f32 %v177_v18, %v177_v18  ;;  %v286_v53 = vmul.f32 %v209_v19, %v209_v19 }
  0xf8   :  { %243 = vst [vmem:[%s553_s2 + $0x18] sm:$0xff] %v379_v20  ;;  %v180_v22 = vpop.f32.mrb[3].mxu0  ;;  %251 = vst [vmem:[%s553_s2 + $0x58] sm:$0xff] %v387_v21  ;;  %v212_v23 = vpop.f32.mrb[3].mxu1  ;;  %v281_v30 = vmul.f32 %v379_v20, %v379_v20  ;;  %v289_v62 = vmul.f32 %v387_v21, %v387_v21 }
  0xf9   :  { %241 = vst [vmem:[%s553_s2 + $0x8] sm:$0xff] %v180_v22  ;;  %v256_v25 = vadd.f32 %v180_v22, %v177_v18  ;;  %v279_v26 = vmul.f32 %v180_v22, %v180_v22  ;;  %249 = vst [vmem:[%s553_s2 + $0x48] sm:$0xff] %v212_v23  ;;  %v287_v58 = vmul.f32 %v212_v23, %v212_v23 }
  0xfb   :  { %v257_v28 = vadd.f32 %v378_v16, %v256_v25  ;;  %v294_v29 = vadd.f32 %v279_v26, %v278_v24 }
  0xfd   :  { %v295_v31 = vadd.f32 %v294_v29, %v280_v27  ;;  %v382_v32 = vpop.f32.mrb[4].mxu0  ;;  %v258_v33 = vadd.f32 %v379_v20, %v257_v28  ;;  %v390_v34 = vpop.f32.mrb[4].mxu1 }
  0xfe   :  { %246 = vst [vmem:[%s553_s2 + $0x30] sm:$0xff] %v382_v32  ;;  %v193_v35 = vpop.f32.mrb[5].mxu0  ;;  %254 = vst [vmem:[%s553_s2 + $0x70] sm:$0xff] %v390_v34  ;;  %v225_v36 = vpop.f32.mrb[5].mxu1  ;;  %v284_v47 = vmul.f32 %v382_v32, %v382_v32  ;;  %v292_v7 = vmul.f32 %v390_v34, %v390_v34 }
  0xff   :  { %244 = vst [vmem:[%s553_s2 + $0x20] sm:$0xff] %v193_v35  ;;  %v259_v37 = vadd.f32 %v258_v33, %v193_v35  ;;  %v282_v38 = vmul.f32 %v193_v35, %v193_v35  ;;  %v296_v39 = vadd.f32 %v295_v31, %v281_v30  ;;  %v383_v40 = vpop.f32.mrb[6].mxu0  ;;  %252 = vst [vmem:[%s553_s2 + $0x60] sm:$0xff] %v225_v36  ;;  %v391_v41 = vpop.f32.mrb[6].mxu1 }
 0x100   :  { %247 = vst [vmem:[%s553_s2 + $0x38] sm:$0xff] %v383_v40  ;;  %v196_v42 = vpop.f32.mrb[7].mxu0  ;;  %255 = vst [vmem:[%s553_s2 + $0x78] sm:$0xff] %v391_v41  ;;  %v228_v43 = vpop.f32.mrb[7].mxu1  ;;  %v285_v50 = vmul.f32 %v383_v40, %v383_v40  ;;  %v290_v1 = vmul.f32 %v225_v36, %v225_v36  ;;  %v293_v10 = vmul.f32 %v391_v41, %v391_v41 }
 0x101   :  { %v297_v44 = vadd.f32 %v296_v39, %v282_v38  ;;  %245 = vst [vmem:[%s553_s2 + $0x28] sm:$0xff] %v196_v42  ;;  %v260_v45 = vadd.f32 %v259_v37, %v196_v42  ;;  %v283_v46 = vmul.f32 %v196_v42, %v196_v42  ;;  %253 = vst [vmem:[%s553_s2 + $0x68] sm:$0xff] %v228_v43 }
 0x102   :  { %v291_v6 = vmul.f32 %v228_v43, %v228_v43 }
 0x103   :  { %v261_v48 = vadd.f32 %v382_v32, %v260_v45  ;;  %v298_v49 = vadd.f32 %v297_v44, %v283_v46 }
 0x105   :  { %v299_v51 = vadd.f32 %v298_v49, %v284_v47  ;;  %v262_v52 = vadd.f32 %v383_v40, %v261_v48 }
 0x107   :  { %v263_v54 = vadd.f32 %v262_v52, %v209_v19  ;;  %v300_v55 = vadd.f32 %v299_v51, %v285_v50 }
 0x109   :  { %v301_v56 = vadd.f32 %v300_v55, %v286_v53  ;;  %v264_v57 = vadd.f32 %v263_v54, %v212_v23 }
 0x10b   :  { %v265_v60 = vadd.f32 %v386_v17, %v264_v57  ;;  %v302_v61 = vadd.f32 %v301_v56, %v287_v58 }
 0x10d   :  { %v303_v63 = vadd.f32 %v302_v61, %v288_v59  ;;  %v266_v0 = vadd.f32 %v387_v21, %v265_v60 }
 0x10f   :  { %v267_v2 = vadd.f32 %v266_v0, %v225_v36  ;;  %v304_v3 = vadd.f32 %v303_v63, %v289_v62 }
 0x111   :  { %v305_v4 = vadd.f32 %v304_v3, %v290_v1  ;;  %v268_v5 = vadd.f32 %v267_v2, %v228_v43 }
 0x113   :  { %v269_v8 = vadd.f32 %v390_v34, %v268_v5  ;;  %v306_v9 = vadd.f32 %v305_v4, %v291_v6 }
 0x115   :  { %v270_v11 = vadd.f32 %v391_v41, %v269_v8  ;;  %v307_v12 = vadd.f32 %v306_v9, %v292_v7 }
 0x117   :  { %v271_v13 = vrot.slane %v270_v11, 4  ;;  %v308_v14 = vadd.f32 %v307_v12, %v293_v10 }
 0x119   :  { %v272_v15 = vadd.f32 %v271_v13, %v270_v11  ;;  %v309_v16 = vrot.slane %v308_v14, 4 }
 0x11b   :  { %v273_v17 = vrot.slane %v272_v15, 2  ;;  %v310_v18 = vadd.f32 %v309_v16, %v308_v14 }
 0x11d   :  { %v274_v19 = vadd.f32 %v273_v17, %v272_v15  ;;  %v311_v20 = vrot.slane %v310_v18, 2 }
 0x11f   :  { %v275_v21 = vrot.slane %v274_v19, 1  ;;  %v312_v22 = vadd.f32 %v311_v20, %v310_v18 }
 0x121   :  { %v276_v23 = vadd.f32 %v275_v21, %v274_v19  ;;  %v313_v24 = vrot.slane %v312_v22, 1 }
 0x123   :  { %277 = vst [vmem:[%s554_s3] sm:$0x1] %v276_v23  ;;  %v314_v25 = vadd.f32 %v313_v24, %v312_v22 }
 0x125   :  { %315 = vst [vmem:[%s555_s4] sm:$0x1] %v314_v25 }

// kernel: basic_block_forward.7
= control target key start
LH: loop header
LB: loop body
LE: loop exit
PB: predicated region body
PF: predicated region fallthrough
CT: control target
= control target key end

     0   :  { %s466_s0 = inlined_call_operand.vmem [shape: f32[128,128], index: 0, kind: input, shape index: {}]   ;;  %s467_s1 = inlined_call_operand.vmem [shape: f32[1,128], index: 1, kind: input, shape index: {}]   ;;  %s468_s2 = inlined_call_operand.vmem [shape: f32[1,128], index: 2, kind: input, shape index: {}]   ;;  %s469_s3 = inlined_call_operand.vmem [shape: f32[128,128], index: 3, kind: input, shape index: {}]   ;;  %s470_s4 = inlined_call_operand.vmem [shape: f32[1,128], index: 4, kind: input, shape index: {}]   ;;  %s471_s5 = inlined_call_operand.vmem [shape: f32[1,128], index: 5, kind: input, shape index: {}]   ;;  %s472_s6 = inlined_call_operand.vmem [shape: f32[128,128], index: 6, kind: output, shape index: {}]  }
   0x1   :  { %v23_v0 = vld [vmem:[%s466_s0] sm:$0xff]  ;;  %v24_v8 = vld [vmem:[%s466_s0 + $0x8] sm:$0xff]  ;;  %v25_v10 = vld [vmem:[%s466_s0 + $0x10] sm:$0xff] }
   0x2   :  { %v244_v1 = vld [vmem:[%s467_s1] ss:$0 sm:$0xff]  ;;  %v86_v9 = vld [vmem:[%s469_s3 + $0x8] sm:$0xff]  ;;  %v87_v15 = vld [vmem:[%s469_s3 + $0x10] sm:$0xff] }
   0x3   :  { %v249_v2 = vld [vmem:[%s468_s2] ss:$0 sm:$0xff]  ;;  %v46_v3 = vmul.f32 %v244_v1, %v23_v0  ;;  %v47_v12 = vmul.f32 %v244_v1, %v24_v8  ;;  %v48_v14 = vmul.f32 %v244_v1, %v25_v10  ;;  %v26_v16 = vld [vmem:[%s466_s0 + $0x18] sm:$0xff]  ;;  %v28_v24 = vld [vmem:[%s466_s0 + $0x28] sm:$0xff] }
   0x4   :  { %v85_v4 = vld [vmem:[%s469_s3] sm:$0xff]  ;;  %v88_v17 = vld [vmem:[%s469_s3 + $0x18] sm:$0xff]  ;;  %v49_v20 = vmul.f32 %v244_v1, %v26_v16  ;;  %v90_v29 = vld [vmem:[%s469_s3 + $0x28] sm:$0xff]  ;;  %v51_v38 = vmul.f32 %v244_v1, %v28_v24 }
   0x5   :  { %v258_v5 = vld [vmem:[%s470_s4] ss:$0 sm:$0xff]  ;;  %v69_v11 = vadd.f32 %v249_v2, %v46_v3  ;;  %v70_v25 = vadd.f32 %v249_v2, %v47_v12  ;;  %v71_v27 = vadd.f32 %v249_v2, %v48_v14  ;;  %v29_v34 = vld [vmem:[%s466_s0 + $0x30] sm:$0xff]  ;;  %v30_v44 = vld [vmem:[%s466_s0 + $0x38] sm:$0xff] }
   0x6   :  { %v263_v6 = vld [vmem:[%s471_s5] ss:$0 sm:$0xff]  ;;  %v108_v7 = vmul.f32 %v258_v5, %v85_v4  ;;  %v109_v13 = vmul.f32 %v258_v5, %v86_v9  ;;  %v110_v19 = vmul.f32 %v258_v5, %v87_v15  ;;  %v111_v21 = vmul.f32 %v258_v5, %v88_v17  ;;  %v91_v39 = vld [vmem:[%s469_s3 + $0x30] sm:$0xff]  ;;  %v92_v45 = vld [vmem:[%s469_s3 + $0x38] sm:$0xff] }
   0x7   :  { %v27_v22 = vld [vmem:[%s466_s0 + $0x20] sm:$0xff]  ;;  %v72_v32 = vadd.f32 %v249_v2, %v49_v20  ;;  %v113_v43 = vmul.f32 %v258_v5, %v90_v29  ;;  %v74_v48 = vadd.f32 %v249_v2, %v51_v38  ;;  %v52_v49 = vmul.f32 %v244_v1, %v29_v34  ;;  %v32_v56 = vld [vmem:[%s466_s0 + $0x48] sm:$0xff]  ;;  %v33_v4 = vld [vmem:[%s466_s0 + $0x50] sm:$0xff] }
   0x8   :  { %v131_v18 = vadd.f32 %v263_v6, %v108_v7  ;;  %v89_v23 = vld [vmem:[%s469_s3 + $0x20] sm:$0xff]  ;;  %v132_v26 = vadd.f32 %v263_v6, %v109_v13  ;;  %v50_v28 = vmul.f32 %v244_v1, %v27_v22  ;;  %v133_v31 = vadd.f32 %v263_v6, %v110_v19  ;;  %v94_v3 = vld [vmem:[%s469_s3 + $0x48] sm:$0xff]  ;;  %v34_v12 = vld [vmem:[%s466_s0 + $0x58] sm:$0xff] }
   0x9   :  { %v134_v33 = vadd.f32 %v263_v6, %v111_v21  ;;  %v112_v37 = vmul.f32 %v258_v5, %v89_v23  ;;  %v31_v50 = vld [vmem:[%s466_s0 + $0x40] sm:$0xff]  ;;  %v136_v54 = vadd.f32 %v263_v6, %v113_v43  ;;  %v114_v55 = vmul.f32 %v258_v5, %v91_v39  ;;  %v96_v17 = vld [vmem:[%s469_s3 + $0x58] sm:$0xff]  ;;  %v37_v34 = vld [vmem:[%s466_s0 + $0x70] sm:$0xff] }
   0xa   :  { %v147_v30 = vadd.f32 %v131_v18, %v69_v11  ;;  %v148_v35 = vadd.f32 %v132_v26, %v70_v25  ;;  %v73_v36 = vadd.f32 %v249_v2, %v50_v28  ;;  %v149_v41 = vadd.f32 %v133_v31, %v71_v27  ;;  %v93_v51 = vld [vmem:[%s469_s3 + $0x40] sm:$0xff]  ;;  %v95_v11 = vld [vmem:[%s469_s3 + $0x50] sm:$0xff]  ;;  %v36_v28 = vld [vmem:[%s466_s0 + $0x68] sm:$0xff] }
   0xb   :  { %v150_v42 = vadd.f32 %v134_v33, %v72_v32  ;;  %v135_v47 = vadd.f32 %v263_v6, %v112_v37  ;;  %v75_v58 = vadd.f32 %v249_v2, %v52_v49  ;;  %v53_v59 = vmul.f32 %v244_v1, %v30_v44  ;;  %v35_v22 = vld [vmem:[%s466_s0 + $0x60] sm:$0xff]  ;;  %v98_v33 = vld [vmem:[%s469_s3 + $0x68] sm:$0xff]  ;;  %v99_v43 = vld [vmem:[%s469_s3 + $0x70] sm:$0xff] }
   0xc   :  { %v163_v40 = vmax.f32 %v147_v30, 0.0  ;;  %v164_v46 = vmax.f32 %v148_v35, 0.0  ;;  %v165_v52 = vmax.f32 %v149_v41, 0.0  ;;  %v115_v60 = vmul.f32 %v258_v5, %v92_v45  ;;  %v97_v27 = vld [vmem:[%s469_s3 + $0x60] sm:$0xff]  ;;  %v100_v49 = vld [vmem:[%s469_s3 + $0x78] sm:$0xff] }
   0xd   :  { %v166_v53 = vmax.f32 %v150_v42, 0.0  ;;  %v151_v57 = vadd.f32 %v135_v47, %v73_v36  ;;  %v152_v61 = vadd.f32 %v136_v54, %v74_v48  ;;  %v137_v62 = vadd.f32 %v263_v6, %v114_v55  ;;  %v38_v48 = vld [vmem:[%s466_s0 + $0x78] sm:$0xff] }
   0xe   :  { %179 = vst [vmem:[%s472_s6] sm:$0xff] %v163_v40  ;;  %180 = vst [vmem:[%s472_s6 + $0x8] sm:$0xff] %v164_v46  ;;  %v54_v63 = vmul.f32 %v244_v1, %v31_v50  ;;  %v116_v0 = vmul.f32 %v258_v5, %v93_v51  ;;  %v76_v8 = vadd.f32 %v249_v2, %v53_v59 }
   0xf   :  { %181 = vst [vmem:[%s472_s6 + $0x10] sm:$0xff] %v165_v52  ;;  %182 = vst [vmem:[%s472_s6 + $0x18] sm:$0xff] %v166_v53  ;;  %v167_v7 = vmax.f32 %v151_v57, 0.0  ;;  %v138_v9 = vadd.f32 %v263_v6, %v115_v60  ;;  %v55_v10 = vmul.f32 %v244_v1, %v32_v56  ;;  %v168_v13 = vmax.f32 %v152_v61, 0.0 }
  0x10   :  { %v153_v14 = vadd.f32 %v137_v62, %v75_v58  ;;  %v77_v15 = vadd.f32 %v249_v2, %v54_v63  ;;  %v139_v16 = vadd.f32 %v263_v6, %v116_v0  ;;  %v117_v20 = vmul.f32 %v258_v5, %v94_v3 }
  0x11   :  { %183 = vst [vmem:[%s472_s6 + $0x20] sm:$0xff] %v167_v7  ;;  %v154_v18 = vadd.f32 %v138_v9, %v76_v8  ;;  %v78_v19 = vadd.f32 %v249_v2, %v55_v10  ;;  %v56_v21 = vmul.f32 %v244_v1, %v33_v4  ;;  %184 = vst [vmem:[%s472_s6 + $0x28] sm:$0xff] %v168_v13 }
  0x12   :  { %v169_v23 = vmax.f32 %v153_v14, 0.0  ;;  %v155_v24 = vadd.f32 %v139_v16, %v77_v15  ;;  %v118_v25 = vmul.f32 %v258_v5, %v95_v11  ;;  %v57_v26 = vmul.f32 %v244_v1, %v34_v12 }
  0x13   :  { %v170_v29 = vmax.f32 %v154_v18, 0.0  ;;  %v140_v30 = vadd.f32 %v263_v6, %v117_v20  ;;  %v79_v31 = vadd.f32 %v249_v2, %v56_v21  ;;  %v119_v32 = vmul.f32 %v258_v5, %v96_v17 }
  0x14   :  { %185 = vst [vmem:[%s472_s6 + $0x30] sm:$0xff] %v169_v23  ;;  %v171_v35 = vmax.f32 %v155_v24, 0.0  ;;  %v141_v36 = vadd.f32 %v263_v6, %v118_v25  ;;  %v80_v37 = vadd.f32 %v249_v2, %v57_v26  ;;  %v58_v38 = vmul.f32 %v244_v1, %v35_v22 }
  0x15   :  { %186 = vst [vmem:[%s472_s6 + $0x38] sm:$0xff] %v170_v29  ;;  %v156_v39 = vadd.f32 %v140_v30, %v78_v19  ;;  %v142_v40 = vadd.f32 %v263_v6, %v119_v32  ;;  %v120_v41 = vmul.f32 %v258_v5, %v97_v27  ;;  %v59_v42 = vmul.f32 %v244_v1, %v36_v28 }
  0x16   :  { %187 = vst [vmem:[%s472_s6 + $0x40] sm:$0xff] %v171_v35  ;;  %v157_v44 = vadd.f32 %v141_v36, %v79_v31  ;;  %v81_v45 = vadd.f32 %v249_v2, %v58_v38  ;;  %v121_v46 = vmul.f32 %v258_v5, %v98_v33  ;;  %v60_v47 = vmul.f32 %v244_v1, %v37_v34 }
  0x17   :  { %v172_v50 = vmax.f32 %v156_v39, 0.0  ;;  %v158_v51 = vadd.f32 %v142_v40, %v80_v37  ;;  %v143_v52 = vadd.f32 %v263_v6, %v120_v41  ;;  %v82_v53 = vadd.f32 %v249_v2, %v59_v42 }
  0x18   :  { %v173_v54 = vmax.f32 %v157_v44, 0.0  ;;  %v144_v55 = vadd.f32 %v263_v6, %v121_v46  ;;  %v83_v56 = vadd.f32 %v249_v2, %v60_v47  ;;  %v122_v57 = vmul.f32 %v258_v5, %v99_v43 }
  0x19   :  { %188 = vst [vmem:[%s472_s6 + $0x48] sm:$0xff] %v172_v50  ;;  %v174_v58 = vmax.f32 %v158_v51, 0.0  ;;  %v159_v59 = vadd.f32 %v143_v52, %v81_v45  ;;  %v61_v60 = vmul.f32 %v244_v1, %v38_v48  ;;  %v123_v61 = vmul.f32 %v258_v5, %v100_v49 }
  0x1a   :  { %189 = vst [vmem:[%s472_s6 + $0x50] sm:$0xff] %v173_v54  ;;  %v160_v62 = vadd.f32 %v144_v55, %v82_v53  ;;  %v145_v63 = vadd.f32 %v263_v6, %v122_v57 }
  0x1b   :  { %190 = vst [vmem:[%s472_s6 + $0x58] sm:$0xff] %v174_v58  ;;  %v175_v0 = vmax.f32 %v159_v59, 0.0  ;;  %v84_v3 = vadd.f32 %v249_v2, %v61_v60  ;;  %v146_v4 = vadd.f32 %v263_v6, %v123_v61 }
  0x1c   :  { %v176_v7 = vmax.f32 %v160_v62, 0.0  ;;  %v161_v1 = vadd.f32 %v145_v63, %v83_v56 }
  0x1d   :  { %191 = vst [vmem:[%s472_s6 + $0x60] sm:$0xff] %v175_v0  ;;  %v162_v5 = vadd.f32 %v146_v4, %v84_v3 }
  0x1e   :  { %192 = vst [vmem:[%s472_s6 + $0x68] sm:$0xff] %v176_v7  ;;  %v177_v8 = vmax.f32 %v161_v1, 0.0 }
  0x1f   :  { %v178_v9 = vmax.f32 %v162_v5, 0.0 }
  0x20   :  { %193 = vst [vmem:[%s472_s6 + $0x70] sm:$0xff] %v177_v8 }
  0x21   :  { %194 = vst [vmem:[%s472_s6 + $0x78] sm:$0xff] %v178_v9 }

</bundles_post_ra>
